<compile_context>
chip_gen: v6e
topology: v6e:2x2x1
jax: 0.10.0
libtpu: 0.0.40
codegen_flags: <defaults>
</compile_context>

<pallas_src>
import functools

import jax
import jax.numpy as jnp
from jax.experimental import pallas as pl
from jax.experimental.pallas import tpu as pltpu  # noqa: F401  (TPU backend assumed)

# ----------------------------- configuration (small demo shapes) ------------------
INPUT_FEATURE = 32
HIDDEN_FEATURE = 32
OUT_FEATURES = 4
NUM_HEADS = 2
HEAD_DIM = HIDDEN_FEATURE // NUM_HEADS
LEAKY_SLOPE = 0.2
EPS = 1e-5
NEG_BIG = -1e30
EDGE_TYPE_COUNT = 9

# (src_type, relation, dst_type) — metadata for to_hetero
RELATIONS = (
    ("word", "seq", "word"),
    ("dep", "to", "word"),
    ("tag", "to", "word"),
    ("word", "rev", "dep"),
    ("word", "rev", "tag"),
)
NODE_TYPES = ("word", "dep", "tag")


# ================================= kernel helpers =================================

def _gat_relation_compute(xs, xd, w, wa_src_t, wa_dst, adj):
    """One GAT relation (bipartite, 2 heads, dense masked softmax), all as values.

    xs [Ns, Fin], xd [Nd, Fin], w [Fin, H*Dh], wa_src_t [H, Fin], wa_dst [Fin, H],
    adj [Nd, Ns] (0.0 => no edge).  Returns [Nd, H*Dh] (lane-dense).
    """
    f32 = jnp.float32
    hs = jnp.dot(xs, w, preferred_element_type=f32)                         # [Ns, H*Dh]
    # Both heads' logits from single matmuls; source logits directly as a row.
    e_src = jax.lax.dot_general(wa_src_t, xs, (((1,), (1,)), ((), ())),
                                preferred_element_type=f32)                 # [H, Ns]
    e_dst = jnp.dot(xd, wa_dst, preferred_element_type=f32)                 # [Nd, H]

    edge_mask = adj > 0.0
    lane = jax.lax.broadcasted_iota(jnp.int32, (1, NUM_HEADS * HEAD_DIM), 1)

    out = None
    for h in range(NUM_HEADS):
        scores = e_dst[:, h:h + 1] + e_src[h:h + 1, :]                      # [Nd, Ns]
        scores = jnp.where(scores >= 0.0, scores, LEAKY_SLOPE * scores)     # LeakyReLU
        scores = jnp.where(edge_mask, scores, NEG_BIG)                      # mask BEFORE max
        m = jnp.max(scores, axis=-1, keepdims=True)
        # TODO(synk): edge weight scaling of the un-normalized attention is an
        # assumed GATConv variant (HeteroGat internals not provided).
        p = jnp.exp(scores - m) * adj
        denom = jnp.sum(p, axis=-1, keepdims=True)
        denom = jnp.where(denom > 0.0, denom, 1.0)
        alpha = p * pl.reciprocal(denom, approx=True)                       # EUP divide
        # Keep the value matmul full-width (lane-dense) via a per-head lane mask.
        head_mask = jnp.logical_and(lane >= h * HEAD_DIM, lane < (h + 1) * HEAD_DIM)
        hs_h = jnp.where(head_mask, hs, 0.0)                                # [Ns, H*Dh]
        contrib = jnp.dot(alpha, hs_h, preferred_element_type=f32)          # [Nd, H*Dh]
        out = contrib if out is None else out + contrib
    return out


def _pairnorm_compute(x, M):
    """PairNorm (scale=1), per graph, using the one-hot batch matrix M [B, N]."""
    f32 = jnp.float32
    cnt = jnp.sum(M, axis=-1, keepdims=True)                                # [B, 1]
    inv_cnt = pl.reciprocal(cnt)                                            # cnt > 0
    mean = jnp.dot(M, x, preferred_element_type=f32) * inv_cnt              # [B, F]
    xc = x - jnp.dot(M.T, mean, preferred_element_type=f32)                 # [N, F]
    n2 = jnp.sum(xc * xc, axis=-1, keepdims=True)                           # [N, 1]
    mn2 = jnp.dot(M, n2, preferred_element_type=f32) * inv_cnt              # [B, 1]
    scale = jax.lax.rsqrt(mn2 + EPS)                                        # PyG eps placement
    return xc * jnp.dot(M.T, scale, preferred_element_type=f32)


# ================================= Pallas kernels =================================

def _gat_layer_kernel(*refs, with_pairnorm):
    """Fused hetero GAT layer: all relations, sum-aggregated per dst node type,
    optionally followed by per-graph PairNorm.  Single full-width store per output.

    refs layout:
      [x_word, x_dep, x_tag]
      + 5 * [w, wa_src_t, wa_dst, adj]
      + ( [M_word, M_dep, M_tag] if with_pairnorm )
      + [out_word, out_dep, out_tag]
    """
    x_by_type = {"word": refs[0][...], "dep": refs[1][...], "tag": refs[2][...]}

    rel_base = 3
    pn_base = rel_base + 4 * len(RELATIONS)
    out_base = pn_base + (3 if with_pairnorm else 0)

    acc = {nt: None for nt in NODE_TYPES}
    for r, (src, _, dst) in enumerate(RELATIONS):
        w = refs[rel_base + 4 * r][...]
        wa_src_t = refs[rel_base + 4 * r + 1][...]
        wa_dst = refs[rel_base + 4 * r + 2][...]
        adj = refs[rel_base + 4 * r + 3][...]
        y = _gat_relation_compute(x_by_type[src], x_by_type[dst],
                                  w, wa_src_t, wa_dst, adj)
        acc[dst] = y if acc[dst] is None else acc[dst] + y

    for i, nt in enumerate(NODE_TYPES):
        y = acc[nt]
        if with_pairnorm:
            y = _pairnorm_compute(y, refs[pn_base + i][...])
        out_ref = refs[out_base + i]
        out_ref[...] = y.astype(out_ref.dtype)


def _pool_head_kernel(x_ref, m_ref, mpw_ref, mpb_ref, w1_ref, b1_ref,
                      w2_ref, b2_ref, g_ref, beta_ref, w3_ref, b3_ref, out_ref):
    """MemPooling(clusters=1) + Linear, then relu(linear_1) ->
    relu(batch_norm_1(linear_2)) -> output_layer, fused in one kernel."""
    f32 = jnp.float32
    x = x_ref[...]                                                          # [N, F]
    M = m_ref[...]                                                          # [B, N]
    # MemPooling with num_clusters=1: the cluster softmax is identically 1, so the
    # Student-t distance block is dead compute and pooling is a per-graph sum.
    pooled = jnp.dot(M, x, preferred_element_type=f32)                      # [B, F]
    xp = jnp.dot(pooled, mpw_ref[...], preferred_element_type=f32) + mpb_ref[...]
    h1 = jnp.maximum(jnp.dot(xp, w1_ref[...], preferred_element_type=f32)
                     + b1_ref[...], 0.0)
    h2 = jnp.dot(h1, w2_ref[...], preferred_element_type=f32) + b2_ref[...]
    mean = jnp.mean(h2, axis=0, keepdims=True)
    var = jnp.mean((h2 - mean) * (h2 - mean), axis=0, keepdims=True)        # biased (train)
    h2n = (h2 - mean) * jax.lax.rsqrt(var + EPS)
    h3 = jnp.maximum(g_ref[...] * h2n + beta_ref[...], 0.0)
    out_ref[...] = (jnp.dot(h3, w3_ref[...], preferred_element_type=f32)
                    + b3_ref[...]).astype(out_ref.dtype)


# ================================= wrappers =================================

def _fold_attention(w, a_src, a_dst):
    """Fold the per-head attention vectors into the projection (parameter glue).

    w [Fin, H*Dh], a_* [H*Dh]  ->  wa_src_t [H, Fin], wa_dst [Fin, H]
    """
    w3 = w.reshape(w.shape[0], NUM_HEADS, HEAD_DIM)
    a_s = a_src.reshape(NUM_HEADS, HEAD_DIM)
    a_d = a_dst.reshape(NUM_HEADS, HEAD_DIM)
    wa_src_t = jnp.einsum("fhd,hd->hf", w3, a_s)
    wa_dst = jnp.einsum("fhd,hd->fh", w3, a_d)
    return wa_src_t, wa_dst


def hetero_gat_layer(layer_params, x_dict, adj_w, batch_onehot=None):
    """to_hetero semantics: per-relation GAT, sum-aggregate at the dst node type.
    One fused pallas_call for the whole layer (+ optional fused PairNorm)."""
    with_pairnorm = batch_onehot is not None
    inputs = [x_dict[nt] for nt in NODE_TYPES]
    for rel in RELATIONS:
        w, a_src, a_dst = layer_params[rel]
        wa_src_t, wa_dst = _fold_attention(w, a_src, a_dst)
        inputs += [w, wa_src_t, wa_dst, adj_w[rel]]
    if with_pairnorm:
        inputs += [batch_onehot[nt] for nt in NODE_TYPES]

    out_shapes = tuple(
        jax.ShapeDtypeStruct((x_dict[nt].shape[0], HIDDEN_FEATURE), jnp.float32)
        for nt in NODE_TYPES)
    kern = functools.partial(_gat_layer_kernel, with_pairnorm=with_pairnorm)
    outs = pl.pallas_call(kern, out_shape=out_shapes)(*inputs)
    return dict(zip(NODE_TYPES, outs))


def pool_and_head(x_word, m_word, params):
    # params["mempool"][0] (cluster keys) does not affect the output when
    # num_clusters == 1 (assignment is identically 1), so it is not passed in.
    _, mp_w, mp_b = params["mempool"]
    num_graphs = m_word.shape[0]
    return pl.pallas_call(
        _pool_head_kernel,
        out_shape=jax.ShapeDtypeStruct((num_graphs, OUT_FEATURES), jnp.float32),
    )(x_word, m_word, mp_w, mp_b.reshape(1, -1),
      params["lin1_w"], params["lin1_b"].reshape(1, -1),
      params["lin2_w"], params["lin2_b"].reshape(1, -1),
      params["bn_g"].reshape(1, -1), params["bn_b"].reshape(1, -1),
      params["out_w"], params["out_b"].reshape(1, -1))


def hetero_deep_graph_embedding4_forward(params, word_x, dep_ids, tag_ids,
                                         adj, batch_onehot):
    # ---- preprocess_data: embedding lookup for 'dep' / 'tag' node types (glue) ----
    x_dict = {
        "word": word_x,
        "dep": jnp.take(params["dep_emb"], dep_ids, axis=0),
        "tag": jnp.take(params["tag_emb"], tag_ids, axis=0),
    }
    # ---- update_weights: edge_attr * pw1[i] (pw1 frozen, all ones) ----
    adj_w = {rel: adj[rel] * params["pw1"][i] for i, rel in enumerate(RELATIONS)}
    # ---- hetero_gat_1 + PairNorm (fused into one kernel) ----
    x_dict = hetero_gat_layer(params["gat1"], x_dict, adj_w, batch_onehot)
    # ---- hetero_gat_2 (fused into one kernel) ----
    x_dict = hetero_gat_layer(params["gat2"], x_dict, adj_w)
    # ---- mem_pool on 'word' nodes + fused MLP head (one kernel) ----
    out = pool_and_head(x_dict["word"], batch_onehot["word"], params)
    return out, x_dict


# ================================= setup helpers =================================

def init_params(key):
    keys = iter(jax.random.split(key, 128))

    def dense(shape, scale=0.1):
        return (scale * jax.random.normal(next(keys), shape)).astype(jnp.float32)

    def gat_layer(fin):
        lp = {}
        for rel in RELATIONS:
            lp[rel] = (dense((fin, NUM_HEADS * HEAD_DIM)),
                       dense((NUM_HEADS * HEAD_DIM,)),
                       dense((NUM_HEADS * HEAD_DIM,)))
        return lp

    params = {
        "dep_emb": dense((45, INPUT_FEATURE)),
        "tag_emb": dense((50, INPUT_FEATURE)),
        "gat1": gat_layer(INPUT_FEATURE),
        "gat2": gat_layer(HIDDEN_FEATURE),
        "mempool": (dense((NUM_HEADS * 1, HIDDEN_FEATURE)),     # keys (unused: K == 1)
                    dense((HIDDEN_FEATURE, HIDDEN_FEATURE)),
                    dense((HIDDEN_FEATURE,))),
        "lin1_w": dense((HIDDEN_FEATURE, HIDDEN_FEATURE)),
        "lin1_b": dense((HIDDEN_FEATURE,)),
        "lin2_w": dense((HIDDEN_FEATURE, HIDDEN_FEATURE)),
        "lin2_b": dense((HIDDEN_FEATURE,)),
        "bn_g": jnp.ones((HIDDEN_FEATURE,), jnp.float32),
        "bn_b": jnp.zeros((HIDDEN_FEATURE,), jnp.float32),
        "out_w": dense((HIDDEN_FEATURE, OUT_FEATURES)),
        "out_b": dense((OUT_FEATURES,)),
        "pw1": jnp.ones((EDGE_TYPE_COUNT,), jnp.float32),       # frozen edge weights
    }
    return params


def build_graph(n_graphs, nw, nd, nt):
    Nw, Nd, Nt = n_graphs * nw, n_graphs * nd, n_graphs * nt
    a_ww = jnp.zeros((Nw, Nw), jnp.float32)
    a_dw = jnp.zeros((Nw, Nd), jnp.float32)   # dst=word, src=dep
    a_tw = jnp.zeros((Nw, Nt), jnp.float32)
    a_wd = jnp.zeros((Nd, Nw), jnp.float32)
    a_wt = jnp.zeros((Nt, Nw), jnp.float32)
    for g in range(n_graphs):
        ow, od, ot = g * nw, g * nd, g * nt
        for i in range(nw - 1):                      # sequential word<->word edges
            a_ww = a_ww.at[ow + i + 1, ow + i].set(1.0)
            a_ww = a_ww.at[ow + i, ow + i + 1].set(1.0)
        for j in range(nd):                          # dep <-> word edges
            w = ow + (j % nw)
            a_dw = a_dw.at[w, od + j].set(1.0)
            a_wd = a_wd.at[od + j, w].set(1.0)
        for j in range(nt):                          # tag <-> word edges
            w = ow + ((j + 2) % nw)
            a_tw = a_tw.at[w, ot + j].set(1.0)
            a_wt = a_wt.at[ot + j, w].set(1.0)
    adj = {
        ("word", "seq", "word"): a_ww,
        ("dep", "to", "word"): a_dw,
        ("tag", "to", "word"): a_tw,
        ("word", "rev", "dep"): a_wd,
        ("word", "rev", "tag"): a_wt,
    }

    def onehot(n_per):
        batch = jnp.repeat(jnp.arange(n_graphs), n_per)
        return jax.nn.one_hot(batch, n_graphs, dtype=jnp.float32).T   # [B, N]

    batch_onehot = {"word": onehot(nw), "dep": onehot(nd), "tag": onehot(nt)}
    return adj, batch_onehot


# ===================================== main =====================================

if __name__ == "__main__":
    key = jax.random.PRNGKey(0)
    k_param, k_word, k_dep, k_tag = jax.random.split(key, 4)

    n_graphs, nw, nd, nt = 2, 8, 6, 6
    params = init_params(k_param)
    adj, batch_onehot = build_graph(n_graphs, nw, nd, nt)

    word_x = jax.random.normal(k_word, (n_graphs * nw, INPUT_FEATURE), jnp.float32)
    dep_ids = jax.random.randint(k_dep, (n_graphs * nd,), 0, 45)
    tag_ids = jax.random.randint(k_tag, (n_graphs * nt,), 0, 50)

    out, x_dict = hetero_deep_graph_embedding4_forward(
        params, word_x, dep_ids, tag_ids, adj, batch_onehot)

    jax.block_until_ready(out)
    jax.block_until_ready(x_dict["word"])
    assert out.shape == (n_graphs, OUT_FEATURES)
    assert x_dict["word"].shape == (n_graphs * nw, HIDDEN_FEATURE)
    print("KERNEL_OK")
</pallas_src>

<mosaic_0001>
module attributes {stable_mosaic.version = 11 : i64} {
  func.func @_gat_layer_kernel(%arg0: memref<16x32xf32, #tpu.memory_space<vmem>>, %arg1: memref<12x32xf32, #tpu.memory_space<vmem>>, %arg2: memref<12x32xf32, #tpu.memory_space<vmem>>, %arg3: memref<32x32xf32, #tpu.memory_space<vmem>>, %arg4: memref<2x32xf32, #tpu.memory_space<vmem>>, %arg5: memref<32x2xf32, #tpu.memory_space<vmem>>, %arg6: memref<16x16xf32, #tpu.memory_space<vmem>>, %arg7: memref<32x32xf32, #tpu.memory_space<vmem>>, %arg8: memref<2x32xf32, #tpu.memory_space<vmem>>, %arg9: memref<32x2xf32, #tpu.memory_space<vmem>>, %arg10: memref<16x12xf32, #tpu.memory_space<vmem>>, %arg11: memref<32x32xf32, #tpu.memory_space<vmem>>, %arg12: memref<2x32xf32, #tpu.memory_space<vmem>>, %arg13: memref<32x2xf32, #tpu.memory_space<vmem>>, %arg14: memref<16x12xf32, #tpu.memory_space<vmem>>, %arg15: memref<32x32xf32, #tpu.memory_space<vmem>>, %arg16: memref<2x32xf32, #tpu.memory_space<vmem>>, %arg17: memref<32x2xf32, #tpu.memory_space<vmem>>, %arg18: memref<12x16xf32, #tpu.memory_space<vmem>>, %arg19: memref<32x32xf32, #tpu.memory_space<vmem>>, %arg20: memref<2x32xf32, #tpu.memory_space<vmem>>, %arg21: memref<32x2xf32, #tpu.memory_space<vmem>>, %arg22: memref<12x16xf32, #tpu.memory_space<vmem>>, %arg23: memref<2x16xf32, #tpu.memory_space<vmem>>, %arg24: memref<2x12xf32, #tpu.memory_space<vmem>>, %arg25: memref<2x12xf32, #tpu.memory_space<vmem>>, %arg26: memref<16x32xf32, #tpu.memory_space<vmem>>, %arg27: memref<12x32xf32, #tpu.memory_space<vmem>>, %arg28: memref<12x32xf32, #tpu.memory_space<vmem>>) attributes {dimension_semantics = [], scalar_prefetch = 0 : i64, scratch_operands = 0 : i64, tpu.core_type = #tpu.core_type<tc>} {
    %c0 = arith.constant 0 : index
    %c0_0 = arith.constant 0 : index
    %0 = vector.load %arg0[%c0, %c0_0] : memref<16x32xf32, #tpu.memory_space<vmem>>, vector<16x32xf32>
    %c0_1 = arith.constant 0 : index
    %c0_2 = arith.constant 0 : index
    %1 = vector.load %arg1[%c0_1, %c0_2] : memref<12x32xf32, #tpu.memory_space<vmem>>, vector<12x32xf32>
    %c0_3 = arith.constant 0 : index
    %c0_4 = arith.constant 0 : index
    %2 = vector.load %arg2[%c0_3, %c0_4] : memref<12x32xf32, #tpu.memory_space<vmem>>, vector<12x32xf32>
    %c0_5 = arith.constant 0 : index
    %c0_6 = arith.constant 0 : index
    %3 = vector.load %arg3[%c0_5, %c0_6] : memref<32x32xf32, #tpu.memory_space<vmem>>, vector<32x32xf32>
    %c0_7 = arith.constant 0 : index
    %c0_8 = arith.constant 0 : index
    %4 = vector.load %arg4[%c0_7, %c0_8] : memref<2x32xf32, #tpu.memory_space<vmem>>, vector<2x32xf32>
    %c0_9 = arith.constant 0 : index
    %c0_10 = arith.constant 0 : index
    %5 = vector.load %arg5[%c0_9, %c0_10] : memref<32x2xf32, #tpu.memory_space<vmem>>, vector<32x2xf32>
    %c0_11 = arith.constant 0 : index
    %c0_12 = arith.constant 0 : index
    %6 = vector.load %arg6[%c0_11, %c0_12] : memref<16x16xf32, #tpu.memory_space<vmem>>, vector<16x16xf32>
    %cst = arith.constant dense<0.000000e+00> : vector<16x32xf32>
    %7 = tpu.matmul %0, %3, %cst {dimension_numbers = #tpu.dot_dimension_numbers<[1], [0], [0], [1], [0, 0, 1, 1], [], []>} : vector<16x32xf32>, vector<32x32xf32>, vector<16x32xf32> -> vector<16x32xf32>
    %cst_13 = arith.constant dense<0.000000e+00> : vector<2x16xf32>
    %8 = tpu.matmul %4, %0, %cst_13 {dimension_numbers = #tpu.dot_dimension_numbers<[1], [1], [0], [0], [0, 0, 1, 0], [], []>} : vector<2x32xf32>, vector<16x32xf32>, vector<2x16xf32> -> vector<2x16xf32>
    %cst_14 = arith.constant dense<0.000000e+00> : vector<16x2xf32>
    %9 = tpu.matmul %0, %5, %cst_14 {dimension_numbers = #tpu.dot_dimension_numbers<[1], [0], [0], [1], [0, 0, 1, 1], [], []>} : vector<16x32xf32>, vector<32x2xf32>, vector<16x2xf32> -> vector<16x2xf32>
    %cst_15 = arith.constant 0.000000e+00 : f32
    %10 = vector.broadcast %cst_15 : f32 to vector<16x16xf32>
    %11 = arith.cmpf ogt, %6, %10 : vector<16x16xf32>
    %12 = tpu.iota {dimensions = array<i32: 1>} : vector<1x32xi32>
    %13 = vector.extract_strided_slice %9 {offsets = [0, 0], sizes = [16, 1], strides = [1, 1]} : vector<16x2xf32> to vector<16x1xf32>
    %14 = vector.extract_strided_slice %8 {offsets = [0, 0], sizes = [1, 16], strides = [1, 1]} : vector<2x16xf32> to vector<1x16xf32>
    %15 = vector.broadcast %13 : vector<16x1xf32> to vector<16x16xf32>
    %16 = vector.broadcast %14 : vector<1x16xf32> to vector<16x16xf32>
    %17 = arith.addf %15, %16 : vector<16x16xf32>
    %cst_16 = arith.constant 0.000000e+00 : f32
    %18 = vector.broadcast %cst_16 : f32 to vector<16x16xf32>
    %19 = arith.cmpf oge, %17, %18 : vector<16x16xf32>
    %cst_17 = arith.constant 2.000000e-01 : f32
    %20 = vector.broadcast %cst_17 : f32 to vector<16x16xf32>
    %21 = arith.mulf %20, %17 : vector<16x16xf32>
    %22 = arith.select %19, %17, %21 : vector<16x16xi1>, vector<16x16xf32>
    %cst_18 = arith.constant -1.000000e+30 : f32
    %23 = vector.broadcast %cst_18 : f32 to vector<16x16xf32>
    %24 = arith.select %11, %22, %23 : vector<16x16xi1>, vector<16x16xf32>
    %cst_19 = arith.constant dense<0xFF800000> : vector<16xf32>
    %25 = vector.multi_reduction <maximumf>, %24, %cst_19 [1] : vector<16x16xf32> to vector<16xf32>
    %26 = vector.shape_cast %25 : vector<16xf32> to vector<16x1xf32>
    %27 = vector.broadcast %26 : vector<16x1xf32> to vector<16x16xf32>
    %28 = arith.subf %24, %27 : vector<16x16xf32>
    %29 = math.exp %28 : vector<16x16xf32>
    %30 = arith.mulf %29, %6 : vector<16x16xf32>
    %cst_20 = arith.constant dense<0.000000e+00> : vector<16xf32>
    %31 = vector.multi_reduction <add>, %30, %cst_20 [1] : vector<16x16xf32> to vector<16xf32>
    %32 = vector.shape_cast %31 : vector<16xf32> to vector<16x1xf32>
    %cst_21 = arith.constant 0.000000e+00 : f32
    %33 = vector.broadcast %cst_21 : f32 to vector<16x1xf32>
    %34 = arith.cmpf ogt, %32, %33 : vector<16x1xf32>
    %cst_22 = arith.constant 1.000000e+00 : f32
    %35 = vector.broadcast %cst_22 : f32 to vector<16x1xf32>
    %36 = arith.select %34, %32, %35 : vector<16x1xi1>, vector<16x1xf32>
    %37 = tpu.reciprocal %36 {approx = true} : vector<16x1xf32> -> vector<16x1xf32>
    %38 = vector.broadcast %37 : vector<16x1xf32> to vector<16x16xf32>
    %39 = arith.mulf %30, %38 : vector<16x16xf32>
    %c0_i32 = arith.constant 0 : i32
    %40 = vector.broadcast %c0_i32 : i32 to vector<1x32xi32>
    %41 = arith.cmpi sge, %12, %40 : vector<1x32xi32>
    %c16_i32 = arith.constant 16 : i32
    %42 = vector.broadcast %c16_i32 : i32 to vector<1x32xi32>
    %43 = arith.cmpi slt, %12, %42 : vector<1x32xi32>
    %44 = arith.andi %41, %43 : vector<1x32xi1>
    %cst_23 = arith.constant 0.000000e+00 : f32
    %45 = vector.shape_cast %44 : vector<1x32xi1> to vector<1x32xi1>
    %46 = vector.broadcast %45 : vector<1x32xi1> to vector<16x32xi1>
    %47 = vector.broadcast %cst_23 : f32 to vector<16x32xf32>
    %48 = arith.select %46, %7, %47 : vector<16x32xi1>, vector<16x32xf32>
    %cst_24 = arith.constant dense<0.000000e+00> : vector<16x32xf32>
    %49 = tpu.matmul %39, %48, %cst_24 {dimension_numbers = #tpu.dot_dimension_numbers<[1], [0], [0], [1], [0, 0, 1, 1], [], []>} : vector<16x16xf32>, vector<16x32xf32>, vector<16x32xf32> -> vector<16x32xf32>
    %50 = vector.extract_strided_slice %9 {offsets = [0, 1], sizes = [16, 1], strides = [1, 1]} : vector<16x2xf32> to vector<16x1xf32>
    %51 = vector.extract_strided_slice %8 {offsets = [1, 0], sizes = [1, 16], strides = [1, 1]} : vector<2x16xf32> to vector<1x16xf32>
    %52 = vector.broadcast %50 : vector<16x1xf32> to vector<16x16xf32>
    %53 = vector.broadcast %51 : vector<1x16xf32> to vector<16x16xf32>
    %54 = arith.addf %52, %53 : vector<16x16xf32>
    %cst_25 = arith.constant 0.000000e+00 : f32
    %55 = vector.broadcast %cst_25 : f32 to vector<16x16xf32>
    %56 = arith.cmpf oge, %54, %55 : vector<16x16xf32>
    %cst_26 = arith.constant 2.000000e-01 : f32
    %57 = vector.broadcast %cst_26 : f32 to vector<16x16xf32>
    %58 = arith.mulf %57, %54 : vector<16x16xf32>
    %59 = arith.select %56, %54, %58 : vector<16x16xi1>, vector<16x16xf32>
    %cst_27 = arith.constant -1.000000e+30 : f32
    %60 = vector.broadcast %cst_27 : f32 to vector<16x16xf32>
    %61 = arith.select %11, %59, %60 : vector<16x16xi1>, vector<16x16xf32>
    %cst_28 = arith.constant dense<0xFF800000> : vector<16xf32>
    %62 = vector.multi_reduction <maximumf>, %61, %cst_28 [1] : vector<16x16xf32> to vector<16xf32>
    %63 = vector.shape_cast %62 : vector<16xf32> to vector<16x1xf32>
    %64 = vector.broadcast %63 : vector<16x1xf32> to vector<16x16xf32>
    %65 = arith.subf %61, %64 : vector<16x16xf32>
    %66 = math.exp %65 : vector<16x16xf32>
    %67 = arith.mulf %66, %6 : vector<16x16xf32>
    %cst_29 = arith.constant dense<0.000000e+00> : vector<16xf32>
    %68 = vector.multi_reduction <add>, %67, %cst_29 [1] : vector<16x16xf32> to vector<16xf32>
    %69 = vector.shape_cast %68 : vector<16xf32> to vector<16x1xf32>
    %cst_30 = arith.constant 0.000000e+00 : f32
    %70 = vector.broadcast %cst_30 : f32 to vector<16x1xf32>
    %71 = arith.cmpf ogt, %69, %70 : vector<16x1xf32>
    %cst_31 = arith.constant 1.000000e+00 : f32
    %72 = vector.broadcast %cst_31 : f32 to vector<16x1xf32>
    %73 = arith.select %71, %69, %72 : vector<16x1xi1>, vector<16x1xf32>
    %74 = tpu.reciprocal %73 {approx = true} : vector<16x1xf32> -> vector<16x1xf32>
    %75 = vector.broadcast %74 : vector<16x1xf32> to vector<16x16xf32>
    %76 = arith.mulf %67, %75 : vector<16x16xf32>
    %c16_i32_32 = arith.constant 16 : i32
    %77 = vector.broadcast %c16_i32_32 : i32 to vector<1x32xi32>
    %78 = arith.cmpi sge, %12, %77 : vector<1x32xi32>
    %c32_i32 = arith.constant 32 : i32
    %79 = vector.broadcast %c32_i32 : i32 to vector<1x32xi32>
    %80 = arith.cmpi slt, %12, %79 : vector<1x32xi32>
    %81 = arith.andi %78, %80 : vector<1x32xi1>
    %cst_33 = arith.constant 0.000000e+00 : f32
    %82 = vector.shape_cast %81 : vector<1x32xi1> to vector<1x32xi1>
    %83 = vector.broadcast %82 : vector<1x32xi1> to vector<16x32xi1>
    %84 = vector.broadcast %cst_33 : f32 to vector<16x32xf32>
    %85 = arith.select %83, %7, %84 : vector<16x32xi1>, vector<16x32xf32>
    %cst_34 = arith.constant dense<0.000000e+00> : vector<16x32xf32>
    %86 = tpu.matmul %76, %85, %cst_34 {dimension_numbers = #tpu.dot_dimension_numbers<[1], [0], [0], [1], [0, 0, 1, 1], [], []>} : vector<16x16xf32>, vector<16x32xf32>, vector<16x32xf32> -> vector<16x32xf32>
    %87 = arith.addf %49, %86 : vector<16x32xf32>
    %c0_35 = arith.constant 0 : index
    %c0_36 = arith.constant 0 : index
    %88 = vector.load %arg7[%c0_35, %c0_36] : memref<32x32xf32, #tpu.memory_space<vmem>>, vector<32x32xf32>
    %c0_37 = arith.constant 0 : index
    %c0_38 = arith.constant 0 : index
    %89 = vector.load %arg8[%c0_37, %c0_38] : memref<2x32xf32, #tpu.memory_space<vmem>>, vector<2x32xf32>
    %c0_39 = arith.constant 0 : index
    %c0_40 = arith.constant 0 : index
    %90 = vector.load %arg9[%c0_39, %c0_40] : memref<32x2xf32, #tpu.memory_space<vmem>>, vector<32x2xf32>
    %c0_41 = arith.constant 0 : index
    %c0_42 = arith.constant 0 : index
    %91 = vector.load %arg10[%c0_41, %c0_42] : memref<16x12xf32, #tpu.memory_space<vmem>>, vector<16x12xf32>
    %cst_43 = arith.constant dense<0.000000e+00> : vector<12x32xf32>
    %92 = tpu.matmul %1, %88, %cst_43 {dimension_numbers = #tpu.dot_dimension_numbers<[1], [0], [0], [1], [0, 0, 1, 1], [], []>} : vector<12x32xf32>, vector<32x32xf32>, vector<12x32xf32> -> vector<12x32xf32>
    %cst_44 = arith.constant dense<0.000000e+00> : vector<2x12xf32>
    %93 = tpu.matmul %89, %1, %cst_44 {dimension_numbers = #tpu.dot_dimension_numbers<[1], [1], [0], [0], [0, 0, 1, 0], [], []>} : vector<2x32xf32>, vector<12x32xf32>, vector<2x12xf32> -> vector<2x12xf32>
    %cst_45 = arith.constant dense<0.000000e+00> : vector<16x2xf32>
    %94 = tpu.matmul %0, %90, %cst_45 {dimension_numbers = #tpu.dot_dimension_numbers<[1], [0], [0], [1], [0, 0, 1, 1], [], []>} : vector<16x32xf32>, vector<32x2xf32>, vector<16x2xf32> -> vector<16x2xf32>
    %cst_46 = arith.constant 0.000000e+00 : f32
    %95 = vector.broadcast %cst_46 : f32 to vector<16x12xf32>
    %96 = arith.cmpf ogt, %91, %95 : vector<16x12xf32>
    %97 = tpu.iota {dimensions = array<i32: 1>} : vector<1x32xi32>
    %98 = vector.extract_strided_slice %94 {offsets = [0, 0], sizes = [16, 1], strides = [1, 1]} : vector<16x2xf32> to vector<16x1xf32>
    %99 = vector.extract_strided_slice %93 {offsets = [0, 0], sizes = [1, 12], strides = [1, 1]} : vector<2x12xf32> to vector<1x12xf32>
    %100 = vector.broadcast %98 : vector<16x1xf32> to vector<16x12xf32>
    %101 = vector.broadcast %99 : vector<1x12xf32> to vector<16x12xf32>
    %102 = arith.addf %100, %101 : vector<16x12xf32>
    %cst_47 = arith.constant 0.000000e+00 : f32
    %103 = vector.broadcast %cst_47 : f32 to vector<16x12xf32>
    %104 = arith.cmpf oge, %102, %103 : vector<16x12xf32>
    %cst_48 = arith.constant 2.000000e-01 : f32
    %105 = vector.broadcast %cst_48 : f32 to vector<16x12xf32>
    %106 = arith.mulf %105, %102 : vector<16x12xf32>
    %107 = arith.select %104, %102, %106 : vector<16x12xi1>, vector<16x12xf32>
    %cst_49 = arith.constant -1.000000e+30 : f32
    %108 = vector.broadcast %cst_49 : f32 to vector<16x12xf32>
    %109 = arith.select %96, %107, %108 : vector<16x12xi1>, vector<16x12xf32>
    %cst_50 = arith.constant dense<0xFF800000> : vector<16xf32>
    %110 = vector.multi_reduction <maximumf>, %109, %cst_50 [1] : vector<16x12xf32> to vector<16xf32>
    %111 = vector.shape_cast %110 : vector<16xf32> to vector<16x1xf32>
    %112 = vector.broadcast %111 : vector<16x1xf32> to vector<16x12xf32>
    %113 = arith.subf %109, %112 : vector<16x12xf32>
    %114 = math.exp %113 : vector<16x12xf32>
    %115 = arith.mulf %114, %91 : vector<16x12xf32>
    %cst_51 = arith.constant dense<0.000000e+00> : vector<16xf32>
    %116 = vector.multi_reduction <add>, %115, %cst_51 [1] : vector<16x12xf32> to vector<16xf32>
    %117 = vector.shape_cast %116 : vector<16xf32> to vector<16x1xf32>
    %cst_52 = arith.constant 0.000000e+00 : f32
    %118 = vector.broadcast %cst_52 : f32 to vector<16x1xf32>
    %119 = arith.cmpf ogt, %117, %118 : vector<16x1xf32>
    %cst_53 = arith.constant 1.000000e+00 : f32
    %120 = vector.broadcast %cst_53 : f32 to vector<16x1xf32>
    %121 = arith.select %119, %117, %120 : vector<16x1xi1>, vector<16x1xf32>
    %122 = tpu.reciprocal %121 {approx = true} : vector<16x1xf32> -> vector<16x1xf32>
    %123 = vector.broadcast %122 : vector<16x1xf32> to vector<16x12xf32>
    %124 = arith.mulf %115, %123 : vector<16x12xf32>
    %c0_i32_54 = arith.constant 0 : i32
    %125 = vector.broadcast %c0_i32_54 : i32 to vector<1x32xi32>
    %126 = arith.cmpi sge, %97, %125 : vector<1x32xi32>
    %c16_i32_55 = arith.constant 16 : i32
    %127 = vector.broadcast %c16_i32_55 : i32 to vector<1x32xi32>
    %128 = arith.cmpi slt, %97, %127 : vector<1x32xi32>
    %129 = arith.andi %126, %128 : vector<1x32xi1>
    %cst_56 = arith.constant 0.000000e+00 : f32
    %130 = vector.shape_cast %129 : vector<1x32xi1> to vector<1x32xi1>
    %131 = vector.broadcast %130 : vector<1x32xi1> to vector<12x32xi1>
    %132 = vector.broadcast %cst_56 : f32 to vector<12x32xf32>
    %133 = arith.select %131, %92, %132 : vector<12x32xi1>, vector<12x32xf32>
    %cst_57 = arith.constant dense<0.000000e+00> : vector<16x32xf32>
    %134 = tpu.matmul %124, %133, %cst_57 {dimension_numbers = #tpu.dot_dimension_numbers<[1], [0], [0], [1], [0, 0, 1, 1], [], []>} : vector<16x12xf32>, vector<12x32xf32>, vector<16x32xf32> -> vector<16x32xf32>
    %135 = vector.extract_strided_slice %94 {offsets = [0, 1], sizes = [16, 1], strides = [1, 1]} : vector<16x2xf32> to vector<16x1xf32>
    %136 = vector.extract_strided_slice %93 {offsets = [1, 0], sizes = [1, 12], strides = [1, 1]} : vector<2x12xf32> to vector<1x12xf32>
    %137 = vector.broadcast %135 : vector<16x1xf32> to vector<16x12xf32>
    %138 = vector.broadcast %136 : vector<1x12xf32> to vector<16x12xf32>
    %139 = arith.addf %137, %138 : vector<16x12xf32>
    %cst_58 = arith.constant 0.000000e+00 : f32
    %140 = vector.broadcast %cst_58 : f32 to vector<16x12xf32>
    %141 = arith.cmpf oge, %139, %140 : vector<16x12xf32>
    %cst_59 = arith.constant 2.000000e-01 : f32
    %142 = vector.broadcast %cst_59 : f32 to vector<16x12xf32>
    %143 = arith.mulf %142, %139 : vector<16x12xf32>
    %144 = arith.select %141, %139, %143 : vector<16x12xi1>, vector<16x12xf32>
    %cst_60 = arith.constant -1.000000e+30 : f32
    %145 = vector.broadcast %cst_60 : f32 to vector<16x12xf32>
    %146 = arith.select %96, %144, %145 : vector<16x12xi1>, vector<16x12xf32>
    %cst_61 = arith.constant dense<0xFF800000> : vector<16xf32>
    %147 = vector.multi_reduction <maximumf>, %146, %cst_61 [1] : vector<16x12xf32> to vector<16xf32>
    %148 = vector.shape_cast %147 : vector<16xf32> to vector<16x1xf32>
    %149 = vector.broadcast %148 : vector<16x1xf32> to vector<16x12xf32>
    %150 = arith.subf %146, %149 : vector<16x12xf32>
    %151 = math.exp %150 : vector<16x12xf32>
    %152 = arith.mulf %151, %91 : vector<16x12xf32>
    %cst_62 = arith.constant dense<0.000000e+00> : vector<16xf32>
    %153 = vector.multi_reduction <add>, %152, %cst_62 [1] : vector<16x12xf32> to vector<16xf32>
    %154 = vector.shape_cast %153 : vector<16xf32> to vector<16x1xf32>
    %cst_63 = arith.constant 0.000000e+00 : f32
    %155 = vector.broadcast %cst_63 : f32 to vector<16x1xf32>
    %156 = arith.cmpf ogt, %154, %155 : vector<16x1xf32>
    %cst_64 = arith.constant 1.000000e+00 : f32
    %157 = vector.broadcast %cst_64 : f32 to vector<16x1xf32>
    %158 = arith.select %156, %154, %157 : vector<16x1xi1>, vector<16x1xf32>
    %159 = tpu.reciprocal %158 {approx = true} : vector<16x1xf32> -> vector<16x1xf32>
    %160 = vector.broadcast %159 : vector<16x1xf32> to vector<16x12xf32>
    %161 = arith.mulf %152, %160 : vector<16x12xf32>
    %c16_i32_65 = arith.constant 16 : i32
    %162 = vector.broadcast %c16_i32_65 : i32 to vector<1x32xi32>
    %163 = arith.cmpi sge, %97, %162 : vector<1x32xi32>
    %c32_i32_66 = arith.constant 32 : i32
    %164 = vector.broadcast %c32_i32_66 : i32 to vector<1x32xi32>
    %165 = arith.cmpi slt, %97, %164 : vector<1x32xi32>
    %166 = arith.andi %163, %165 : vector<1x32xi1>
    %cst_67 = arith.constant 0.000000e+00 : f32
    %167 = vector.shape_cast %166 : vector<1x32xi1> to vector<1x32xi1>
    %168 = vector.broadcast %167 : vector<1x32xi1> to vector<12x32xi1>
    %169 = vector.broadcast %cst_67 : f32 to vector<12x32xf32>
    %170 = arith.select %168, %92, %169 : vector<12x32xi1>, vector<12x32xf32>
    %cst_68 = arith.constant dense<0.000000e+00> : vector<16x32xf32>
    %171 = tpu.matmul %161, %170, %cst_68 {dimension_numbers = #tpu.dot_dimension_numbers<[1], [0], [0], [1], [0, 0, 1, 1], [], []>} : vector<16x12xf32>, vector<12x32xf32>, vector<16x32xf32> -> vector<16x32xf32>
    %172 = arith.addf %134, %171 : vector<16x32xf32>
    %173 = arith.addf %87, %172 : vector<16x32xf32>
    %c0_69 = arith.constant 0 : index
    %c0_70 = arith.constant 0 : index
    %174 = vector.load %arg11[%c0_69, %c0_70] : memref<32x32xf32, #tpu.memory_space<vmem>>, vector<32x32xf32>
    %c0_71 = arith.constant 0 : index
    %c0_72 = arith.constant 0 : index
    %175 = vector.load %arg12[%c0_71, %c0_72] : memref<2x32xf32, #tpu.memory_space<vmem>>, vector<2x32xf32>
    %c0_73 = arith.constant 0 : index
    %c0_74 = arith.constant 0 : index
    %176 = vector.load %arg13[%c0_73, %c0_74] : memref<32x2xf32, #tpu.memory_space<vmem>>, vector<32x2xf32>
    %c0_75 = arith.constant 0 : index
    %c0_76 = arith.constant 0 : index
    %177 = vector.load %arg14[%c0_75, %c0_76] : memref<16x12xf32, #tpu.memory_space<vmem>>, vector<16x12xf32>
    %cst_77 = arith.constant dense<0.000000e+00> : vector<12x32xf32>
    %178 = tpu.matmul %2, %174, %cst_77 {dimension_numbers = #tpu.dot_dimension_numbers<[1], [0], [0], [1], [0, 0, 1, 1], [], []>} : vector<12x32xf32>, vector<32x32xf32>, vector<12x32xf32> -> vector<12x32xf32>
    %cst_78 = arith.constant dense<0.000000e+00> : vector<2x12xf32>
    %179 = tpu.matmul %175, %2, %cst_78 {dimension_numbers = #tpu.dot_dimension_numbers<[1], [1], [0], [0], [0, 0, 1, 0], [], []>} : vector<2x32xf32>, vector<12x32xf32>, vector<2x12xf32> -> vector<2x12xf32>
    %cst_79 = arith.constant dense<0.000000e+00> : vector<16x2xf32>
    %180 = tpu.matmul %0, %176, %cst_79 {dimension_numbers = #tpu.dot_dimension_numbers<[1], [0], [0], [1], [0, 0, 1, 1], [], []>} : vector<16x32xf32>, vector<32x2xf32>, vector<16x2xf32> -> vector<16x2xf32>
    %cst_80 = arith.constant 0.000000e+00 : f32
    %181 = vector.broadcast %cst_80 : f32 to vector<16x12xf32>
    %182 = arith.cmpf ogt, %177, %181 : vector<16x12xf32>
    %183 = tpu.iota {dimensions = array<i32: 1>} : vector<1x32xi32>
    %184 = vector.extract_strided_slice %180 {offsets = [0, 0], sizes = [16, 1], strides = [1, 1]} : vector<16x2xf32> to vector<16x1xf32>
    %185 = vector.extract_strided_slice %179 {offsets = [0, 0], sizes = [1, 12], strides = [1, 1]} : vector<2x12xf32> to vector<1x12xf32>
    %186 = vector.broadcast %184 : vector<16x1xf32> to vector<16x12xf32>
    %187 = vector.broadcast %185 : vector<1x12xf32> to vector<16x12xf32>
    %188 = arith.addf %186, %187 : vector<16x12xf32>
    %cst_81 = arith.constant 0.000000e+00 : f32
    %189 = vector.broadcast %cst_81 : f32 to vector<16x12xf32>
    %190 = arith.cmpf oge, %188, %189 : vector<16x12xf32>
    %cst_82 = arith.constant 2.000000e-01 : f32
    %191 = vector.broadcast %cst_82 : f32 to vector<16x12xf32>
    %192 = arith.mulf %191, %188 : vector<16x12xf32>
    %193 = arith.select %190, %188, %192 : vector<16x12xi1>, vector<16x12xf32>
    %cst_83 = arith.constant -1.000000e+30 : f32
    %194 = vector.broadcast %cst_83 : f32 to vector<16x12xf32>
    %195 = arith.select %182, %193, %194 : vector<16x12xi1>, vector<16x12xf32>
    %cst_84 = arith.constant dense<0xFF800000> : vector<16xf32>
    %196 = vector.multi_reduction <maximumf>, %195, %cst_84 [1] : vector<16x12xf32> to vector<16xf32>
    %197 = vector.shape_cast %196 : vector<16xf32> to vector<16x1xf32>
    %198 = vector.broadcast %197 : vector<16x1xf32> to vector<16x12xf32>
    %199 = arith.subf %195, %198 : vector<16x12xf32>
    %200 = math.exp %199 : vector<16x12xf32>
    %201 = arith.mulf %200, %177 : vector<16x12xf32>
    %cst_85 = arith.constant dense<0.000000e+00> : vector<16xf32>
    %202 = vector.multi_reduction <add>, %201, %cst_85 [1] : vector<16x12xf32> to vector<16xf32>
    %203 = vector.shape_cast %202 : vector<16xf32> to vector<16x1xf32>
    %cst_86 = arith.constant 0.000000e+00 : f32
    %204 = vector.broadcast %cst_86 : f32 to vector<16x1xf32>
    %205 = arith.cmpf ogt, %203, %204 : vector<16x1xf32>
    %cst_87 = arith.constant 1.000000e+00 : f32
    %206 = vector.broadcast %cst_87 : f32 to vector<16x1xf32>
    %207 = arith.select %205, %203, %206 : vector<16x1xi1>, vector<16x1xf32>
    %208 = tpu.reciprocal %207 {approx = true} : vector<16x1xf32> -> vector<16x1xf32>
    %209 = vector.broadcast %208 : vector<16x1xf32> to vector<16x12xf32>
    %210 = arith.mulf %201, %209 : vector<16x12xf32>
    %c0_i32_88 = arith.constant 0 : i32
    %211 = vector.broadcast %c0_i32_88 : i32 to vector<1x32xi32>
    %212 = arith.cmpi sge, %183, %211 : vector<1x32xi32>
    %c16_i32_89 = arith.constant 16 : i32
    %213 = vector.broadcast %c16_i32_89 : i32 to vector<1x32xi32>
    %214 = arith.cmpi slt, %183, %213 : vector<1x32xi32>
    %215 = arith.andi %212, %214 : vector<1x32xi1>
    %cst_90 = arith.constant 0.000000e+00 : f32
    %216 = vector.shape_cast %215 : vector<1x32xi1> to vector<1x32xi1>
    %217 = vector.broadcast %216 : vector<1x32xi1> to vector<12x32xi1>
    %218 = vector.broadcast %cst_90 : f32 to vector<12x32xf32>
    %219 = arith.select %217, %178, %218 : vector<12x32xi1>, vector<12x32xf32>
    %cst_91 = arith.constant dense<0.000000e+00> : vector<16x32xf32>
    %220 = tpu.matmul %210, %219, %cst_91 {dimension_numbers = #tpu.dot_dimension_numbers<[1], [0], [0], [1], [0, 0, 1, 1], [], []>} : vector<16x12xf32>, vector<12x32xf32>, vector<16x32xf32> -> vector<16x32xf32>
    %221 = vector.extract_strided_slice %180 {offsets = [0, 1], sizes = [16, 1], strides = [1, 1]} : vector<16x2xf32> to vector<16x1xf32>
    %222 = vector.extract_strided_slice %179 {offsets = [1, 0], sizes = [1, 12], strides = [1, 1]} : vector<2x12xf32> to vector<1x12xf32>
    %223 = vector.broadcast %221 : vector<16x1xf32> to vector<16x12xf32>
    %224 = vector.broadcast %222 : vector<1x12xf32> to vector<16x12xf32>
    %225 = arith.addf %223, %224 : vector<16x12xf32>
    %cst_92 = arith.constant 0.000000e+00 : f32
    %226 = vector.broadcast %cst_92 : f32 to vector<16x12xf32>
    %227 = arith.cmpf oge, %225, %226 : vector<16x12xf32>
    %cst_93 = arith.constant 2.000000e-01 : f32
    %228 = vector.broadcast %cst_93 : f32 to vector<16x12xf32>
    %229 = arith.mulf %228, %225 : vector<16x12xf32>
    %230 = arith.select %227, %225, %229 : vector<16x12xi1>, vector<16x12xf32>
    %cst_94 = arith.constant -1.000000e+30 : f32
    %231 = vector.broadcast %cst_94 : f32 to vector<16x12xf32>
    %232 = arith.select %182, %230, %231 : vector<16x12xi1>, vector<16x12xf32>
    %cst_95 = arith.constant dense<0xFF800000> : vector<16xf32>
    %233 = vector.multi_reduction <maximumf>, %232, %cst_95 [1] : vector<16x12xf32> to vector<16xf32>
    %234 = vector.shape_cast %233 : vector<16xf32> to vector<16x1xf32>
    %235 = vector.broadcast %234 : vector<16x1xf32> to vector<16x12xf32>
    %236 = arith.subf %232, %235 : vector<16x12xf32>
    %237 = math.exp %236 : vector<16x12xf32>
    %238 = arith.mulf %237, %177 : vector<16x12xf32>
    %cst_96 = arith.constant dense<0.000000e+00> : vector<16xf32>
    %239 = vector.multi_reduction <add>, %238, %cst_96 [1] : vector<16x12xf32> to vector<16xf32>
    %240 = vector.shape_cast %239 : vector<16xf32> to vector<16x1xf32>
    %cst_97 = arith.constant 0.000000e+00 : f32
    %241 = vector.broadcast %cst_97 : f32 to vector<16x1xf32>
    %242 = arith.cmpf ogt, %240, %241 : vector<16x1xf32>
    %cst_98 = arith.constant 1.000000e+00 : f32
    %243 = vector.broadcast %cst_98 : f32 to vector<16x1xf32>
    %244 = arith.select %242, %240, %243 : vector<16x1xi1>, vector<16x1xf32>
    %245 = tpu.reciprocal %244 {approx = true} : vector<16x1xf32> -> vector<16x1xf32>
    %246 = vector.broadcast %245 : vector<16x1xf32> to vector<16x12xf32>
    %247 = arith.mulf %238, %246 : vector<16x12xf32>
    %c16_i32_99 = arith.constant 16 : i32
    %248 = vector.broadcast %c16_i32_99 : i32 to vector<1x32xi32>
    %249 = arith.cmpi sge, %183, %248 : vector<1x32xi32>
    %c32_i32_100 = arith.constant 32 : i32
    %250 = vector.broadcast %c32_i32_100 : i32 to vector<1x32xi32>
    %251 = arith.cmpi slt, %183, %250 : vector<1x32xi32>
    %252 = arith.andi %249, %251 : vector<1x32xi1>
    %cst_101 = arith.constant 0.000000e+00 : f32
    %253 = vector.shape_cast %252 : vector<1x32xi1> to vector<1x32xi1>
    %254 = vector.broadcast %253 : vector<1x32xi1> to vector<12x32xi1>
    %255 = vector.broadcast %cst_101 : f32 to vector<12x32xf32>
    %256 = arith.select %254, %178, %255 : vector<12x32xi1>, vector<12x32xf32>
    %cst_102 = arith.constant dense<0.000000e+00> : vector<16x32xf32>
    %257 = tpu.matmul %247, %256, %cst_102 {dimension_numbers = #tpu.dot_dimension_numbers<[1], [0], [0], [1], [0, 0, 1, 1], [], []>} : vector<16x12xf32>, vector<12x32xf32>, vector<16x32xf32> -> vector<16x32xf32>
    %258 = arith.addf %220, %257 : vector<16x32xf32>
    %259 = arith.addf %173, %258 : vector<16x32xf32>
    %c0_103 = arith.constant 0 : index
    %c0_104 = arith.constant 0 : index
    %260 = vector.load %arg15[%c0_103, %c0_104] : memref<32x32xf32, #tpu.memory_space<vmem>>, vector<32x32xf32>
    %c0_105 = arith.constant 0 : index
    %c0_106 = arith.constant 0 : index
    %261 = vector.load %arg16[%c0_105, %c0_106] : memref<2x32xf32, #tpu.memory_space<vmem>>, vector<2x32xf32>
    %c0_107 = arith.constant 0 : index
    %c0_108 = arith.constant 0 : index
    %262 = vector.load %arg17[%c0_107, %c0_108] : memref<32x2xf32, #tpu.memory_space<vmem>>, vector<32x2xf32>
    %c0_109 = arith.constant 0 : index
    %c0_110 = arith.constant 0 : index
    %263 = vector.load %arg18[%c0_109, %c0_110] : memref<12x16xf32, #tpu.memory_space<vmem>>, vector<12x16xf32>
    %cst_111 = arith.constant dense<0.000000e+00> : vector<16x32xf32>
    %264 = tpu.matmul %0, %260, %cst_111 {dimension_numbers = #tpu.dot_dimension_numbers<[1], [0], [0], [1], [0, 0, 1, 1], [], []>} : vector<16x32xf32>, vector<32x32xf32>, vector<16x32xf32> -> vector<16x32xf32>
    %cst_112 = arith.constant dense<0.000000e+00> : vector<2x16xf32>
    %265 = tpu.matmul %261, %0, %cst_112 {dimension_numbers = #tpu.dot_dimension_numbers<[1], [1], [0], [0], [0, 0, 1, 0], [], []>} : vector<2x32xf32>, vector<16x32xf32>, vector<2x16xf32> -> vector<2x16xf32>
    %cst_113 = arith.constant dense<0.000000e+00> : vector<12x2xf32>
    %266 = tpu.matmul %1, %262, %cst_113 {dimension_numbers = #tpu.dot_dimension_numbers<[1], [0], [0], [1], [0, 0, 1, 1], [], []>} : vector<12x32xf32>, vector<32x2xf32>, vector<12x2xf32> -> vector<12x2xf32>
    %cst_114 = arith.constant 0.000000e+00 : f32
    %267 = vector.broadcast %cst_114 : f32 to vector<12x16xf32>
    %268 = arith.cmpf ogt, %263, %267 : vector<12x16xf32>
    %269 = tpu.iota {dimensions = array<i32: 1>} : vector<1x32xi32>
    %270 = vector.extract_strided_slice %266 {offsets = [0, 0], sizes = [12, 1], strides = [1, 1]} : vector<12x2xf32> to vector<12x1xf32>
    %271 = vector.extract_strided_slice %265 {offsets = [0, 0], sizes = [1, 16], strides = [1, 1]} : vector<2x16xf32> to vector<1x16xf32>
    %272 = vector.broadcast %270 : vector<12x1xf32> to vector<12x16xf32>
    %273 = vector.broadcast %271 : vector<1x16xf32> to vector<12x16xf32>
    %274 = arith.addf %272, %273 : vector<12x16xf32>
    %cst_115 = arith.constant 0.000000e+00 : f32
    %275 = vector.broadcast %cst_115 : f32 to vector<12x16xf32>
    %276 = arith.cmpf oge, %274, %275 : vector<12x16xf32>
    %cst_116 = arith.constant 2.000000e-01 : f32
    %277 = vector.broadcast %cst_116 : f32 to vector<12x16xf32>
    %278 = arith.mulf %277, %274 : vector<12x16xf32>
    %279 = arith.select %276, %274, %278 : vector<12x16xi1>, vector<12x16xf32>
    %cst_117 = arith.constant -1.000000e+30 : f32
    %280 = vector.broadcast %cst_117 : f32 to vector<12x16xf32>
    %281 = arith.select %268, %279, %280 : vector<12x16xi1>, vector<12x16xf32>
    %cst_118 = arith.constant dense<0xFF800000> : vector<12xf32>
    %282 = vector.multi_reduction <maximumf>, %281, %cst_118 [1] : vector<12x16xf32> to vector<12xf32>
    %283 = vector.shape_cast %282 : vector<12xf32> to vector<12x1xf32>
    %284 = vector.broadcast %283 : vector<12x1xf32> to vector<12x16xf32>
    %285 = arith.subf %281, %284 : vector<12x16xf32>
    %286 = math.exp %285 : vector<12x16xf32>
    %287 = arith.mulf %286, %263 : vector<12x16xf32>
    %cst_119 = arith.constant dense<0.000000e+00> : vector<12xf32>
    %288 = vector.multi_reduction <add>, %287, %cst_119 [1] : vector<12x16xf32> to vector<12xf32>
    %289 = vector.shape_cast %288 : vector<12xf32> to vector<12x1xf32>
    %cst_120 = arith.constant 0.000000e+00 : f32
    %290 = vector.broadcast %cst_120 : f32 to vector<12x1xf32>
    %291 = arith.cmpf ogt, %289, %290 : vector<12x1xf32>
    %cst_121 = arith.constant 1.000000e+00 : f32
    %292 = vector.broadcast %cst_121 : f32 to vector<12x1xf32>
    %293 = arith.select %291, %289, %292 : vector<12x1xi1>, vector<12x1xf32>
    %294 = tpu.reciprocal %293 {approx = true} : vector<12x1xf32> -> vector<12x1xf32>
    %295 = vector.broadcast %294 : vector<12x1xf32> to vector<12x16xf32>
    %296 = arith.mulf %287, %295 : vector<12x16xf32>
    %c0_i32_122 = arith.constant 0 : i32
    %297 = vector.broadcast %c0_i32_122 : i32 to vector<1x32xi32>
    %298 = arith.cmpi sge, %269, %297 : vector<1x32xi32>
    %c16_i32_123 = arith.constant 16 : i32
    %299 = vector.broadcast %c16_i32_123 : i32 to vector<1x32xi32>
    %300 = arith.cmpi slt, %269, %299 : vector<1x32xi32>
    %301 = arith.andi %298, %300 : vector<1x32xi1>
    %cst_124 = arith.constant 0.000000e+00 : f32
    %302 = vector.shape_cast %301 : vector<1x32xi1> to vector<1x32xi1>
    %303 = vector.broadcast %302 : vector<1x32xi1> to vector<16x32xi1>
    %304 = vector.broadcast %cst_124 : f32 to vector<16x32xf32>
    %305 = arith.select %303, %264, %304 : vector<16x32xi1>, vector<16x32xf32>
    %cst_125 = arith.constant dense<0.000000e+00> : vector<12x32xf32>
    %306 = tpu.matmul %296, %305, %cst_125 {dimension_numbers = #tpu.dot_dimension_numbers<[1], [0], [0], [1], [0, 0, 1, 1], [], []>} : vector<12x16xf32>, vector<16x32xf32>, vector<12x32xf32> -> vector<12x32xf32>
    %307 = vector.extract_strided_slice %266 {offsets = [0, 1], sizes = [12, 1], strides = [1, 1]} : vector<12x2xf32> to vector<12x1xf32>
    %308 = vector.extract_strided_slice %265 {offsets = [1, 0], sizes = [1, 16], strides = [1, 1]} : vector<2x16xf32> to vector<1x16xf32>
    %309 = vector.broadcast %307 : vector<12x1xf32> to vector<12x16xf32>
    %310 = vector.broadcast %308 : vector<1x16xf32> to vector<12x16xf32>
    %311 = arith.addf %309, %310 : vector<12x16xf32>
    %cst_126 = arith.constant 0.000000e+00 : f32
    %312 = vector.broadcast %cst_126 : f32 to vector<12x16xf32>
    %313 = arith.cmpf oge, %311, %312 : vector<12x16xf32>
    %cst_127 = arith.constant 2.000000e-01 : f32
    %314 = vector.broadcast %cst_127 : f32 to vector<12x16xf32>
    %315 = arith.mulf %314, %311 : vector<12x16xf32>
    %316 = arith.select %313, %311, %315 : vector<12x16xi1>, vector<12x16xf32>
    %cst_128 = arith.constant -1.000000e+30 : f32
    %317 = vector.broadcast %cst_128 : f32 to vector<12x16xf32>
    %318 = arith.select %268, %316, %317 : vector<12x16xi1>, vector<12x16xf32>
    %cst_129 = arith.constant dense<0xFF800000> : vector<12xf32>
    %319 = vector.multi_reduction <maximumf>, %318, %cst_129 [1] : vector<12x16xf32> to vector<12xf32>
    %320 = vector.shape_cast %319 : vector<12xf32> to vector<12x1xf32>
    %321 = vector.broadcast %320 : vector<12x1xf32> to vector<12x16xf32>
    %322 = arith.subf %318, %321 : vector<12x16xf32>
    %323 = math.exp %322 : vector<12x16xf32>
    %324 = arith.mulf %323, %263 : vector<12x16xf32>
    %cst_130 = arith.constant dense<0.000000e+00> : vector<12xf32>
    %325 = vector.multi_reduction <add>, %324, %cst_130 [1] : vector<12x16xf32> to vector<12xf32>
    %326 = vector.shape_cast %325 : vector<12xf32> to vector<12x1xf32>
    %cst_131 = arith.constant 0.000000e+00 : f32
    %327 = vector.broadcast %cst_131 : f32 to vector<12x1xf32>
    %328 = arith.cmpf ogt, %326, %327 : vector<12x1xf32>
    %cst_132 = arith.constant 1.000000e+00 : f32
    %329 = vector.broadcast %cst_132 : f32 to vector<12x1xf32>
    %330 = arith.select %328, %326, %329 : vector<12x1xi1>, vector<12x1xf32>
    %331 = tpu.reciprocal %330 {approx = true} : vector<12x1xf32> -> vector<12x1xf32>
    %332 = vector.broadcast %331 : vector<12x1xf32> to vector<12x16xf32>
    %333 = arith.mulf %324, %332 : vector<12x16xf32>
    %c16_i32_133 = arith.constant 16 : i32
    %334 = vector.broadcast %c16_i32_133 : i32 to vector<1x32xi32>
    %335 = arith.cmpi sge, %269, %334 : vector<1x32xi32>
    %c32_i32_134 = arith.constant 32 : i32
    %336 = vector.broadcast %c32_i32_134 : i32 to vector<1x32xi32>
    %337 = arith.cmpi slt, %269, %336 : vector<1x32xi32>
    %338 = arith.andi %335, %337 : vector<1x32xi1>
    %cst_135 = arith.constant 0.000000e+00 : f32
    %339 = vector.shape_cast %338 : vector<1x32xi1> to vector<1x32xi1>
    %340 = vector.broadcast %339 : vector<1x32xi1> to vector<16x32xi1>
    %341 = vector.broadcast %cst_135 : f32 to vector<16x32xf32>
    %342 = arith.select %340, %264, %341 : vector<16x32xi1>, vector<16x32xf32>
    %cst_136 = arith.constant dense<0.000000e+00> : vector<12x32xf32>
    %343 = tpu.matmul %333, %342, %cst_136 {dimension_numbers = #tpu.dot_dimension_numbers<[1], [0], [0], [1], [0, 0, 1, 1], [], []>} : vector<12x16xf32>, vector<16x32xf32>, vector<12x32xf32> -> vector<12x32xf32>
    %344 = arith.addf %306, %343 : vector<12x32xf32>
    %c0_137 = arith.constant 0 : index
    %c0_138 = arith.constant 0 : index
    %345 = vector.load %arg19[%c0_137, %c0_138] : memref<32x32xf32, #tpu.memory_space<vmem>>, vector<32x32xf32>
    %c0_139 = arith.constant 0 : index
    %c0_140 = arith.constant 0 : index
    %346 = vector.load %arg20[%c0_139, %c0_140] : memref<2x32xf32, #tpu.memory_space<vmem>>, vector<2x32xf32>
    %c0_141 = arith.constant 0 : index
    %c0_142 = arith.constant 0 : index
    %347 = vector.load %arg21[%c0_141, %c0_142] : memref<32x2xf32, #tpu.memory_space<vmem>>, vector<32x2xf32>
    %c0_143 = arith.constant 0 : index
    %c0_144 = arith.constant 0 : index
    %348 = vector.load %arg22[%c0_143, %c0_144] : memref<12x16xf32, #tpu.memory_space<vmem>>, vector<12x16xf32>
    %cst_145 = arith.constant dense<0.000000e+00> : vector<16x32xf32>
    %349 = tpu.matmul %0, %345, %cst_145 {dimension_numbers = #tpu.dot_dimension_numbers<[1], [0], [0], [1], [0, 0, 1, 1], [], []>} : vector<16x32xf32>, vector<32x32xf32>, vector<16x32xf32> -> vector<16x32xf32>
    %cst_146 = arith.constant dense<0.000000e+00> : vector<2x16xf32>
    %350 = tpu.matmul %346, %0, %cst_146 {dimension_numbers = #tpu.dot_dimension_numbers<[1], [1], [0], [0], [0, 0, 1, 0], [], []>} : vector<2x32xf32>, vector<16x32xf32>, vector<2x16xf32> -> vector<2x16xf32>
    %cst_147 = arith.constant dense<0.000000e+00> : vector<12x2xf32>
    %351 = tpu.matmul %2, %347, %cst_147 {dimension_numbers = #tpu.dot_dimension_numbers<[1], [0], [0], [1], [0, 0, 1, 1], [], []>} : vector<12x32xf32>, vector<32x2xf32>, vector<12x2xf32> -> vector<12x2xf32>
    %cst_148 = arith.constant 0.000000e+00 : f32
    %352 = vector.broadcast %cst_148 : f32 to vector<12x16xf32>
    %353 = arith.cmpf ogt, %348, %352 : vector<12x16xf32>
    %354 = tpu.iota {dimensions = array<i32: 1>} : vector<1x32xi32>
    %355 = vector.extract_strided_slice %351 {offsets = [0, 0], sizes = [12, 1], strides = [1, 1]} : vector<12x2xf32> to vector<12x1xf32>
    %356 = vector.extract_strided_slice %350 {offsets = [0, 0], sizes = [1, 16], strides = [1, 1]} : vector<2x16xf32> to vector<1x16xf32>
    %357 = vector.broadcast %355 : vector<12x1xf32> to vector<12x16xf32>
    %358 = vector.broadcast %356 : vector<1x16xf32> to vector<12x16xf32>
    %359 = arith.addf %357, %358 : vector<12x16xf32>
    %cst_149 = arith.constant 0.000000e+00 : f32
    %360 = vector.broadcast %cst_149 : f32 to vector<12x16xf32>
    %361 = arith.cmpf oge, %359, %360 : vector<12x16xf32>
    %cst_150 = arith.constant 2.000000e-01 : f32
    %362 = vector.broadcast %cst_150 : f32 to vector<12x16xf32>
    %363 = arith.mulf %362, %359 : vector<12x16xf32>
    %364 = arith.select %361, %359, %363 : vector<12x16xi1>, vector<12x16xf32>
    %cst_151 = arith.constant -1.000000e+30 : f32
    %365 = vector.broadcast %cst_151 : f32 to vector<12x16xf32>
    %366 = arith.select %353, %364, %365 : vector<12x16xi1>, vector<12x16xf32>
    %cst_152 = arith.constant dense<0xFF800000> : vector<12xf32>
    %367 = vector.multi_reduction <maximumf>, %366, %cst_152 [1] : vector<12x16xf32> to vector<12xf32>
    %368 = vector.shape_cast %367 : vector<12xf32> to vector<12x1xf32>
    %369 = vector.broadcast %368 : vector<12x1xf32> to vector<12x16xf32>
    %370 = arith.subf %366, %369 : vector<12x16xf32>
    %371 = math.exp %370 : vector<12x16xf32>
    %372 = arith.mulf %371, %348 : vector<12x16xf32>
    %cst_153 = arith.constant dense<0.000000e+00> : vector<12xf32>
    %373 = vector.multi_reduction <add>, %372, %cst_153 [1] : vector<12x16xf32> to vector<12xf32>
    %374 = vector.shape_cast %373 : vector<12xf32> to vector<12x1xf32>
    %cst_154 = arith.constant 0.000000e+00 : f32
    %375 = vector.broadcast %cst_154 : f32 to vector<12x1xf32>
    %376 = arith.cmpf ogt, %374, %375 : vector<12x1xf32>
    %cst_155 = arith.constant 1.000000e+00 : f32
    %377 = vector.broadcast %cst_155 : f32 to vector<12x1xf32>
    %378 = arith.select %376, %374, %377 : vector<12x1xi1>, vector<12x1xf32>
    %379 = tpu.reciprocal %378 {approx = true} : vector<12x1xf32> -> vector<12x1xf32>
    %380 = vector.broadcast %379 : vector<12x1xf32> to vector<12x16xf32>
    %381 = arith.mulf %372, %380 : vector<12x16xf32>
    %c0_i32_156 = arith.constant 0 : i32
    %382 = vector.broadcast %c0_i32_156 : i32 to vector<1x32xi32>
    %383 = arith.cmpi sge, %354, %382 : vector<1x32xi32>
    %c16_i32_157 = arith.constant 16 : i32
    %384 = vector.broadcast %c16_i32_157 : i32 to vector<1x32xi32>
    %385 = arith.cmpi slt, %354, %384 : vector<1x32xi32>
    %386 = arith.andi %383, %385 : vector<1x32xi1>
    %cst_158 = arith.constant 0.000000e+00 : f32
    %387 = vector.shape_cast %386 : vector<1x32xi1> to vector<1x32xi1>
    %388 = vector.broadcast %387 : vector<1x32xi1> to vector<16x32xi1>
    %389 = vector.broadcast %cst_158 : f32 to vector<16x32xf32>
    %390 = arith.select %388, %349, %389 : vector<16x32xi1>, vector<16x32xf32>
    %cst_159 = arith.constant dense<0.000000e+00> : vector<12x32xf32>
    %391 = tpu.matmul %381, %390, %cst_159 {dimension_numbers = #tpu.dot_dimension_numbers<[1], [0], [0], [1], [0, 0, 1, 1], [], []>} : vector<12x16xf32>, vector<16x32xf32>, vector<12x32xf32> -> vector<12x32xf32>
    %392 = vector.extract_strided_slice %351 {offsets = [0, 1], sizes = [12, 1], strides = [1, 1]} : vector<12x2xf32> to vector<12x1xf32>
    %393 = vector.extract_strided_slice %350 {offsets = [1, 0], sizes = [1, 16], strides = [1, 1]} : vector<2x16xf32> to vector<1x16xf32>
    %394 = vector.broadcast %392 : vector<12x1xf32> to vector<12x16xf32>
    %395 = vector.broadcast %393 : vector<1x16xf32> to vector<12x16xf32>
    %396 = arith.addf %394, %395 : vector<12x16xf32>
    %cst_160 = arith.constant 0.000000e+00 : f32
    %397 = vector.broadcast %cst_160 : f32 to vector<12x16xf32>
    %398 = arith.cmpf oge, %396, %397 : vector<12x16xf32>
    %cst_161 = arith.constant 2.000000e-01 : f32
    %399 = vector.broadcast %cst_161 : f32 to vector<12x16xf32>
    %400 = arith.mulf %399, %396 : vector<12x16xf32>
    %401 = arith.select %398, %396, %400 : vector<12x16xi1>, vector<12x16xf32>
    %cst_162 = arith.constant -1.000000e+30 : f32
    %402 = vector.broadcast %cst_162 : f32 to vector<12x16xf32>
    %403 = arith.select %353, %401, %402 : vector<12x16xi1>, vector<12x16xf32>
    %cst_163 = arith.constant dense<0xFF800000> : vector<12xf32>
    %404 = vector.multi_reduction <maximumf>, %403, %cst_163 [1] : vector<12x16xf32> to vector<12xf32>
    %405 = vector.shape_cast %404 : vector<12xf32> to vector<12x1xf32>
    %406 = vector.broadcast %405 : vector<12x1xf32> to vector<12x16xf32>
    %407 = arith.subf %403, %406 : vector<12x16xf32>
    %408 = math.exp %407 : vector<12x16xf32>
    %409 = arith.mulf %408, %348 : vector<12x16xf32>
    %cst_164 = arith.constant dense<0.000000e+00> : vector<12xf32>
    %410 = vector.multi_reduction <add>, %409, %cst_164 [1] : vector<12x16xf32> to vector<12xf32>
    %411 = vector.shape_cast %410 : vector<12xf32> to vector<12x1xf32>
    %cst_165 = arith.constant 0.000000e+00 : f32
    %412 = vector.broadcast %cst_165 : f32 to vector<12x1xf32>
    %413 = arith.cmpf ogt, %411, %412 : vector<12x1xf32>
    %cst_166 = arith.constant 1.000000e+00 : f32
    %414 = vector.broadcast %cst_166 : f32 to vector<12x1xf32>
    %415 = arith.select %413, %411, %414 : vector<12x1xi1>, vector<12x1xf32>
    %416 = tpu.reciprocal %415 {approx = true} : vector<12x1xf32> -> vector<12x1xf32>
    %417 = vector.broadcast %416 : vector<12x1xf32> to vector<12x16xf32>
    %418 = arith.mulf %409, %417 : vector<12x16xf32>
    %c16_i32_167 = arith.constant 16 : i32
    %419 = vector.broadcast %c16_i32_167 : i32 to vector<1x32xi32>
    %420 = arith.cmpi sge, %354, %419 : vector<1x32xi32>
    %c32_i32_168 = arith.constant 32 : i32
    %421 = vector.broadcast %c32_i32_168 : i32 to vector<1x32xi32>
    %422 = arith.cmpi slt, %354, %421 : vector<1x32xi32>
    %423 = arith.andi %420, %422 : vector<1x32xi1>
    %cst_169 = arith.constant 0.000000e+00 : f32
    %424 = vector.shape_cast %423 : vector<1x32xi1> to vector<1x32xi1>
    %425 = vector.broadcast %424 : vector<1x32xi1> to vector<16x32xi1>
    %426 = vector.broadcast %cst_169 : f32 to vector<16x32xf32>
    %427 = arith.select %425, %349, %426 : vector<16x32xi1>, vector<16x32xf32>
    %cst_170 = arith.constant dense<0.000000e+00> : vector<12x32xf32>
    %428 = tpu.matmul %418, %427, %cst_170 {dimension_numbers = #tpu.dot_dimension_numbers<[1], [0], [0], [1], [0, 0, 1, 1], [], []>} : vector<12x16xf32>, vector<16x32xf32>, vector<12x32xf32> -> vector<12x32xf32>
    %429 = arith.addf %391, %428 : vector<12x32xf32>
    %c0_171 = arith.constant 0 : index
    %c0_172 = arith.constant 0 : index
    %430 = vector.load %arg23[%c0_171, %c0_172] : memref<2x16xf32, #tpu.memory_space<vmem>>, vector<2x16xf32>
    %cst_173 = arith.constant dense<0.000000e+00> : vector<2xf32>
    %431 = vector.multi_reduction <add>, %430, %cst_173 [1] : vector<2x16xf32> to vector<2xf32>
    %432 = vector.shape_cast %431 : vector<2xf32> to vector<2x1xf32>
    %433 = tpu.reciprocal %432 : vector<2x1xf32> -> vector<2x1xf32>
    %cst_174 = arith.constant dense<0.000000e+00> : vector<2x32xf32>
    %434 = tpu.matmul %430, %259, %cst_174 {dimension_numbers = #tpu.dot_dimension_numbers<[1], [0], [0], [1], [0, 0, 1, 1], [], []>} : vector<2x16xf32>, vector<16x32xf32>, vector<2x32xf32> -> vector<2x32xf32>
    %435 = vector.broadcast %433 : vector<2x1xf32> to vector<2x32xf32>
    %436 = arith.mulf %434, %435 : vector<2x32xf32>
    %437 = tpu.transpose %430, [1, 0] : vector<2x16xf32> -> vector<16x2xf32>
    %cst_175 = arith.constant dense<0.000000e+00> : vector<16x32xf32>
    %438 = tpu.matmul %437, %436, %cst_175 {dimension_numbers = #tpu.dot_dimension_numbers<[1], [0], [0], [1], [0, 0, 1, 1], [], []>} : vector<16x2xf32>, vector<2x32xf32>, vector<16x32xf32> -> vector<16x32xf32>
    %439 = arith.subf %259, %438 : vector<16x32xf32>
    %440 = arith.mulf %439, %439 : vector<16x32xf32>
    %cst_176 = arith.constant dense<0.000000e+00> : vector<16xf32>
    %441 = vector.multi_reduction <add>, %440, %cst_176 [1] : vector<16x32xf32> to vector<16xf32>
    %442 = vector.shape_cast %441 : vector<16xf32> to vector<16x1xf32>
    %cst_177 = arith.constant dense<0.000000e+00> : vector<2x1xf32>
    %443 = tpu.matmul %430, %442, %cst_177 {dimension_numbers = #tpu.dot_dimension_numbers<[1], [0], [0], [1], [0, 0, 1, 1], [], []>} : vector<2x16xf32>, vector<16x1xf32>, vector<2x1xf32> -> vector<2x1xf32>
    %444 = arith.mulf %443, %433 : vector<2x1xf32>
    %cst_178 = arith.constant 9.99999974E-6 : f32
    %445 = vector.broadcast %cst_178 : f32 to vector<2x1xf32>
    %446 = arith.addf %444, %445 : vector<2x1xf32>
    %447 = math.rsqrt %446 : vector<2x1xf32>
    %448 = tpu.transpose %430, [1, 0] : vector<2x16xf32> -> vector<16x2xf32>
    %cst_179 = arith.constant dense<0.000000e+00> : vector<16x1xf32>
    %449 = tpu.matmul %448, %447, %cst_179 {dimension_numbers = #tpu.dot_dimension_numbers<[1], [0], [0], [1], [0, 0, 1, 1], [], []>} : vector<16x2xf32>, vector<2x1xf32>, vector<16x1xf32> -> vector<16x1xf32>
    %450 = vector.broadcast %449 : vector<16x1xf32> to vector<16x32xf32>
    %451 = arith.mulf %439, %450 : vector<16x32xf32>
    %c0_180 = arith.constant 0 : index
    %c0_181 = arith.constant 0 : index
    %452 = vector.load %arg26[%c0_180, %c0_181] : memref<16x32xf32, #tpu.memory_space<vmem>>, vector<16x32xf32>
    tpu.vector_store %arg26[%c0_180, %c0_181], %451 {strides = array<i32>} : memref<16x32xf32, #tpu.memory_space<vmem>>, vector<16x32xf32>,
    %c0_182 = arith.constant 0 : index
    %c0_183 = arith.constant 0 : index
    %453 = vector.load %arg24[%c0_182, %c0_183] : memref<2x12xf32, #tpu.memory_space<vmem>>, vector<2x12xf32>
    %cst_184 = arith.constant dense<0.000000e+00> : vector<2xf32>
    %454 = vector.multi_reduction <add>, %453, %cst_184 [1] : vector<2x12xf32> to vector<2xf32>
    %455 = vector.shape_cast %454 : vector<2xf32> to vector<2x1xf32>
    %456 = tpu.reciprocal %455 : vector<2x1xf32> -> vector<2x1xf32>
    %cst_185 = arith.constant dense<0.000000e+00> : vector<2x32xf32>
    %457 = tpu.matmul %453, %344, %cst_185 {dimension_numbers = #tpu.dot_dimension_numbers<[1], [0], [0], [1], [0, 0, 1, 1], [], []>} : vector<2x12xf32>, vector<12x32xf32>, vector<2x32xf32> -> vector<2x32xf32>
    %458 = vector.broadcast %456 : vector<2x1xf32> to vector<2x32xf32>
    %459 = arith.mulf %457, %458 : vector<2x32xf32>
    %460 = tpu.transpose %453, [1, 0] : vector<2x12xf32> -> vector<12x2xf32>
    %cst_186 = arith.constant dense<0.000000e+00> : vector<12x32xf32>
    %461 = tpu.matmul %460, %459, %cst_186 {dimension_numbers = #tpu.dot_dimension_numbers<[1], [0], [0], [1], [0, 0, 1, 1], [], []>} : vector<12x2xf32>, vector<2x32xf32>, vector<12x32xf32> -> vector<12x32xf32>
    %462 = arith.subf %344, %461 : vector<12x32xf32>
    %463 = arith.mulf %462, %462 : vector<12x32xf32>
    %cst_187 = arith.constant dense<0.000000e+00> : vector<12xf32>
    %464 = vector.multi_reduction <add>, %463, %cst_187 [1] : vector<12x32xf32> to vector<12xf32>
    %465 = vector.shape_cast %464 : vector<12xf32> to vector<12x1xf32>
    %cst_188 = arith.constant dense<0.000000e+00> : vector<2x1xf32>
    %466 = tpu.matmul %453, %465, %cst_188 {dimension_numbers = #tpu.dot_dimension_numbers<[1], [0], [0], [1], [0, 0, 1, 1], [], []>} : vector<2x12xf32>, vector<12x1xf32>, vector<2x1xf32> -> vector<2x1xf32>
    %467 = arith.mulf %466, %456 : vector<2x1xf32>
    %cst_189 = arith.constant 9.99999974E-6 : f32
    %468 = vector.broadcast %cst_189 : f32 to vector<2x1xf32>
    %469 = arith.addf %467, %468 : vector<2x1xf32>
    %470 = math.rsqrt %469 : vector<2x1xf32>
    %471 = tpu.transpose %453, [1, 0] : vector<2x12xf32> -> vector<12x2xf32>
    %cst_190 = arith.constant dense<0.000000e+00> : vector<12x1xf32>
    %472 = tpu.matmul %471, %470, %cst_190 {dimension_numbers = #tpu.dot_dimension_numbers<[1], [0], [0], [1], [0, 0, 1, 1], [], []>} : vector<12x2xf32>, vector<2x1xf32>, vector<12x1xf32> -> vector<12x1xf32>
    %473 = vector.broadcast %472 : vector<12x1xf32> to vector<12x32xf32>
    %474 = arith.mulf %462, %473 : vector<12x32xf32>
    %c0_191 = arith.constant 0 : index
    %c0_192 = arith.constant 0 : index
    %475 = vector.load %arg27[%c0_191, %c0_192] : memref<12x32xf32, #tpu.memory_space<vmem>>, vector<12x32xf32>
    tpu.vector_store %arg27[%c0_191, %c0_192], %474 {strides = array<i32>} : memref<12x32xf32, #tpu.memory_space<vmem>>, vector<12x32xf32>,
    %c0_193 = arith.constant 0 : index
    %c0_194 = arith.constant 0 : index
    %476 = vector.load %arg25[%c0_193, %c0_194] : memref<2x12xf32, #tpu.memory_space<vmem>>, vector<2x12xf32>
    %cst_195 = arith.constant dense<0.000000e+00> : vector<2xf32>
    %477 = vector.multi_reduction <add>, %476, %cst_195 [1] : vector<2x12xf32> to vector<2xf32>
    %478 = vector.shape_cast %477 : vector<2xf32> to vector<2x1xf32>
    %479 = tpu.reciprocal %478 : vector<2x1xf32> -> vector<2x1xf32>
    %cst_196 = arith.constant dense<0.000000e+00> : vector<2x32xf32>
    %480 = tpu.matmul %476, %429, %cst_196 {dimension_numbers = #tpu.dot_dimension_numbers<[1], [0], [0], [1], [0, 0, 1, 1], [], []>} : vector<2x12xf32>, vector<12x32xf32>, vector<2x32xf32> -> vector<2x32xf32>
    %481 = vector.broadcast %479 : vector<2x1xf32> to vector<2x32xf32>
    %482 = arith.mulf %480, %481 : vector<2x32xf32>
    %483 = tpu.transpose %476, [1, 0] : vector<2x12xf32> -> vector<12x2xf32>
    %cst_197 = arith.constant dense<0.000000e+00> : vector<12x32xf32>
    %484 = tpu.matmul %483, %482, %cst_197 {dimension_numbers = #tpu.dot_dimension_numbers<[1], [0], [0], [1], [0, 0, 1, 1], [], []>} : vector<12x2xf32>, vector<2x32xf32>, vector<12x32xf32> -> vector<12x32xf32>
    %485 = arith.subf %429, %484 : vector<12x32xf32>
    %486 = arith.mulf %485, %485 : vector<12x32xf32>
    %cst_198 = arith.constant dense<0.000000e+00> : vector<12xf32>
    %487 = vector.multi_reduction <add>, %486, %cst_198 [1] : vector<12x32xf32> to vector<12xf32>
    %488 = vector.shape_cast %487 : vector<12xf32> to vector<12x1xf32>
    %cst_199 = arith.constant dense<0.000000e+00> : vector<2x1xf32>
    %489 = tpu.matmul %476, %488, %cst_199 {dimension_numbers = #tpu.dot_dimension_numbers<[1], [0], [0], [1], [0, 0, 1, 1], [], []>} : vector<2x12xf32>, vector<12x1xf32>, vector<2x1xf32> -> vector<2x1xf32>
    %490 = arith.mulf %489, %479 : vector<2x1xf32>
    %cst_200 = arith.constant 9.99999974E-6 : f32
    %491 = vector.broadcast %cst_200 : f32 to vector<2x1xf32>
    %492 = arith.addf %490, %491 : vector<2x1xf32>
    %493 = math.rsqrt %492 : vector<2x1xf32>
    %494 = tpu.transpose %476, [1, 0] : vector<2x12xf32> -> vector<12x2xf32>
    %cst_201 = arith.constant dense<0.000000e+00> : vector<12x1xf32>
    %495 = tpu.matmul %494, %493, %cst_201 {dimension_numbers = #tpu.dot_dimension_numbers<[1], [0], [0], [1], [0, 0, 1, 1], [], []>} : vector<12x2xf32>, vector<2x1xf32>, vector<12x1xf32> -> vector<12x1xf32>
    %496 = vector.broadcast %495 : vector<12x1xf32> to vector<12x32xf32>
    %497 = arith.mulf %485, %496 : vector<12x32xf32>
    %c0_202 = arith.constant 0 : index
    %c0_203 = arith.constant 0 : index
    %498 = vector.load %arg28[%c0_202, %c0_203] : memref<12x32xf32, #tpu.memory_space<vmem>>, vector<12x32xf32>
    tpu.vector_store %arg28[%c0_202, %c0_203], %497 {strides = array<i32>} : memref<12x32xf32, #tpu.memory_space<vmem>>, vector<12x32xf32>,
    return
  }
}

</mosaic_0001>

<bundles_post_ra>
// kernel: tpu_custom_call.1
= control target key start
LH: loop header
LB: loop body
LE: loop exit
PB: predicated region body
PF: predicated region fallthrough
CT: control target
= control target key end

     0   :  { %s5852_s0 = inlined_call_operand.hbm [shape: f32[16,32], index: 0, kind: input, shape index: {}]   ;;  %s5853_s1 = inlined_call_operand.hbm [shape: f32[12,32], index: 1, kind: input, shape index: {}]   ;;  %s5854_s2 = inlined_call_operand.hbm [shape: f32[12,32], index: 2, kind: input, shape index: {}]   ;;  %s5855_s3 = inlined_call_operand.vmem [shape: f32[32,32], index: 3, kind: input, shape index: {}]   ;;  %s5856_s4 = inlined_call_operand.hbm [shape: f32[2,32], index: 4, kind: input, shape index: {}]   ;;  %s5857_s5 = inlined_call_operand.vmem [shape: f32[32,2], index: 5, kind: input, shape index: {}]   ;;  %s5858_s6 = inlined_call_operand.vmem [shape: f32[16,16], index: 6, kind: input, shape index: {}]   ;;  %s5859_s7 = inlined_call_operand.vmem [shape: f32[32,32], index: 7, kind: input, shape index: {}]   ;;  %s5860_s8 = inlined_call_operand.vmem [shape: f32[2,32], index: 8, kind: input, shape index: {}]   ;;  %s5861_s9 = inlined_call_operand.vmem [shape: f32[32,2], index: 9, kind: input, shape index: {}]   ;;  %s5862_s10 = inlined_call_operand.hbm [shape: f32[16,12], index: 10, kind: input, shape index: {}]   ;;  %s5863_s11 = inlined_call_operand.vmem [shape: f32[32,32], index: 11, kind: input, shape index: {}]   ;;  %s5864_s12 = inlined_call_operand.hbm [shape: f32[2,32], index: 12, kind: input, shape index: {}]   ;;  %s5865_s13 = inlined_call_operand.vmem [shape: f32[32,2], index: 13, kind: input, shape index: {}]   ;;  %s5866_s14 = inlined_call_operand.vmem [shape: f32[16,12], index: 14, kind: input, shape index: {}]   ;;  %s5867_s15 = inlined_call_operand.vmem [shape: f32[32,32], index: 15, kind: input, shape index: {}]   ;;  %s5868_s16 = inlined_call_operand.hbm [shape: f32[2,32], index: 16, kind: input, shape index: {}]   ;;  %s5869_s17 = inlined_call_operand.vmem [shape: f32[32,2], index: 17, kind: input, shape index: {}]   ;;  %s5870_s18 = inlined_call_operand.hbm [shape: f32[12,16], index: 18, kind: input, shape index: {}]   ;;  %s5871_s19 = inlined_call_operand.vmem [shape: f32[32,32], index: 19, kind: input, shape index: {}]   ;;  %s5872_s20 = inlined_call_operand.hbm [shape: f32[2,32], index: 20, kind: input, shape index: {}]   ;;  %s5873_s21 = inlined_call_operand.vmem [shape: f32[32,2], index: 21, kind: input, shape index: {}]   ;;  %s5874_s22 = inlined_call_operand.vmem [shape: f32[12,16], index: 22, kind: input, shape index: {}]   ;;  %s5875_s23 = inlined_call_operand.hbm [shape: f32[2,16], index: 23, kind: input, shape index: {}]   ;;  %s5876_s24 = inlined_call_operand.vmem [shape: f32[2,12], index: 24, kind: input, shape index: {}]   ;;  %s5877_s25 = inlined_call_operand.hbm [shape: f32[2,12], index: 25, kind: input, shape index: {}]   ;;  %s5878_s26 = inlined_call_operand.hbm [shape: f32[16,32], index: 26, kind: output, shape index: {0}]   ;;  %s5879_s27 = inlined_call_operand.hbm [shape: f32[12,32], index: 27, kind: output, shape index: {1}]   ;;  %s5880_s28 = inlined_call_operand.hbm [shape: f32[12,32], index: 28, kind: output, shape index: {2}]  }
   0x1   :  { %5887 = sst [smem:[#allocation32_spill]] %s5852_s0 }
   0x2   :  { %5888 = sst [smem:[#allocation33_spill]] %s5853_s1 }
   0x3   :  { %5889 = sst [smem:[#allocation34_spill]] %s5854_s2 }
   0x4   :  { %5890 = sst [smem:[#allocation35_spill]] %s5855_s3 }
   0x5   :  { %5891 = sst [smem:[#allocation36_spill]] %s5856_s4 }
   0x6   :  { %5892 = sst [smem:[#allocation37_spill]] %s5857_s5 }
   0x7   :  { %5893 = sst [smem:[#allocation38_spill]] %s5858_s6 }
   0x8   :  { %5894 = sst [smem:[#allocation39_spill]] %s5859_s7 }
   0x9   :  { %5895 = sst [smem:[#allocation40_spill]] %s5860_s8 }
   0xa   :  { %5896 = sst [smem:[#allocation41_spill]] %s5861_s9 }
   0xb   :  { %5897 = sst [smem:[#allocation42_spill]] %s5862_s10 }
   0xc   :  { %5898 = sst [smem:[#allocation43_spill]] %s5863_s11 }
   0xd   :  { %5899 = sst [smem:[#allocation44_spill]] %s5864_s12 }
   0xe   :  { %5900 = sst [smem:[#allocation45_spill]] %s5880_s28 }
   0xf   :  { %34 = vsyncpa [#allocation3], 0 }
  0x10   :  { %35 = vsyncpa [#allocation6], 0 }
  0x11   :  { %36 = vsyncpa [#allocation9], 0 }
  0x12   :  { %37 = vsyncpa [#allocation12], 0 }
  0x13   :  { %38 = vsyncpa [#allocation15], 0 }
  0x14   :  { %39 = vsyncpa [#allocation18], 0 }
  0x15   :  { %40 = vsyncpa [#allocation4], 0 }
  0x16   :  { %41 = vsyncpa [#allocation22], 0  ;;  %s4944_s8 = smov [#allocation5]   ;;  %s4945_s9 = smov [#allocation8]  }
  0x17   :  { %s59_s5 = sshll.u32 %s4944_s8, 4  ;;  %s86_s30 = sshll.u32 %s4945_s9, 4  ;;  %s60_s5 = int_to_ptr.vmem [resolvable:$true] %s59_s5  ;;  %s87_s30 = int_to_ptr.vmem [resolvable:$true] %s86_s30 }
  0x18   :  { %s4656_s3 = scalar_lea.vmem %s60_s5, 256  ;;  %p4661_p1 = scmp.lt.s32.totalorder %s60_s5, %s60_s5 }
  0x19   :  { %p4657_p0 = scmp.ne.s32.totalorder %s60_s5, %s4656_s3  ;;  %p4662_p2 = scmp.lt.s32.totalorder %s4656_s3, %s4656_s3 }
  0x1b   :  { %p4663_p3 = por %p4662_p2, %p4661_p1 }
  0x1d   :  { %p4664_p4 = pnand %p4663_p3, %p4657_p0 }
  0x1f   :  { %4667 = shalt.err (!%p4664_p4)
}
  0x20   :  { %s4946_s6 = smov 128   ;;  %s4947_s10 = smov 8  }
  0x21   :  { %s5901_s29 = sld [smem:[#allocation33_spill]]  ;;  %s4676_s2 = scalar_lea.vmem %s87_s30, 32 }
  0x22   :  { %p4677_p5 = scmp.ne.s32.totalorder %s87_s30, %s4676_s2  ;;  %p4681_p6 = scmp.lt.s32.totalorder %s87_s30, %s87_s30 }
  0x23   :  { %p4682_p7 = scmp.lt.s32.totalorder %s4676_s2, %s4676_s2 }
  0x25   :  { %p4683_p8 = por %p4682_p7, %p4681_p6 }
  0x27   :  { %65 = dma.hbm_to_vmem [thread:$0]  %s5901_s29, 256, %s60_s5, [#allocation6], %s4946_s6, %s4946_s6, %s4947_s10  }
  0x28   :  { %p4684_p9 = pnand %p4683_p8, %p4677_p5 }
  0x2a   :  { %4687 = shalt.err (!%p4684_p9)
}
  0x2b   :  { %s5902_s1 = sld [smem:[#allocation36_spill]]  ;;  %s4948_s4 = smov [#allocation11]  }
  0x2c   :  { %s120_s8 = sshll.u32 %s4948_s4, 4  ;;  %s4949_s9 = smov [#allocation14]   ;;  %s121_s8 = int_to_ptr.vmem [resolvable:$true] %s120_s8 }
  0x2d   :  { %s147_s3 = sshll.u32 %s4949_s9, 4  ;;  %s4696_s28 = scalar_lea.vmem %s121_s8, 32  ;;  %s148_s3 = int_to_ptr.vmem [resolvable:$true] %s147_s3 }
  0x2e   :  { %p4697_p10 = scmp.ne.s32.totalorder %s121_s8, %s4696_s28  ;;  %p4701_p11 = scmp.lt.s32.totalorder %s121_s8, %s121_s8 }
  0x2f   :  { %p4702_p12 = scmp.lt.s32.totalorder %s4696_s28, %s4696_s28 }
  0x31   :  { %89 = dma.hbm_to_vmem [thread:$0]  %s5902_s1, 32, %s87_s30, [#allocation9]  }
  0x32   :  { %p4703_p13 = por %p4702_p12, %p4701_p11 }
  0x34   :  { %p4704_p0 = pnand %p4703_p13, %p4697_p10 }
  0x36   :  { %4707 = shalt.err (!%p4704_p0)
}
  0x37   :  { %s5903_s11 = sld [smem:[#allocation44_spill]]  ;;  %s4716_s29 = scalar_lea.vmem %s148_s3, 256 }
  0x38   :  { %p4717_p1 = scmp.ne.s32.totalorder %s148_s3, %s4716_s29  ;;  %p4721_p2 = scmp.lt.s32.totalorder %s148_s3, %s148_s3 }
  0x39   :  { %p4722_p3 = scmp.lt.s32.totalorder %s4716_s29, %s4716_s29 }
  0x3b   :  { %p4723_p4 = por %p4722_p3, %p4721_p2 }
  0x3d   :  { %123 = dma.hbm_to_vmem [thread:$0]  %s5903_s11, 32, %s121_s8, [#allocation12]  }
  0x3e   :  { %p4724_p5 = pnand %p4723_p4, %p4717_p1 }
  0x40   :  { %4727 = shalt.err (!%p4724_p5)
}
  0x41   :  { %153 = dma.hbm_to_vmem [thread:$0]  %s5870_s18, 256, %s148_s3, [#allocation15], %s4946_s6, %s4946_s6, %s4947_s10  }
  0x42   :  { %s4950_s28 = smov [#allocation17]   ;;  %s4951_s12 = smov [#allocation2]  }
  0x43   :  { %s176_s7 = sshll.u32 %s4950_s28, 4  ;;  %s47_s1 = sshll.u32 %s4951_s12, 4  ;;  %s177_s7 = int_to_ptr.vmem [resolvable:$true] %s176_s7  ;;  %s48_s1 = int_to_ptr.vmem [resolvable:$true] %s47_s1 }
  0x44   :  { %s4736_s4 = scalar_lea.vmem %s177_s7, 32  ;;  %p4741_p7 = scmp.lt.s32.totalorder %s177_s7, %s177_s7 }
  0x45   :  { %p4737_p6 = scmp.ne.s32.totalorder %s177_s7, %s4736_s4  ;;  %p4742_p8 = scmp.lt.s32.totalorder %s4736_s4, %s4736_s4 }
  0x47   :  { %p4743_p9 = por %p4742_p8, %p4741_p7 }
  0x49   :  { %p4744_p10 = pnand %p4743_p9, %p4737_p6 }
  0x4b   :  { %4747 = shalt.err (!%p4744_p10)
}
  0x4c   :  { %179 = dma.hbm_to_vmem [thread:$0]  %s5875_s23, 32, %s177_s7, [#allocation18]  }
  0x4d   :  { %s4756_s5 = scalar_lea.vmem %s48_s1, 256  ;;  %p4761_p12 = scmp.lt.s32.totalorder %s48_s1, %s48_s1 }
  0x4e   :  { %p4757_p11 = scmp.ne.s32.totalorder %s48_s1, %s4756_s5  ;;  %p4762_p13 = scmp.lt.s32.totalorder %s4756_s5, %s4756_s5 }
  0x50   :  { %p4763_p0 = por %p4762_p13, %p4761_p12 }
  0x52   :  { %p4764_p1 = pnand %p4763_p0, %p4757_p11 }
  0x54   :  { %4767 = shalt.err (!%p4764_p1)
}
  0x55   :  { %s5904_s0 = sld [smem:[#allocation32_spill]]  ;;  %s4952_s11 = smov [#allocation7]  }
  0x56   :  { %s71_s29 = sshll.u32 %s4952_s11, 4  ;;  %s4953_s30 = smov [#allocation10]   ;;  %s72_s29 = int_to_ptr.vmem [resolvable:$true] %s71_s29 }
  0x57   :  { %s105_s2 = sshll.u32 %s4953_s30, 4  ;;  %s4776_s23 = scalar_lea.vmem %s72_s29, 256  ;;  %s106_s2 = int_to_ptr.vmem [resolvable:$true] %s105_s2 }
  0x58   :  { %p4777_p2 = scmp.ne.s32.totalorder %s72_s29, %s4776_s23  ;;  %p4781_p3 = scmp.lt.s32.totalorder %s72_s29, %s72_s29 }
  0x59   :  { %p4782_p4 = scmp.lt.s32.totalorder %s4776_s23, %s4776_s23 }
  0x5b   :  { %53 = dma.hbm_to_vmem [thread:$0]  %s5904_s0, 256, %s48_s1, [#allocation3], %s4946_s6, %s4946_s6, %s4947_s10  }
  0x5c   :  { %p4783_p5 = por %p4782_p4, %p4781_p3 }
  0x5e   :  { %p4784_p6 = pnand %p4783_p5, %p4777_p2 }
  0x60   :  { %4787 = shalt.err (!%p4784_p6)
}
  0x61   :  { %s5905_s12 = sld [smem:[#allocation34_spill]]  ;;  %s4796_s1 = scalar_lea.vmem %s106_s2, 256 }
  0x62   :  { %p4797_p7 = scmp.ne.s32.totalorder %s106_s2, %s4796_s1  ;;  %p4801_p8 = scmp.lt.s32.totalorder %s106_s2, %s106_s2 }
  0x63   :  { %p4802_p9 = scmp.lt.s32.totalorder %s4796_s1, %s4796_s1 }
  0x65   :  { %p4803_p10 = por %p4802_p9, %p4801_p8 }
  0x67   :  { %77 = dma.hbm_to_vmem [thread:$0]  %s5905_s12, 256, %s72_s29, [#allocation6], %s4946_s6, %s4946_s6, %s4947_s10  }
  0x68   :  { %p4804_p11 = pnand %p4803_p10, %p4797_p7 }
  0x6a   :  { %4807 = shalt.err (!%p4804_p11)
}
  0x6b   :  { %s5906_s9 = sld [smem:[#allocation42_spill]]  ;;  %s4954_s5 = smov [#allocation13]  }
  0x6c   :  { %s136_s18 = sshll.u32 %s4954_s5, 4  ;;  %s4955_s3 = smov [#allocation16]   ;;  %s137_s18 = int_to_ptr.vmem [resolvable:$true] %s136_s18 }
  0x6d   :  { %s162_s0 = sshll.u32 %s4955_s3, 4  ;;  %s4816_s11 = scalar_lea.vmem %s137_s18, 32  ;;  %s163_s0 = int_to_ptr.vmem [resolvable:$true] %s162_s0 }
  0x6e   :  { %p4817_p12 = scmp.ne.s32.totalorder %s137_s18, %s4816_s11  ;;  %p4821_p13 = scmp.lt.s32.totalorder %s137_s18, %s137_s18 }
  0x6f   :  { %p4822_p0 = scmp.lt.s32.totalorder %s4816_s11, %s4816_s11 }
  0x71   :  { %111 = dma.hbm_to_vmem [thread:$0]  %s5906_s9, 256, %s106_s2, [#allocation9], %s4946_s6, %s4946_s6, %s4947_s10  }
  0x72   :  { %p4823_p1 = por %p4822_p0, %p4821_p13 }
  0x74   :  { %p4824_p2 = pnand %p4823_p1, %p4817_p12 }
  0x76   :  { %4827 = shalt.err (!%p4824_p2)
}
  0x77   :  { %139 = dma.hbm_to_vmem [thread:$0]  %s5868_s16, 32, %s137_s18, [#allocation12]  }
  0x78   :  { %s4836_s23 = scalar_lea.vmem %s163_s0, 32  ;;  %p4841_p4 = scmp.lt.s32.totalorder %s163_s0, %s163_s0 }
  0x79   :  { %p4837_p3 = scmp.ne.s32.totalorder %s163_s0, %s4836_s23  ;;  %p4842_p5 = scmp.lt.s32.totalorder %s4836_s23, %s4836_s23 }
  0x7b   :  { %p4843_p6 = por %p4842_p5, %p4841_p4 }
  0x7d   :  { %p4844_p7 = pnand %p4843_p6, %p4837_p3 }
  0x7f   :  { %4847 = shalt.err (!%p4844_p7)
}
  0x80   :  { %165 = dma.hbm_to_vmem [thread:$0]  %s5872_s20, 32, %s163_s0, [#allocation15]  }
  0x81   :  { %s4956_s7 = smov [#allocation19]  }
  0x82   :  { %s188_s12 = sshll.u32 %s4956_s7, 4  ;;  %s189_s12 = int_to_ptr.vmem [resolvable:$true] %s188_s12 }
  0x83   :  { %s4856_s1 = scalar_lea.vmem %s189_s12, 32  ;;  %p4861_p9 = scmp.lt.s32.totalorder %s189_s12, %s189_s12 }
  0x84   :  { %p4857_p8 = scmp.ne.s32.totalorder %s189_s12, %s4856_s1  ;;  %p4862_p10 = scmp.lt.s32.totalorder %s4856_s1, %s4856_s1 }
  0x86   :  { %p4863_p11 = por %p4862_p10, %p4861_p9 }
  0x88   :  { %p4864_p12 = pnand %p4863_p11, %p4857_p8 }
  0x8a   :  { %4867 = shalt.err (!%p4864_p12)
}
  0x8b   :  { %191 = dma.hbm_to_vmem [thread:$0]  %s5877_s25, 32, %s189_s12, [#allocation18]  }
  0x8c   :  { %4928 = dma.done.wait [#allocation3], 256  }
  0x8d   :  { %4929 = vsyncadd [#allocation3], 4294967040 }
  0x8e   :  { %4930 = dma.done.wait [#allocation6], 512  }
  0x8f   :  { %4931 = vsyncadd [#allocation6], 4294966784 }
  0x90   :  { %4932 = dma.done.wait [#allocation9], 288  }
  0x91   :  { %4933 = vsyncadd [#allocation9], 4294967008 }
  0x92   :  { %4934 = dma.done.wait [#allocation12], 64  }
  0x93   :  { %4935 = vsyncadd [#allocation12], 4294967232 }
  0x94   :  { %4936 = dma.done.wait [#allocation15], 288  }
  0x95   :  { %4937 = vsyncadd [#allocation15], 4294967008 }
  0x96   :  { %4938 = dma.done.wait [#allocation18], 64  }
  0x97   :  { %4939 = vsyncadd [#allocation18], 4294967232  ;;  %v4957_v0 = vmov 0.0   ;;  %vm4958_vm0 = vmmov 0   ;;  %vm242_vm1 = vcmask 261120   ;;  %s5907_s8 = sld [smem:[#allocation35_spill]]  ;;  %v474_v23 = vlaneseq }
  0x98   :  { %4247 = vmatprep.subr.mxu1 %v4957_v0  ;;  %4251 = vmatprep.mubr.msk.f32.mxu1 %vm4958_vm0, %v4957_v0  ;;  %v5166_v3 = vld [vmem:[#allocation2] sm:$0xff]  ;;  %v5173_v5 = vld [vmem:[#allocation2 + $0x8] sm:$0xff]  ;;  %s5908_s23 = sld [smem:[#allocation37_spill]]  ;;  %v235_v9 = vld [vmem:[#allocation8] sm:$0x3]  ;;  %v4959_v12 = vmov 1  }
  0x99   :  { %4244 = vmatprep.mubr.msk.f32.mxu0 %vm242_vm1, %v5166_v3  ;;  %4248 = vmatpush3.xpose.msk.msra.mxu1 %vm242_vm1, %v5173_v5  ;;  %v4960_v13 = vmov 0   ;;  %s5909_s25 = sld [smem:[#allocation39_spill]]  ;;  %v5210_v16 = vld [vmem:[#allocation5] sm:$0xff]  ;;  %v5223_v20 = vld [vmem:[#allocation5 + $0x8] sm:$0xf]  ;;  %v5235_v24 = vand.u32 127, %v474_v23 }
  0x9a   :  { %4249 = vmatprep.subr.mxu1 %v4957_v0  ;;  %4543 = vset.pattern.permute.xlu0 %v4959_v12  ;;  %s5910_s30 = sld [smem:[#allocation41_spill]]  ;;  %v487_v33 = vshrl.u32 %v474_v23, 7  ;;  %vm500_vm9 = vcmask 130048   ;;  %s4962_s4 = smov [#allocation20]  }
  0x9b   :  { %4544 = vset.pattern.permute.xlu1 %v4960_v13  ;;  %vm586_vm2 = vcmp.ge.s32.totalorder %v5235_v24, 16  ;;  %vm587_vm3 = vcmp.lt.s32.totalorder %v5235_v24, 32  ;;  %vm530_vm5 = vcmp.lt.s32.totalorder %v5235_v24, 16  ;;  %s5913_s20 = sld [smem:[#allocation38_spill]] }
  0x9c   :  { %vm5239_vm4 = vmand %vm586_vm2, %vm587_vm3  ;;  %v5269_v34 = vsub.s32 0, %v487_v33  ;;  %v5271_v35 = vsub.s32 1, %v487_v33  ;;  %vm1110_vm3 = vcmask 1043456   ;;  %s5914_s18 = sld [smem:[#allocation40_spill]] }
  0x9d   :  { %v234_v1 = vld [vmem:[%s5907_s8 + $0x18] sm:$0xff]  ;;  %v233_v2 = vld [vmem:[%s5907_s8 + $0x10] sm:$0xff]  ;;  %v232_v4 = vld [vmem:[%s5907_s8 + $0x8] sm:$0xff]  ;;  %4250 = vmatpush3.xpose.msk.msra.mxu1 %vm242_vm1, %v5166_v3  ;;  %s5915_s11 = sld [smem:[#allocation43_spill]] }
  0x9e   :  { %4236 = vmatprep.subr.mxu0 %v234_v1  ;;  %v231_v6 = vld [vmem:[%s5907_s8] sm:$0xff]  ;;  %v239_v7 = vld [vmem:[%s5908_s23 + $0x18] sm:$0xff]  ;;  %v238_v8 = vld [vmem:[%s5908_s23 + $0x10] sm:$0xff] }
  0x9f   :  { %4237 = vmatpush3.msra.mxu0 %v234_v1  ;;  %v237_v10 = vld [vmem:[%s5908_s23 + $0x8] sm:$0xff]  ;;  %v236_v11 = vld [vmem:[%s5908_s23] sm:$0xff]  ;;  %v758_v14 = vld [vmem:[%s5909_s25 + $0x18] sm:$0xff] }
  0xa0   :  { %4238 = vmatprep.subr.mxu0 %v233_v2  ;;  %4252 = vmatmul.mubr.msk.f32.vlgmr.msra.gmra.mxu1 %vm242_vm1, %v235_v9  ;;  %v757_v15 = vld [vmem:[%s5909_s25 + $0x10] sm:$0xff]  ;;  %v756_v17 = vld [vmem:[%s5909_s25 + $0x8] sm:$0xff]  ;;  %v755_v18 = vld [vmem:[%s5909_s25] sm:$0xff] }
  0xa1   :  { %4239 = vmatpush3.msra.mxu0 %v233_v2  ;;  %v763_v19 = vld [vmem:[%s5910_s30 + $0x18] sm:$0xff]  ;;  %v762_v21 = vld [vmem:[%s5910_s30 + $0x10] sm:$0xff]  ;;  %v761_v22 = vld [vmem:[%s5910_s30 + $0x8] sm:$0xff] }
  0xa2   :  { %4240 = vmatprep.subr.mxu0 %v232_v4  ;;  %v760_v30 = vld [vmem:[%s5910_s30] sm:$0xff]  ;;  %v241_v47 = vld [vmem:[%s5913_s20 + $0x8] sm:$0xff] }
  0xa3   :  { %4241 = vmatpush3.msra.mxu0 %v232_v4  ;;  %v240_v38 = vld [vmem:[%s5913_s20] sm:$0xff]  ;;  %vm473_vm10 = vcmp.gt.f32.partialorder %v241_v47, 0.0  ;;  %s3934_s20 = sshll.u32 %s4962_s4, 4  ;;  %s3935_s20 = int_to_ptr.vmem [resolvable:$true] %s3934_s20 }
  0xa4   :  { %4242 = vmatprep.subr.mxu0 %v231_v6  ;;  %vm472_vm6 = vcmp.gt.f32.partialorder %v240_v38, 0.0 }
  0xa5   :  { %4243 = vmatpush3.msra.mxu0 %v231_v6 }
  0xa6   :  { %4245 = vmatmul.mubr.msk.f32.vlgmr.msra.gmra.mxu0 %vm242_vm1, %v5173_v5  ;;  %4254 = vmatprep.subr.mxu0 %v239_v7 }
  0xa7   :  { %4255 = vmatpush3.msra.mxu0 %v239_v7  ;;  %4262 = vmatprep.mubr.msk.f32.mxu0 %vm242_vm1, %v5166_v3 }
  0xa8   :  { %4256 = vmatprep.subr.mxu0 %v238_v8 }
  0xa9   :  { %4257 = vmatpush3.msra.mxu0 %v238_v8 }
  0xaa   :  { %4258 = vmatprep.subr.mxu0 %v237_v10 }
  0xab   :  { %4259 = vmatpush3.msra.mxu0 %v237_v10 }
  0xac   :  { %4260 = vmatprep.subr.mxu0 %v236_v11 }
  0xad   :  { %4261 = vmatpush3.msra.mxu0 %v236_v11 }
  0xae   :  { %4263 = vmatmul.mubr.msk.f32.vlgmr.msra.gmra.mxu0 %vm242_vm1, %v5173_v5  ;;  %4279 = vmatprep.subr.mxu0 %v758_v14 }
  0xaf   :  { %4280 = vmatpush3.msra.mxu0 %v758_v14  ;;  %4287 = vmatprep.mubr.msk.f32.mxu0 %vm242_vm1, %v5210_v16 }
  0xb0   :  { %4281 = vmatprep.subr.mxu0 %v757_v15 }
  0xb1   :  { %4282 = vmatpush3.msra.mxu0 %v757_v15 }
  0xb2   :  { %4283 = vmatprep.subr.mxu0 %v756_v17 }
  0xb3   :  { %4284 = vmatpush3.msra.mxu0 %v756_v17 }
  0xb4   :  { %4285 = vmatprep.subr.mxu0 %v755_v18 }
  0xb5   :  { %4286 = vmatpush3.msra.mxu0 %v755_v18 }
  0xb6   :  { %4297 = vmatprep.subr.mxu0 %v763_v19  ;;  %4288 = vmatmul.mubr.msk.f32.vlgmr.msra.gmra.mxu0 %vm242_vm1, %v5223_v20 }
  0xb7   :  { %4298 = vmatpush3.msra.mxu0 %v763_v19  ;;  %4305 = vmatprep.mubr.msk.f32.mxu0 %vm242_vm1, %v5166_v3 }
  0xb8   :  { %4299 = vmatprep.subr.mxu0 %v762_v21 }
  0xb9   :  { %4300 = vmatpush3.msra.mxu0 %v762_v21 }
  0xba   :  { %4301 = vmatprep.subr.mxu0 %v761_v22 }
  0xbb   :  { %4302 = vmatpush3.msra.mxu0 %v761_v22 }
  0xbc   :  { %4303 = vmatprep.subr.mxu0 %v760_v30 }
  0xbd   :  { %4304 = vmatpush3.msra.mxu0 %v760_v30 }
  0xbe   :  { %4306 = vmatmul.mubr.msk.f32.vlgmr.msra.gmra.mxu0 %vm242_vm1, %v5173_v5 }
 0x160   :  { %v393_v28 = vpop.f32.mrf.mxu1 }
 0x161   :  { %v489_v36 = vrot.slane %v393_v28, %v5269_v34  ;;  %v547_v37 = vrot.slane %v393_v28, %v5271_v35 }
 0x162   :  { %v4253_v29 = vpop.f32.mrf.mxu1 }
 0x166   :  { %v5243_v26 = vpop.f32.mrf.mxu0 }
 0x167   :  { %4265 = vmatprep.subr.msk.mxu1 %vm5239_vm4, %v5243_v26 }
 0x168   :  { %v5248_v27 = vpop.f32.mrf.mxu0  ;;  %4266 = vmatpush3.msk.msra.mxu1 %vm5239_vm4, %v5243_v26 }
 0x169   :  { %4267 = vmatprep.subr.msk.mxu1 %vm5239_vm4, %v5248_v27 }
 0x16a   :  { %4268 = vmatpush3.msk.msra.mxu1 %vm5239_vm4, %v5248_v27 }
 0x16b   :  { %4272 = vmatprep.subr.msk.mxu1 %vm530_vm5, %v5243_v26 }
 0x16e   :  { %v4264_v31 = vpop.f32.mrf.mxu0 }
 0x170   :  { %v463_v32 = vpop.f32.mrf.mxu0 }
 0x171   :  { %478 = vperm.xlu1 %4544, %v463_v32   ;;  %537 = vperm.xlu0 %4543, %v463_v32  }
 0x175   :  { %483 = vperm.xlu1 %4544, %v4264_v31   ;;  %541 = vperm.xlu0 %4543, %v4264_v31  }
 0x179   :  { %4545 = vset.pattern.permute.xlu1 %v4959_v12 }
 0x1ec   :  { %v479_v39 = vpop.permute.xlu1 %478  ;;  %v538_v40 = vpop.permute.xlu0 %537 }
 0x1ed   :  { %v490_v41 = vadd.f32 %v489_v36, %v479_v39  ;;  %v548_v42 = vadd.f32 %v547_v37, %v538_v40 }
 0x1ef   :  { %v494_v43 = vmul.f32 0.2, %v490_v41  ;;  %v552_v44 = vmul.f32 0.2, %v548_v42  ;;  %vm550_vm7 = vcmp.ge.f32.partialorder %v548_v42, 0.0  ;;  %vm492_vm8 = vcmp.ge.f32.partialorder %v490_v41, 0.0 }
 0x1f0   :  { %v484_v45 = vpop.permute.xlu1 %483  ;;  %v542_v46 = vpop.permute.xlu0 %541 }
 0x1f1   :  { %v491_v48 = vadd.f32 %v489_v36, %v484_v45  ;;  %v549_v49 = vadd.f32 %v547_v37, %v542_v46  ;;  %v554_v50 = vsel %vm550_vm7, %v548_v42, %v552_v44  ;;  %v496_v51 = vsel %vm492_vm8, %v490_v41, %v494_v43  ;;  %v4289_v37 = vpop.f32.mrf.mxu0 }
 0x1f2   :  { %v556_v52 = vsel %vm472_vm6, %v554_v50, -1e+30  ;;  %v498_v56 = vsel %vm472_vm6, %v496_v51, -1e+30 }
 0x1f3   :  { %v495_v53 = vmul.f32 0.2, %v491_v48  ;;  %v553_v54 = vmul.f32 0.2, %v549_v49  ;;  %v558_v55 = vsel %vm500_vm9, %v556_v52, -inf  ;;  %vm551_vm11 = vcmp.ge.f32.partialorder %v549_v49, 0.0  ;;  %v5291_v39 = vpop.f32.mrf.mxu0 }
 0x1f4   :  { %559 = vmax.xlane.f32.xlu0 %v558_v55  ;;  %vm493_vm12 = vcmp.ge.f32.partialorder %v491_v48, 0.0  ;;  %v501_v60 = vsel %vm500_vm9, %v498_v56, -inf }
 0x1f5   :  { %v555_v57 = vsel %vm551_vm11, %v549_v49, %v553_v54  ;;  %v497_v58 = vsel %vm493_vm12, %v491_v48, %v495_v53  ;;  %v4307_v40 = vpop.f32.mrf.mxu0  ;;  %vm1021_vm11 = vcmask 97280  }
 0x1f6   :  { %v557_v59 = vsel %vm473_vm10, %v555_v57, -1e+30  ;;  %v499_v62 = vsel %vm473_vm10, %v497_v58, -1e+30  ;;  %v5325_v57 = vsel %vm530_vm5, %v4289_v37, 0.0  ;;  %v1278_v58 = vld [vmem:[%s5915_s11 + $0x18] sm:$0xff] }
 0x1f7   :  { %v561_v61 = vsel %vm500_vm9, %v557_v59, -inf  ;;  %v504_v63 = vsel %vm500_vm9, %v499_v62, -inf  ;;  %v986_v41 = vpop.f32.mrf.mxu0  ;;  %4322 = vmatprep.subr.mxu0 %v1278_v58 }
 0x1f8   :  { %502 = vmax.xlane.f32.xlu0 %v501_v60  ;;  %562 = vmax.xlane.f32.xlu1 %v561_v61  ;;  %v1276_v60 = vld [vmem:[%s5915_s11 + $0x8] sm:$0xff]  ;;  %v1275_v61 = vld [vmem:[%s5915_s11] sm:$0xff] }
 0x1f9   :  { %4323 = vmatpush3.msra.mxu0 %v1278_v58 }
 0x1fc   :  { %505 = vmax.xlane.f32.xlu0 %v504_v63  ;;  %v1283_v63 = vld [vmem:[%s5865_s13 + $0x18] sm:$0xff] }
 0x27d   :  { %v560_v1 = vpop.xlane.xlu0 %559 }
 0x27e   :  { %v564_v2 = vsub.f32 %v556_v52, %v560_v1  ;;  %v5355_v1 = vld [vmem:[#allocation7 + $0x8] sm:$0xf] }
 0x280   :  { %v566_v4 = vmul.f32 1.442695, %v564_v2  ;;  %v1282_v2 = vld [vmem:[%s5865_s13 + $0x10] sm:$0xff] }
 0x281   :  { %v563_v6 = vpop.xlane.xlu1 %562  ;;  %v503_v7 = vpop.xlane.xlu0 %502 }
 0x282   :  { %4554 = vpow2.f32 %v566_v4  ;;  %v565_v8 = vsub.f32 %v557_v59, %v563_v6  ;;  %v507_v9 = vsub.f32 %v498_v56, %v503_v7  ;;  %v1277_v59 = vld [vmem:[%s5915_s11 + $0x10] sm:$0xff]  ;;  %v1281_v4 = vld [vmem:[%s5865_s13 + $0x8] sm:$0xff]  ;;  %v1280_v6 = vld [vmem:[%s5865_s13] sm:$0xff] }
 0x283   :  { %4324 = vmatprep.subr.mxu0 %v1277_v59 }
 0x284   :  { %v568_v10 = vmul.f32 1.442695, %v565_v8  ;;  %v509_v11 = vmul.f32 1.442695, %v507_v9  ;;  %4325 = vmatpush3.msra.mxu0 %v1277_v59 }
 0x285   :  { %v506_v14 = vpop.xlane.xlu0 %505  ;;  %4326 = vmatprep.subr.mxu0 %v1276_v60 }
 0x286   :  { %4556 = vpow2.f32 %v568_v10  ;;  %v508_v15 = vsub.f32 %v499_v62, %v506_v14  ;;  %4327 = vmatpush3.msra.mxu0 %v1276_v60  ;;  %v5348_v62 = vld [vmem:[#allocation7] sm:$0xff] }
 0x287   :  { %4558 = vpow2.f32 %v509_v11  ;;  %4328 = vmatprep.subr.mxu0 %v1275_v61  ;;  %4330 = vmatprep.mubr.msk.f32.mxu0 %vm242_vm1, %v5348_v62 }
 0x288   :  { %v511_v17 = vmul.f32 1.442695, %v508_v15  ;;  %4329 = vmatpush3.msra.mxu0 %v1275_v61 }
 0x289   :  { %4340 = vmatprep.subr.mxu0 %v1283_v63  ;;  %4331 = vmatmul.mubr.msk.f32.vlgmr.msra.gmra.mxu0 %vm242_vm1, %v5355_v1 }
 0x28a   :  { %4560 = vpow2.f32 %v511_v17  ;;  %4341 = vmatpush3.msra.mxu0 %v1283_v63  ;;  %4348 = vmatprep.mubr.msk.f32.mxu0 %vm242_vm1, %v5166_v3 }
 0x28b   :  { %4342 = vmatprep.subr.mxu0 %v1282_v2 }
 0x28c   :  { %4343 = vmatpush3.msra.mxu0 %v1282_v2 }
 0x28d   :  { %4344 = vmatprep.subr.mxu0 %v1281_v4 }
 0x28e   :  { %4345 = vmatpush3.msra.mxu0 %v1281_v4 }
 0x28f   :  { %v4555_v18 = vpop.eup %4554  ;;  %4346 = vmatprep.subr.mxu0 %v1280_v6 }
 0x290   :  { %v570_v19 = vmul.f32 %v4555_v18, %v240_v38  ;;  %4347 = vmatpush3.msra.mxu0 %v1280_v6 }
 0x291   :  { %4349 = vmatmul.mubr.msk.f32.vlgmr.msra.gmra.mxu0 %vm242_vm1, %v5173_v5 }
 0x292   :  { %v572_v21 = vsel %vm500_vm9, %v570_v19, 0.0  ;;  %4373 = vmatprep.mubr.msk.f32.mxu0 %vm242_vm1, %v5166_v3 }
 0x293   :  { %v4557_v22 = vpop.eup %4556  ;;  %573 = vadd.xlane.f32.xlu1 %v572_v21 }
 0x294   :  { %v4559_v23 = vpop.eup %4558  ;;  %v571_v28 = vmul.f32 %v4557_v22, %v241_v47 }
 0x295   :  { %v513_v29 = vmul.f32 %v4559_v23, %v240_v38  ;;  %v5380_v23 = vld [vmem:[#allocation10 + $0x8] sm:$0xff] }
 0x296   :  { %v575_v30 = vsel %vm500_vm9, %v571_v28, 0.0  ;;  %vm996_vm6 = vcmp.gt.f32.partialorder %v5380_v23, 0.0 }
 0x297   :  { %v4561_v31 = vpop.eup %4560  ;;  %576 = vadd.xlane.f32.xlu0 %v575_v30  ;;  %v515_v32 = vsel %vm500_vm9, %v513_v29, 0.0 }
 0x298   :  { %516 = vadd.xlane.f32.xlu1 %v515_v32  ;;  %v514_v33 = vmul.f32 %v4561_v31, %v241_v47 }
 0x29a   :  { %v518_v36 = vsel %vm500_vm9, %v514_v33, 0.0 }
 0x29b   :  { %519 = vadd.xlane.f32.xlu0 %v518_v36 }
 0x2a9   :  { %1053 = vperm.xlu1 %4545, %v986_v41  }
 0x2ad   :  { %4546 = vset.pattern.permute.xlu1 %v4960_v13 }
 0x2ae   :  { %999 = vperm.xlu1 %4546, %v986_v41  }
 0x2b1   :  { %1057 = vperm.xlu0 %4543, %v4307_v40  }
 0x2b2   :  { %1004 = vperm.xlu1 %4546, %v4307_v40  }
 0x2b6   :  { %4547 = vset.pattern.permute.xlu1 %v4959_v12 }
 0x31c   :  { %v574_v38 = vpop.xlane.xlu1 %573 }
 0x31d   :  { %vm578_vm13 = vcmp.gt.f32.partialorder %v574_v38, 0.0 }
 0x31e   :  { %v580_v42 = vsel %vm578_vm13, %v574_v38, 1.0 }
 0x31f   :  { %4562 = vrcp.f32 %v580_v42 }
 0x320   :  { %v577_v43 = vpop.xlane.xlu0 %576 }
 0x321   :  { %v517_v44 = vpop.xlane.xlu1 %516  ;;  %vm579_vm14 = vcmp.gt.f32.partialorder %v577_v43, 0.0 }
 0x322   :  { %vm521_vm15 = vcmp.gt.f32.partialorder %v517_v44, 0.0  ;;  %v581_v45 = vsel %vm579_vm14, %v577_v43, 1.0 }
 0x323   :  { %v523_v46 = vsel %vm521_vm15, %v517_v44, 1.0  ;;  %4564 = vrcp.f32 %v581_v45 }
 0x324   :  { %4566 = vrcp.f32 %v523_v46  ;;  %v520_v47 = vpop.xlane.xlu0 %519 }
 0x325   :  { %vm522_vm2 = vcmp.gt.f32.partialorder %v520_v47, 0.0  ;;  %v1054_v9 = vpop.permute.xlu1 %1053 }
 0x326   :  { %v524_v48 = vsel %vm522_vm2, %v520_v47, 1.0 }
 0x327   :  { %4568 = vrcp.f32 %v524_v48 }
 0x329   :  { %v1000_v17 = vpop.permute.xlu1 %999 }
 0x32c   :  { %v4563_v49 = vpop.eup %4562 }
 0x32d   :  { %v584_v50 = vmul.f32 %v4563_v49, %v570_v19  ;;  %v1058_v19 = vpop.permute.xlu0 %1057 }
 0x32f   :  { %4269 = vmatprep.mubr.msk.f32.mxu1 %vm500_vm9, %v584_v50 }
 0x330   :  { %v4565_v51 = vpop.eup %4564 }
 0x331   :  { %v4567_v52 = vpop.eup %4566  ;;  %v585_v53 = vmul.f32 %v4565_v51, %v571_v28  ;;  %v764_v28 = vld [vmem:[#allocation10] sm:$0xff] }
 0x332   :  { %v527_v54 = vmul.f32 %v4567_v52, %v513_v29  ;;  %v1005_v29 = vpop.permute.xlu1 %1004  ;;  %vm995_vm7 = vcmp.gt.f32.partialorder %v764_v28, 0.0 }
 0x333   :  { %4270 = vmatmul.mubr.msk.f32.vlgmr.msra.gmra.mxu1 %vm500_vm9, %v585_v53 }
 0x334   :  { %v4569_v55 = vpop.eup %4568  ;;  %4273 = vmatpush3.msk.msra.mxu1 %vm530_vm5, %v5243_v26  ;;  %4276 = vmatprep.mubr.msk.f32.mxu1 %vm500_vm9, %v527_v54  ;;  %v1103_v26 = vsel %vm5239_vm4, %v4289_v37, 0.0 }
 0x335   :  { %4274 = vmatprep.subr.msk.mxu1 %vm530_vm5, %v5248_v27  ;;  %v528_v56 = vmul.f32 %v4569_v55, %v514_v33 }
 0x336   :  { %4275 = vmatpush3.msk.msra.mxu1 %vm530_vm5, %v5248_v27  ;;  %v759_v27 = vld [vmem:[%s5914_s18] sm:$0x3] }
 0x337   :  { %4290 = vmatprep.subr.mxu1 %v4957_v0  ;;  %4277 = vmatmul.mubr.msk.f32.vlgmr.msra.gmra.mxu1 %vm500_vm9, %v528_v56 }
 0x338   :  { %4291 = vmatpush3.xpose.msk.msra.mxu1 %vm242_vm1, %v5223_v20  ;;  %4294 = vmatprep.mubr.msk.f32.mxu1 %vm4958_vm0, %v4957_v0 }
 0x339   :  { %4292 = vmatprep.subr.mxu1 %v4957_v0 }
 0x33c   :  { %4293 = vmatpush3.xpose.msk.msra.mxu1 %vm242_vm1, %v5210_v16 }
 0x33d   :  { %4308 = vmatprep.subr.msk.mxu1 %vm1110_vm3, %v1103_v26 }
 0x33f   :  { %4295 = vmatmul.mubr.msk.f32.vlgmr.msra.gmra.mxu1 %vm242_vm1, %v759_v27 }
 0x340   :  { %4309 = vmatpush3.msk.msra.mxu1 %vm1110_vm3, %v1103_v26 }
 0x341   :  { %4310 = vmatprep.subr.msk.mxu1 %vm5239_vm4, %v5291_v39 }
 0x342   :  { %4311 = vmatpush3.msk.msra.mxu1 %vm5239_vm4, %v5291_v39 }
 0x343   :  { %4315 = vmatprep.subr.msk.mxu1 %vm1110_vm3, %v5325_v57 }
 0x3f3   :  { %v4271_v7 = vpop.f32.mrf.mxu1 }
 0x3f5   :  { %v665_v8 = vpop.f32.mrf.mxu1 }
 0x3f7   :  { %v4278_v10 = vpop.f32.mrf.mxu1 }
 0x3f8   :  { %v5374_v11 = vadd.f32 %v4278_v10, %v4271_v7 }
 0x3f9   :  { %v746_v14 = vpop.f32.mrf.mxu1 }
 0x3fa   :  { %v5376_v15 = vadd.f32 %v746_v14, %v665_v8 }
 0x3ff   :  { %v916_v18 = vpop.f32.mrf.mxu1 }
 0x400   :  { %v1010_v21 = vrot.slane %v916_v18, %v5269_v34  ;;  %v1063_v22 = vrot.slane %v916_v18, %v5271_v35 }
 0x401   :  { %v4296_v30 = vpop.f32.mrf.mxu1 }
 0x402   :  { %v1011_v31 = vadd.f32 %v1010_v21, %v1000_v17  ;;  %v1012_v32 = vadd.f32 %v1010_v21, %v1005_v29  ;;  %v1064_v33 = vadd.f32 %v1063_v22, %v1054_v9  ;;  %v1065_v36 = vadd.f32 %v1063_v22, %v1058_v19  ;;  %v4332_v30 = vpop.f32.mrf.mxu0 }
 0x404   :  { %vm1067_vm8 = vcmp.ge.f32.partialorder %v1065_v36, 0.0  ;;  %v1069_v37 = vmul.f32 0.2, %v1065_v36  ;;  %vm1066_vm10 = vcmp.ge.f32.partialorder %v1064_v33, 0.0  ;;  %v1068_v40 = vmul.f32 0.2, %v1064_v33 }
 0x405   :  { %vm1013_vm12 = vcmp.ge.f32.partialorder %v1011_v31, 0.0  ;;  %v1015_v41 = vmul.f32 0.2, %v1011_v31  ;;  %v1016_v43 = vmul.f32 0.2, %v1012_v32  ;;  %vm1014_vm13 = vcmp.ge.f32.partialorder %v1012_v32, 0.0 }
 0x406   :  { %v1071_v38 = vsel %vm1067_vm8, %v1065_v36, %v1069_v37  ;;  %v1070_v42 = vsel %vm1066_vm10, %v1064_v33, %v1068_v40 }
 0x407   :  { %v1073_v44 = vsel %vm996_vm6, %v1071_v38, -1e+30  ;;  %v1072_v45 = vsel %vm995_vm7, %v1070_v42, -1e+30  ;;  %v1017_v46 = vsel %vm1013_vm12, %v1011_v31, %v1015_v41  ;;  %v1018_v50 = vsel %vm1014_vm13, %v1012_v32, %v1016_v43  ;;  %v5399_v31 = vpop.f32.mrf.mxu0 }
 0x408   :  { %v1077_v47 = vsel %vm1021_vm11, %v1073_v44, -inf  ;;  %v1074_v48 = vsel %vm1021_vm11, %v1072_v45, -inf  ;;  %v1019_v49 = vsel %vm995_vm7, %v1017_v46, -1e+30  ;;  %v1020_v52 = vsel %vm996_vm6, %v1018_v50, -1e+30 }
 0x409   :  { %1078 = vmax.xlane.f32.xlu1 %v1077_v47  ;;  %1075 = vmax.xlane.f32.xlu0 %v1074_v48  ;;  %v1022_v51 = vsel %vm1021_vm11, %v1019_v49, -inf  ;;  %v1025_v53 = vsel %vm1021_vm11, %v1020_v52, -inf  ;;  %v4350_v32 = vpop.f32.mrf.mxu0 }
 0x40b   :  { %v1506_v33 = vpop.f32.mrf.mxu0 }
 0x40d   :  { %1023 = vmax.xlane.f32.xlu0 %v1022_v51  ;;  %v5429_v51 = vsel %vm530_vm5, %v4332_v30, 0.0 }
 0x411   :  { %1026 = vmax.xlane.f32.xlu0 %v1025_v53  ;;  %v1795_v53 = vld [vmem:[%s5867_s15 + $0x10] sm:$0xff] }
 0x492   :  { %v1076_v54 = vpop.xlane.xlu0 %1075  ;;  %v1079_v55 = vpop.xlane.xlu1 %1078 }
 0x493   :  { %v1080_v56 = vsub.f32 %v1072_v45, %v1076_v54  ;;  %v1081_v26 = vsub.f32 %v1073_v44, %v1079_v55  ;;  %v1794_v54 = vld [vmem:[%s5867_s15 + $0x8] sm:$0xff]  ;;  %v1793_v55 = vld [vmem:[%s5867_s15] sm:$0xff] }
 0x495   :  { %v1082_v27 = vmul.f32 1.442695, %v1080_v56  ;;  %v1084_v58 = vmul.f32 1.442695, %v1081_v26  ;;  %v1801_v56 = vld [vmem:[%s5869_s17 + $0x18] sm:$0xff]  ;;  %v1800_v26 = vld [vmem:[%s5869_s17 + $0x10] sm:$0xff] }
 0x496   :  { %v1024_v59 = vpop.xlane.xlu0 %1023 }
 0x497   :  { %4570 = vpow2.f32 %v1082_v27  ;;  %v1028_v60 = vsub.f32 %v1019_v49, %v1024_v59  ;;  %v1799_v27 = vld [vmem:[%s5869_s17 + $0x8] sm:$0xff] }
 0x498   :  { %4572 = vpow2.f32 %v1084_v58 }
 0x499   :  { %v1030_v61 = vmul.f32 1.442695, %v1028_v60 }
 0x49a   :  { %v1027_v63 = vpop.xlane.xlu0 %1026 }
 0x49b   :  { %4574 = vpow2.f32 %v1030_v61  ;;  %v1029_v2 = vsub.f32 %v1020_v52, %v1027_v63  ;;  %v1796_v52 = vld [vmem:[%s5867_s15 + $0x18] sm:$0xff] }
 0x49c   :  { %4365 = vmatprep.subr.mxu0 %v1796_v52 }
 0x49d   :  { %v1032_v4 = vmul.f32 1.442695, %v1029_v2  ;;  %4366 = vmatpush3.msra.mxu0 %v1796_v52 }
 0x49e   :  { %4367 = vmatprep.subr.mxu0 %v1795_v53 }
 0x49f   :  { %4576 = vpow2.f32 %v1032_v4  ;;  %4368 = vmatpush3.msra.mxu0 %v1795_v53 }
 0x4a0   :  { %4369 = vmatprep.subr.mxu0 %v1794_v54 }
 0x4a1   :  { %4370 = vmatpush3.msra.mxu0 %v1794_v54 }
 0x4a2   :  { %4371 = vmatprep.subr.mxu0 %v1793_v55 }
 0x4a3   :  { %4372 = vmatpush3.msra.mxu0 %v1793_v55 }
 0x4a4   :  { %v4571_v6 = vpop.eup %4570  ;;  %4383 = vmatprep.subr.mxu0 %v1801_v56  ;;  %4374 = vmatmul.mubr.msk.f32.vlgmr.msra.gmra.mxu0 %vm242_vm1, %v5173_v5  ;;  %v1798_v5 = vld [vmem:[%s5869_s17] sm:$0xff] }
 0x4a5   :  { %v4573_v7 = vpop.eup %4572  ;;  %v1086_v8 = vmul.f32 %v4571_v6, %v764_v28  ;;  %4384 = vmatpush3.msra.mxu0 %v1801_v56  ;;  %4391 = vmatprep.mubr.msk.f32.mxu0 %vm242_vm1, %v5210_v16 }
 0x4a6   :  { %v1087_v9 = vmul.f32 %v4573_v7, %v5380_v23  ;;  %4385 = vmatprep.subr.mxu0 %v1800_v26 }
 0x4a7   :  { %v1088_v10 = vsel %vm1021_vm11, %v1086_v8, 0.0  ;;  %4386 = vmatpush3.msra.mxu0 %v1800_v26 }
 0x4a8   :  { %v4575_v14 = vpop.eup %4574  ;;  %1089 = vadd.xlane.f32.xlu1 %v1088_v10  ;;  %v1091_v17 = vsel %vm1021_vm11, %v1087_v9, 0.0  ;;  %4387 = vmatprep.subr.mxu0 %v1799_v27  ;;  %v5483_v10 = vld [vmem:[%s5866_s14 + $0x8] sm:$0xff] }
 0x4a9   :  { %1092 = vadd.xlane.f32.xlu0 %v1091_v17  ;;  %v1034_v18 = vmul.f32 %v4575_v14, %v764_v28  ;;  %4388 = vmatpush3.msra.mxu0 %v1799_v27  ;;  %vm1516_vm7 = vcmp.gt.f32.partialorder %v5483_v10, 0.0 }
 0x4aa   :  { %4389 = vmatprep.subr.mxu0 %v1798_v5 }
 0x4ab   :  { %v1036_v19 = vsel %vm1021_vm11, %v1034_v18, 0.0  ;;  %4390 = vmatpush3.msra.mxu0 %v1798_v5 }
 0x4ac   :  { %v4577_v21 = vpop.eup %4576  ;;  %1037 = vadd.xlane.f32.xlu1 %v1036_v19  ;;  %4392 = vmatmul.mubr.msk.f32.vlgmr.msra.gmra.mxu0 %vm242_vm1, %v5223_v20 }
 0x4ad   :  { %v1035_v22 = vmul.f32 %v4577_v21, %v5380_v23  ;;  %4416 = vmatprep.mubr.msk.f32.mxu0 %vm242_vm1, %v5166_v3 }
 0x4af   :  { %v1039_v29 = vsel %vm1021_vm11, %v1035_v22, 0.0 }
 0x4b0   :  { %1040 = vadd.xlane.f32.xlu0 %v1039_v29 }
 0x4bd   :  { %1572 = vperm.xlu1 %4547, %v1506_v33  }
 0x4c1   :  { %4548 = vset.pattern.permute.xlu1 %v4960_v13 }
 0x4c2   :  { %1519 = vperm.xlu1 %4548, %v1506_v33  }
 0x4c6   :  { %1576 = vperm.xlu0 %4543, %v4350_v32   ;;  %1524 = vperm.xlu1 %4548, %v4350_v32  }
 0x4ca   :  { %4549 = vset.pattern.permute.xlu1 %v4959_v12 }
 0x531   :  { %v1090_v28 = vpop.xlane.xlu1 %1089 }
 0x532   :  { %v1093_v36 = vpop.xlane.xlu0 %1092  ;;  %vm1094_vm14 = vcmp.gt.f32.partialorder %v1090_v28, 0.0 }
 0x533   :  { %vm1095_vm15 = vcmp.gt.f32.partialorder %v1093_v36, 0.0  ;;  %v1096_v23 = vsel %vm1094_vm14, %v1090_v28, 1.0 }
 0x534   :  { %v1097_v37 = vsel %vm1095_vm15, %v1093_v36, 1.0  ;;  %4578 = vrcp.f32 %v1096_v23 }
 0x535   :  { %4580 = vrcp.f32 %v1097_v37  ;;  %v1038_v40 = vpop.xlane.xlu1 %1037 }
 0x536   :  { %vm1042_vm2 = vcmp.gt.f32.partialorder %v1038_v40, 0.0 }
 0x537   :  { %v1044_v41 = vsel %vm1042_vm2, %v1038_v40, 1.0 }
 0x538   :  { %4582 = vrcp.f32 %v1044_v41 }
 0x539   :  { %v1041_v38 = vpop.xlane.xlu0 %1040  ;;  %v1573_v59 = vpop.permute.xlu1 %1572 }
 0x53a   :  { %vm1043_vm6 = vcmp.gt.f32.partialorder %v1041_v38, 0.0 }
 0x53b   :  { %v1045_v42 = vsel %vm1043_vm6, %v1041_v38, 1.0 }
 0x53c   :  { %4584 = vrcp.f32 %v1045_v42 }
 0x53d   :  { %v1520_v6 = vpop.permute.xlu1 %1519 }
 0x541   :  { %v4579_v43 = vpop.eup %4578  ;;  %v1525_v14 = vpop.permute.xlu1 %1524 }
 0x542   :  { %v4581_v44 = vpop.eup %4580  ;;  %v1100_v45 = vmul.f32 %v4579_v43, %v1086_v8 }
 0x543   :  { %v1101_v46 = vmul.f32 %v4581_v44, %v1087_v9  ;;  %v1577_v9 = vpop.permute.xlu0 %1576 }
 0x544   :  { %4312 = vmatprep.mubr.msk.f32.mxu1 %vm1021_vm11, %v1100_v45 }
 0x545   :  { %v4583_v47 = vpop.eup %4582  ;;  %4313 = vmatmul.mubr.msk.f32.vlgmr.msra.gmra.mxu1 %vm1021_vm11, %v1101_v46 }
 0x546   :  { %4316 = vmatpush3.msk.msra.mxu1 %vm1110_vm3, %v5325_v57  ;;  %v1048_v48 = vmul.f32 %v4583_v47, %v1034_v18  ;;  %v1622_v57 = vsel %vm5239_vm4, %v4332_v30, 0.0 }
 0x547   :  { %4317 = vmatprep.subr.msk.mxu1 %vm530_vm5, %v5291_v39 }
 0x548   :  { %4318 = vmatpush3.msk.msra.mxu1 %vm530_vm5, %v5291_v39  ;;  %4319 = vmatprep.mubr.msk.f32.mxu1 %vm1021_vm11, %v1048_v48  ;;  %v1279_v39 = vld [vmem:[#allocation11] sm:$0x3] }
 0x549   :  { %v4585_v49 = vpop.eup %4584  ;;  %4333 = vmatprep.subr.mxu1 %v4957_v0 }
 0x54a   :  { %v1049_v50 = vmul.f32 %v4585_v49, %v1035_v22 }
 0x54c   :  { %4320 = vmatmul.mubr.msk.f32.vlgmr.msra.gmra.mxu1 %vm1021_vm11, %v1049_v50 }
 0x54d   :  { %4334 = vmatpush3.xpose.msk.msra.mxu1 %vm242_vm1, %v5355_v1  ;;  %4337 = vmatprep.mubr.msk.f32.mxu1 %vm4958_vm0, %v4957_v0 }
 0x54e   :  { %4335 = vmatprep.subr.mxu1 %v4957_v0 }
 0x551   :  { %4336 = vmatpush3.xpose.msk.msra.mxu1 %vm242_vm1, %v5348_v62 }
 0x552   :  { %4351 = vmatprep.subr.msk.mxu1 %vm1110_vm3, %v1622_v57 }
 0x554   :  { %4338 = vmatmul.mubr.msk.f32.vlgmr.msra.gmra.mxu1 %vm242_vm1, %v1279_v39 }
 0x555   :  { %4352 = vmatpush3.msk.msra.mxu1 %vm1110_vm3, %v1622_v57 }
 0x556   :  { %4353 = vmatprep.subr.msk.mxu1 %vm5239_vm4, %v5399_v31 }
 0x557   :  { %4354 = vmatpush3.msk.msra.mxu1 %vm5239_vm4, %v5399_v31 }
 0x558   :  { %4358 = vmatprep.subr.msk.mxu1 %vm1110_vm3, %v5429_v51 }
 0x605   :  { %v4314_v16 = vpop.f32.mrf.mxu1 }
 0x607   :  { %v1180_v58 = vpop.f32.mrf.mxu1 }
 0x60c   :  { %v4321_v60 = vpop.f32.mrf.mxu1 }
 0x60d   :  { %v1270_v61 = vadd.f32 %v4321_v60, %v4314_v16 }
 0x60e   :  { %v1264_v63 = vpop.f32.mrf.mxu1 }
 0x60f   :  { %v5473_v2 = vadd.f32 %v1270_v61, %v5374_v11  ;;  %v1265_v4 = vadd.f32 %v1264_v63, %v1180_v58  ;;  %v1284_v11 = vld [vmem:[%s5866_s14] sm:$0xff] }
 0x610   :  { %vm1515_vm8 = vcmp.gt.f32.partialorder %v1284_v11, 0.0 }
 0x611   :  { %v5476_v7 = vadd.f32 %v1265_v4, %v5376_v15 }
 0x614   :  { %v1436_v8 = vpop.f32.mrf.mxu1 }
 0x615   :  { %v1530_v20 = vrot.slane %v1436_v8, %v5269_v34  ;;  %v1582_v3 = vrot.slane %v1436_v8, %v5271_v35 }
 0x616   :  { %v4339_v17 = vpop.f32.mrf.mxu1 }
 0x617   :  { %v1531_v18 = vadd.f32 %v1530_v20, %v1520_v6  ;;  %v1532_v15 = vadd.f32 %v1530_v20, %v1525_v14  ;;  %v1583_v19 = vadd.f32 %v1582_v3, %v1573_v59  ;;  %v1584_v21 = vadd.f32 %v1582_v3, %v1577_v9  ;;  %v5505_v9 = vpop.f32.mrf.mxu0  ;;  %v2300_v17 = vld [vmem:[%s5871_s19 + $0x10] sm:$0xff] }
 0x619   :  { %vm1586_vm10 = vcmp.ge.f32.partialorder %v1584_v21, 0.0  ;;  %v1588_v22 = vmul.f32 0.2, %v1584_v21  ;;  %vm1585_vm12 = vcmp.ge.f32.partialorder %v1583_v19, 0.0  ;;  %v1587_v29 = vmul.f32 0.2, %v1583_v19  ;;  %v5507_v20 = vpop.f32.mrf.mxu0 }
 0x61a   :  { %vm1533_vm13 = vcmp.ge.f32.partialorder %v1531_v18, 0.0  ;;  %v1535_v30 = vmul.f32 0.2, %v1531_v18  ;;  %v1536_v28 = vmul.f32 0.2, %v1532_v15  ;;  %vm1534_vm14 = vcmp.ge.f32.partialorder %v1532_v15, 0.0 }
 0x61b   :  { %v1590_v32 = vsel %vm1586_vm10, %v1584_v21, %v1588_v22  ;;  %v1589_v33 = vsel %vm1585_vm12, %v1583_v19, %v1587_v29  ;;  %v4393_v3 = vpop.f32.mrf.mxu0 }
 0x61c   :  { %v1592_v36 = vsel %vm1516_vm7, %v1590_v32, -1e+30  ;;  %v1591_v23 = vsel %vm1515_vm8, %v1589_v33, -1e+30  ;;  %v1537_v37 = vsel %vm1533_vm13, %v1531_v18, %v1535_v30  ;;  %v1538_v42 = vsel %vm1534_vm14, %v1532_v15, %v1536_v28 }
 0x61d   :  { %v1596_v40 = vsel %vm1021_vm11, %v1592_v36, -inf  ;;  %v1593_v41 = vsel %vm1021_vm11, %v1591_v23, -inf  ;;  %v1539_v38 = vsel %vm1515_vm8, %v1537_v37, -1e+30  ;;  %v1540_v44 = vsel %vm1516_vm7, %v1538_v42, -1e+30  ;;  %v2018_v14 = vpop.f32.mrf.mxu0 }
 0x61e   :  { %1597 = vmax.xlane.f32.xlu1 %v1596_v40  ;;  %1594 = vmax.xlane.f32.xlu0 %v1593_v41  ;;  %v1541_v43 = vsel %vm1021_vm11, %v1539_v38, -inf  ;;  %v1544_v45 = vsel %vm1021_vm11, %v1540_v44, -inf  ;;  %v2298_v42 = vld [vmem:[%s5871_s19] sm:$0xff]  ;;  %vm2056_vm14 = vcmask 125952  }
 0x622   :  { %1542 = vmax.xlane.f32.xlu0 %v1541_v43  ;;  %v2306_v43 = vld [vmem:[%s5873_s21 + $0x18] sm:$0xff] }
 0x626   :  { %1545 = vmax.xlane.f32.xlu0 %v1544_v45  ;;  %v2304_v45 = vld [vmem:[%s5873_s21 + $0x8] sm:$0xff] }
 0x6a7   :  { %v1595_v46 = vpop.xlane.xlu0 %1594  ;;  %v1598_v47 = vpop.xlane.xlu1 %1597 }
 0x6a8   :  { %v1599_v48 = vsub.f32 %v1591_v23, %v1595_v46  ;;  %v1600_v49 = vsub.f32 %v1592_v36, %v1598_v47  ;;  %v2303_v46 = vld [vmem:[%s5873_s21] sm:$0xff] }
 0x6aa   :  { %v1601_v50 = vmul.f32 1.442695, %v1599_v48  ;;  %v1603_v57 = vmul.f32 1.442695, %v1600_v49 }
 0x6ab   :  { %v1543_v39 = vpop.xlane.xlu0 %1542 }
 0x6ac   :  { %4586 = vpow2.f32 %v1601_v50  ;;  %v1547_v52 = vsub.f32 %v1539_v38, %v1543_v39  ;;  %v5533_v38 = vld [vmem:[#allocation2 + $0x8] sm:$0xff] }
 0x6ad   :  { %4588 = vpow2.f32 %v1603_v57 }
 0x6ae   :  { %v1549_v53 = vmul.f32 1.442695, %v1547_v52 }
 0x6af   :  { %v1546_v54 = vpop.xlane.xlu0 %1545 }
 0x6b0   :  { %4590 = vpow2.f32 %v1549_v53  ;;  %v1548_v55 = vsub.f32 %v1540_v44, %v1546_v54  ;;  %v2305_v44 = vld [vmem:[%s5873_s21 + $0x10] sm:$0xff] }
 0x6b2   :  { %v1551_v56 = vmul.f32 1.442695, %v1548_v55 }
 0x6b4   :  { %4592 = vpow2.f32 %v1551_v56 }
 0x6b9   :  { %v4587_v26 = vpop.eup %4586 }
 0x6ba   :  { %v4589_v27 = vpop.eup %4588  ;;  %v1605_v5 = vmul.f32 %v4587_v26, %v1284_v11  ;;  %v5596_v26 = vld [vmem:[#allocation14 + $0x8] sm:$0xf] }
 0x6bb   :  { %v1606_v16 = vmul.f32 %v4589_v27, %v5483_v10  ;;  %v1802_v27 = vld [vmem:[#allocation14] sm:$0xff]  ;;  %vm2028_vm8 = vcmp.gt.f32.partialorder %v5596_v26, 0.0 }
 0x6bc   :  { %v1607_v58 = vsel %vm1021_vm11, %v1605_v5, 0.0  ;;  %vm2027_vm10 = vcmp.gt.f32.partialorder %v1802_v27, 0.0 }
 0x6bd   :  { %v4591_v59 = vpop.eup %4590  ;;  %1608 = vadd.xlane.f32.xlu1 %v1607_v58  ;;  %v1610_v60 = vsel %vm1021_vm11, %v1606_v16, 0.0 }
 0x6be   :  { %1611 = vadd.xlane.f32.xlu0 %v1610_v60  ;;  %v1553_v61 = vmul.f32 %v4591_v59, %v1284_v11  ;;  %v2301_v11 = vld [vmem:[%s5871_s19 + $0x18] sm:$0xff] }
 0x6bf   :  { %4408 = vmatprep.subr.mxu0 %v2301_v11 }
 0x6c0   :  { %v1555_v63 = vsel %vm1021_vm11, %v1553_v61, 0.0  ;;  %4409 = vmatpush3.msra.mxu0 %v2301_v11 }
 0x6c1   :  { %v4593_v4 = vpop.eup %4592  ;;  %1556 = vadd.xlane.f32.xlu1 %v1555_v63  ;;  %4410 = vmatprep.subr.mxu0 %v2300_v17 }
 0x6c2   :  { %v1554_v6 = vmul.f32 %v4593_v4, %v5483_v10  ;;  %v2299_v10 = vld [vmem:[%s5871_s19 + $0x8] sm:$0xff]  ;;  %4411 = vmatpush3.msra.mxu0 %v2300_v17 }
 0x6c3   :  { %4412 = vmatprep.subr.mxu0 %v2299_v10 }
 0x6c4   :  { %v1558_v8 = vsel %vm1021_vm11, %v1554_v6, 0.0  ;;  %4413 = vmatpush3.msra.mxu0 %v2299_v10 }
 0x6c5   :  { %1559 = vadd.xlane.f32.xlu0 %v1558_v8  ;;  %4414 = vmatprep.subr.mxu0 %v2298_v42 }
 0x6c6   :  { %4415 = vmatpush3.msra.mxu0 %v2298_v42 }
 0x6c7   :  { %4426 = vmatprep.subr.mxu0 %v2306_v43  ;;  %4417 = vmatmul.mubr.msk.f32.vlgmr.msra.gmra.mxu0 %vm242_vm1, %v5533_v38 }
 0x6c8   :  { %4427 = vmatpush3.msra.mxu0 %v2306_v43  ;;  %4434 = vmatprep.mubr.msk.f32.mxu0 %vm242_vm1, %v5348_v62 }
 0x6c9   :  { %4428 = vmatprep.subr.mxu0 %v2305_v44 }
 0x6ca   :  { %4429 = vmatpush3.msra.mxu0 %v2305_v44 }
 0x6cb   :  { %4430 = vmatprep.subr.mxu0 %v2304_v45 }
 0x6cc   :  { %4431 = vmatpush3.msra.mxu0 %v2304_v45 }
 0x6cd   :  { %4432 = vmatprep.subr.mxu0 %v2303_v46 }
 0x6ce   :  { %4433 = vmatpush3.msra.mxu0 %v2303_v46 }
 0x6cf   :  { %4451 = vmatprep.subr.mxu0 %v4957_v0  ;;  %4435 = vmatmul.mubr.msk.f32.vlgmr.msra.gmra.mxu0 %vm242_vm1, %v5355_v1 }
 0x6d0   :  { %4455 = vmatprep.mubr.msk.f32.mxu0 %vm4958_vm0, %v4957_v0 }
 0x6d2   :  { %2085 = vperm.xlu1 %4549, %v2018_v14  }
 0x6d6   :  { %4550 = vset.pattern.permute.xlu1 %v4960_v13 }
 0x6d7   :  { %2031 = vperm.xlu1 %4550, %v2018_v14  }
 0x6db   :  { %2089 = vperm.xlu0 %4543, %v4393_v3   ;;  %2036 = vperm.xlu1 %4550, %v4393_v3  }
 0x6df   :  { %4551 = vset.pattern.permute.xlu1 %v4959_v12 }
 0x746   :  { %v1609_v18 = vpop.xlane.xlu1 %1608 }
 0x747   :  { %v1612_v15 = vpop.xlane.xlu0 %1611  ;;  %vm1613_vm15 = vcmp.gt.f32.partialorder %v1609_v18, 0.0 }
 0x748   :  { %vm1614_vm2 = vcmp.gt.f32.partialorder %v1612_v15, 0.0  ;;  %v1615_v19 = vsel %vm1613_vm15, %v1609_v18, 1.0 }
 0x749   :  { %v1616_v21 = vsel %vm1614_vm2, %v1612_v15, 1.0  ;;  %4594 = vrcp.f32 %v1615_v19 }
 0x74a   :  { %4596 = vrcp.f32 %v1616_v21  ;;  %v1557_v22 = vpop.xlane.xlu1 %1556 }
 0x74b   :  { %vm1561_vm6 = vcmp.gt.f32.partialorder %v1557_v22, 0.0 }
 0x74c   :  { %v1563_v29 = vsel %vm1561_vm6, %v1557_v22, 1.0 }
 0x74d   :  { %4598 = vrcp.f32 %v1563_v29 }
 0x74e   :  { %v1560_v30 = vpop.xlane.xlu0 %1559  ;;  %v2086_v48 = vpop.permute.xlu1 %2085 }
 0x74f   :  { %vm1562_vm7 = vcmp.gt.f32.partialorder %v1560_v30, 0.0 }
 0x750   :  { %v1564_v32 = vsel %vm1562_vm7, %v1560_v30, 1.0 }
 0x751   :  { %4600 = vrcp.f32 %v1564_v32 }
 0x752   :  { %v2032_v53 = vpop.permute.xlu1 %2031 }
 0x756   :  { %v4595_v33 = vpop.eup %4594  ;;  %v2090_v55 = vpop.permute.xlu0 %2089 }
 0x757   :  { %v4597_v28 = vpop.eup %4596  ;;  %v1619_v36 = vmul.f32 %v4595_v33, %v1605_v5  ;;  %v2037_v5 = vpop.permute.xlu1 %2036 }
 0x758   :  { %v1620_v12 = vmul.f32 %v4597_v28, %v1606_v16 }
 0x759   :  { %4355 = vmatprep.mubr.msk.f32.mxu1 %vm1021_vm11, %v1619_v36 }
 0x75a   :  { %v4599_v23 = vpop.eup %4598  ;;  %4356 = vmatmul.mubr.msk.f32.vlgmr.msra.gmra.mxu1 %vm1021_vm11, %v1620_v12 }
 0x75b   :  { %4359 = vmatpush3.msk.msra.mxu1 %vm1110_vm3, %v5429_v51  ;;  %v1567_v37 = vmul.f32 %v4599_v23, %v1553_v61  ;;  %v5540_v51 = vld [vmem:[#allocation2] sm:$0xff] }
 0x75c   :  { %4360 = vmatprep.subr.msk.mxu1 %vm530_vm5, %v5399_v31 }
 0x75d   :  { %4361 = vmatpush3.msk.msra.mxu1 %vm530_vm5, %v5399_v31  ;;  %4362 = vmatprep.mubr.msk.f32.mxu1 %vm1021_vm11, %v1567_v37  ;;  %v1797_v31 = vld [vmem:[#allocation13] sm:$0x3] }
 0x75e   :  { %v4601_v40 = vpop.eup %4600  ;;  %4376 = vmatprep.subr.mxu1 %v4957_v0 }
 0x75f   :  { %v1568_v41 = vmul.f32 %v4601_v40, %v1554_v6 }
 0x761   :  { %4363 = vmatmul.mubr.msk.f32.vlgmr.msra.gmra.mxu1 %vm1021_vm11, %v1568_v41 }
 0x762   :  { %4377 = vmatpush3.xpose.msk.msra.mxu1 %vm242_vm1, %v5533_v38  ;;  %4380 = vmatprep.mubr.msk.f32.mxu1 %vm4958_vm0, %v4957_v0 }
 0x763   :  { %4378 = vmatprep.subr.mxu1 %v4957_v0 }
 0x766   :  { %4379 = vmatpush3.xpose.msk.msra.mxu1 %vm242_vm1, %v5540_v51 }
 0x767   :  { %4394 = vmatprep.subr.msk.mxu1 %vm5239_vm4, %v5505_v9 }
 0x769   :  { %4381 = vmatmul.mubr.msk.f32.vlgmr.msra.gmra.mxu1 %vm242_vm1, %v1797_v31 }
 0x76a   :  { %4395 = vmatpush3.msk.msra.mxu1 %vm5239_vm4, %v5505_v9 }
 0x76b   :  { %4396 = vmatprep.subr.msk.mxu1 %vm5239_vm4, %v5507_v20 }
 0x76c   :  { %4397 = vmatpush3.msk.msra.mxu1 %vm5239_vm4, %v5507_v20 }
 0x76d   :  { %4401 = vmatprep.subr.msk.mxu1 %vm530_vm5, %v5505_v9 }
 0x81a   :  { %v4357_v62 = vpop.f32.mrf.mxu1 }
 0x81c   :  { %v1698_v47 = vpop.f32.mrf.mxu1 }
 0x821   :  { %v4364_v49 = vpop.f32.mrf.mxu1 }
 0x822   :  { %v1788_v50 = vadd.f32 %v4364_v49, %v4357_v62 }
 0x823   :  { %v1782_v57 = vpop.f32.mrf.mxu1 }
 0x824   :  { %v5585_v39 = vadd.f32 %v1788_v50, %v5473_v2  ;;  %v1783_v52 = vadd.f32 %v1782_v57, %v1698_v47 }
 0x826   :  { %v5588_v54 = vadd.f32 %v1783_v52, %v5476_v7  ;;  %4452 = vmatpush3.msra.mxu0 %v5585_v39 }
 0x827   :  { %4453 = vmatprep.subr.mxu0 %v4957_v0 }
 0x828   :  { %4454 = vmatpush3.msra.mxu0 %v5588_v54 }
 0x829   :  { %v1948_v1 = vpop.f32.mrf.mxu1  ;;  %4463 = vmatprep.subr.mxu0 %v4957_v0 }
 0x82a   :  { %v2042_v56 = vrot.slane %v1948_v1, %v5269_v34  ;;  %v2095_v2 = vrot.slane %v1948_v1, %v5271_v35  ;;  %v5615_v1 = vpop.f32.mrf.mxu0 }
 0x82b   :  { %v4382_v7 = vpop.f32.mrf.mxu1 }
 0x82c   :  { %v2043_v16 = vadd.f32 %v2042_v56, %v2032_v53  ;;  %v2044_v58 = vadd.f32 %v2042_v56, %v2037_v5  ;;  %v2096_v59 = vadd.f32 %v2095_v2, %v2086_v48  ;;  %v2097_v60 = vadd.f32 %v2095_v2, %v2090_v55  ;;  %v5617_v55 = vpop.f32.mrf.mxu0 }
 0x82e   :  { %vm2099_vm12 = vcmp.ge.f32.partialorder %v2097_v60, 0.0  ;;  %v2101_v61 = vmul.f32 0.2, %v2097_v60  ;;  %vm2098_vm13 = vcmp.ge.f32.partialorder %v2096_v59, 0.0  ;;  %v2100_v63 = vmul.f32 0.2, %v2096_v59  ;;  %v4436_v56 = vpop.f32.mrf.mxu0 }
 0x82f   :  { %vm2045_vm15 = vcmp.ge.f32.partialorder %v2043_v16, 0.0  ;;  %v2047_v4 = vmul.f32 0.2, %v2043_v16  ;;  %v2048_v3 = vmul.f32 0.2, %v2044_v58  ;;  %vm2046_vm2 = vcmp.ge.f32.partialorder %v2044_v58, 0.0 }
 0x830   :  { %v2103_v6 = vsel %vm2099_vm12, %v2097_v60, %v2101_v61  ;;  %v2102_v8 = vsel %vm2098_vm13, %v2096_v59, %v2100_v63  ;;  %v2523_v2 = vpop.f32.mrf.mxu0 }
 0x831   :  { %v2105_v14 = vsel %vm2028_vm8, %v2103_v6, -1e+30  ;;  %v2104_v11 = vsel %vm2027_vm10, %v2102_v8, -1e+30  ;;  %v2049_v17 = vsel %vm2045_vm15, %v2043_v16, %v2047_v4  ;;  %v2050_v19 = vsel %vm2046_vm2, %v2044_v58, %v2048_v3 }
 0x832   :  { %v2109_v10 = vsel %vm2056_vm14, %v2105_v14, -inf  ;;  %v2106_v18 = vsel %vm500_vm9, %v2104_v11, -inf  ;;  %v2051_v15 = vsel %vm2027_vm10, %v2049_v17, -1e+30  ;;  %v2052_v22 = vsel %vm2028_vm8, %v2050_v19, -1e+30 }
 0x833   :  { %2110 = vmax.xlane.f32.xlu1 %v2109_v10  ;;  %2107 = vmax.xlane.f32.xlu0 %v2106_v18  ;;  %v2053_v21 = vsel %vm500_vm9, %v2051_v15, -inf  ;;  %v2057_v29 = vsel %vm2056_vm14, %v2052_v22, -inf }
 0x837   :  { %2054 = vmax.xlane.f32.xlu0 %v2053_v21 }
 0x83b   :  { %2058 = vmax.xlane.f32.xlu0 %v2057_v29 }
 0x8bc   :  { %v2108_v30 = vpop.xlane.xlu0 %2107  ;;  %v2111_v32 = vpop.xlane.xlu1 %2110 }
 0x8bd   :  { %v2112_v33 = vsub.f32 %v2104_v11, %v2108_v30  ;;  %v2113_v28 = vsub.f32 %v2105_v14, %v2111_v32  ;;  %v5666_v30 = vld [vmem:[%s5874_s22 + $0x8] sm:$0xf]  ;;  %v2307_v32 = vld [vmem:[%s5874_s22] sm:$0xff] }
 0x8be   :  { %vm2532_vm12 = vcmp.gt.f32.partialorder %v2307_v32, 0.0 }
 0x8bf   :  { %v2114_v36 = vmul.f32 1.442695, %v2112_v33  ;;  %v2116_v12 = vmul.f32 1.442695, %v2113_v28 }
 0x8c0   :  { %v2055_v23 = vpop.xlane.xlu0 %2054 }
 0x8c1   :  { %4602 = vpow2.f32 %v2114_v36  ;;  %v2060_v37 = vsub.f32 %v2051_v15, %v2055_v23 }
 0x8c2   :  { %4604 = vpow2.f32 %v2116_v12 }
 0x8c3   :  { %v2062_v40 = vmul.f32 1.442695, %v2060_v37 }
 0x8c4   :  { %v2059_v41 = vpop.xlane.xlu0 %2058 }
 0x8c5   :  { %4606 = vpow2.f32 %v2062_v40  ;;  %v2061_v31 = vsub.f32 %v2052_v22, %v2059_v41 }
 0x8c7   :  { %v2064_v42 = vmul.f32 1.442695, %v2061_v31 }
 0x8c9   :  { %4608 = vpow2.f32 %v2064_v42 }
 0x8ce   :  { %v4603_v43 = vpop.eup %4602 }
 0x8cf   :  { %v4605_v44 = vpop.eup %4604  ;;  %v2118_v45 = vmul.f32 %v4603_v43, %v1802_v27 }
 0x8d0   :  { %v2119_v46 = vmul.f32 %v4605_v44, %v5596_v26 }
 0x8d1   :  { %v2120_v62 = vsel %vm500_vm9, %v2118_v45, 0.0 }
 0x8d2   :  { %v4607_v47 = vpop.eup %4606  ;;  %2121 = vadd.xlane.f32.xlu1 %v2120_v62  ;;  %v2123_v48 = vsel %vm2056_vm14, %v2119_v46, 0.0 }
 0x8d3   :  { %2124 = vadd.xlane.f32.xlu0 %v2123_v48  ;;  %v2066_v49 = vmul.f32 %v4607_v47, %v1802_v27 }
 0x8d5   :  { %v2068_v50 = vsel %vm500_vm9, %v2066_v49, 0.0 }
 0x8d6   :  { %v4609_v57 = vpop.eup %4608  ;;  %2069 = vadd.xlane.f32.xlu1 %v2068_v50 }
 0x8d7   :  { %v2067_v52 = vmul.f32 %v4609_v57, %v5596_v26 }
 0x8d9   :  { %v2071_v53 = vsel %vm2056_vm14, %v2067_v52, 0.0 }
 0x8da   :  { %2072 = vadd.xlane.f32.xlu0 %v2071_v53 }
 0x8e7   :  { %2589 = vperm.xlu1 %4551, %v2523_v2  }
 0x8eb   :  { %4552 = vset.pattern.permute.xlu1 %v4960_v13 }
 0x8ec   :  { %2536 = vperm.xlu1 %4552, %v2523_v2  }
 0x8f0   :  { %2593 = vperm.xlu0 %4543, %v4436_v56   ;;  %2541 = vperm.xlu1 %4552, %v4436_v56  }
 0x95b   :  { %v2122_v27 = vpop.xlane.xlu1 %2121 }
 0x95c   :  { %v2125_v5 = vpop.xlane.xlu0 %2124  ;;  %vm2126_vm6 = vcmp.gt.f32.partialorder %v2122_v27, 0.0 }
 0x95d   :  { %vm2127_vm7 = vcmp.gt.f32.partialorder %v2125_v5, 0.0  ;;  %v2128_v26 = vsel %vm2126_vm6, %v2122_v27, 1.0 }
 0x95e   :  { %v2129_v7 = vsel %vm2127_vm7, %v2125_v5, 1.0  ;;  %4610 = vrcp.f32 %v2128_v26  ;;  %vm2803_vm7 = vcmask 123904  }
 0x95f   :  { %4612 = vrcp.f32 %v2129_v7  ;;  %v2070_v16 = vpop.xlane.xlu1 %2069 }
 0x960   :  { %vm2074_vm8 = vcmp.gt.f32.partialorder %v2070_v16, 0.0 }
 0x961   :  { %v2076_v58 = vsel %vm2074_vm8, %v2070_v16, 1.0 }
 0x962   :  { %4614 = vrcp.f32 %v2076_v58 }
 0x963   :  { %v2073_v59 = vpop.xlane.xlu0 %2072 }
 0x964   :  { %vm2075_vm10 = vcmp.gt.f32.partialorder %v2073_v59, 0.0 }
 0x965   :  { %v2077_v60 = vsel %vm2075_vm10, %v2073_v59, 1.0 }
 0x966   :  { %4616 = vrcp.f32 %v2077_v60 }
 0x96b   :  { %v4611_v61 = vpop.eup %4610  ;;  %v2594_v22 = vpop.permute.xlu0 %2593 }
 0x96c   :  { %v4613_v63 = vpop.eup %4612  ;;  %v2132_v4 = vmul.f32 %v4611_v61, %v2118_v45 }
 0x96d   :  { %v2133_v6 = vmul.f32 %v4613_v63, %v2119_v46 }
 0x96e   :  { %4398 = vmatprep.mubr.msk.f32.mxu1 %vm500_vm9, %v2132_v4 }
 0x96f   :  { %v4615_v8 = vpop.eup %4614  ;;  %4399 = vmatmul.mubr.msk.f32.vlgmr.msra.gmra.mxu1 %vm500_vm9, %v2133_v6 }
 0x970   :  { %4402 = vmatpush3.msk.msra.mxu1 %vm530_vm5, %v5505_v9  ;;  %v2080_v3 = vmul.f32 %v4615_v8, %v2066_v49  ;;  %v2302_v9 = vld [vmem:[#allocation16] sm:$0x3] }
 0x971   :  { %4403 = vmatprep.subr.msk.mxu1 %vm530_vm5, %v5507_v20 }
 0x972   :  { %4404 = vmatpush3.msk.msra.mxu1 %vm530_vm5, %v5507_v20  ;;  %4405 = vmatprep.mubr.msk.f32.mxu1 %vm500_vm9, %v2080_v3 }
 0x973   :  { %v4617_v14 = vpop.eup %4616  ;;  %4419 = vmatprep.subr.mxu1 %v4957_v0 }
 0x974   :  { %v2081_v11 = vmul.f32 %v4617_v14, %v2067_v52  ;;  %v5682_v52 = vld [vmem:[#allocation17] sm:$0x3] }
 0x975   :  { %4456 = vmatmul.mubr.msk.f32.vlgmr.msra.gmra.mxu0 %vm500_vm9, %v5682_v52 }
 0x976   :  { %4406 = vmatmul.mubr.msk.f32.vlgmr.msra.gmra.mxu1 %vm500_vm9, %v2081_v11  ;;  %4467 = vmatprep.mubr.msk.f32.mxu0 %vm4958_vm0, %v4957_v0 }
 0x977   :  { %4420 = vmatpush3.xpose.msk.msra.mxu1 %vm242_vm1, %v5533_v38  ;;  %4423 = vmatprep.mubr.msk.f32.mxu1 %vm4958_vm0, %v4957_v0 }
 0x978   :  { %4421 = vmatprep.subr.mxu1 %v4957_v0 }
 0x97b   :  { %4422 = vmatpush3.xpose.msk.msra.mxu1 %vm242_vm1, %v5540_v51  ;;  %v2590_v51 = vpop.permute.xlu1 %2589 }
 0x97c   :  { %4437 = vmatprep.subr.msk.mxu1 %vm5239_vm4, %v5615_v1 }
 0x97e   :  { %4424 = vmatmul.mubr.msk.f32.vlgmr.msra.gmra.mxu1 %vm242_vm1, %v2302_v9 }
 0x97f   :  { %4438 = vmatpush3.msk.msra.mxu1 %vm5239_vm4, %v5615_v1  ;;  %v2537_v19 = vpop.permute.xlu1 %2536 }
 0x980   :  { %4439 = vmatprep.subr.msk.mxu1 %vm5239_vm4, %v5617_v55 }
 0x981   :  { %4440 = vmatpush3.msk.msra.mxu1 %vm5239_vm4, %v5617_v55  ;;  %vm2533_vm4 = vcmp.gt.f32.partialorder %v5666_v30, 0.0 }
 0x982   :  { %4444 = vmatprep.subr.msk.mxu1 %vm530_vm5, %v5615_v1 }
 0x983   :  { %v2542_v33 = vpop.permute.xlu1 %2541 }
 0xa2f   :  { %v4400_v20 = vpop.f32.mrf.mxu1 }
 0xa31   :  { %v2208_v38 = vpop.f32.mrf.mxu1 }
 0xa36   :  { %v4407_v17 = vpop.f32.mrf.mxu1 }
 0xa37   :  { %v5657_v10 = vadd.f32 %v4407_v17, %v4400_v20  ;;  %v2804_v17 = vsel %vm2803_vm7, %v5682_v52, 0.0 }
 0xa38   :  { %v2289_v18 = vpop.f32.mrf.mxu1 }
 0xa39   :  { %v5659_v15 = vadd.f32 %v2289_v18, %v2208_v38 }
 0xa3e   :  { %v2453_v21 = vpop.f32.mrf.mxu1 }
 0xa3f   :  { %v2547_v29 = vrot.slane %v2453_v21, %v5269_v34  ;;  %v2599_v25 = vrot.slane %v2453_v21, %v5271_v35 }
 0xa40   :  { %v4425_v28 = vpop.f32.mrf.mxu1 }
 0xa41   :  { %v2548_v36 = vadd.f32 %v2547_v29, %v2537_v19  ;;  %v2549_v12 = vadd.f32 %v2547_v29, %v2542_v33  ;;  %v2600_v23 = vadd.f32 %v2599_v25, %v2590_v51  ;;  %v2601_v37 = vadd.f32 %v2599_v25, %v2594_v22  ;;  %v2877_v19 = vpop.f32.mrf.mxu0 }
 0xa43   :  { %vm2603_vm13 = vcmp.ge.f32.partialorder %v2601_v37, 0.0  ;;  %v2605_v34 = vmul.f32 0.2, %v2601_v37  ;;  %vm2602_vm15 = vcmp.ge.f32.partialorder %v2600_v23, 0.0  ;;  %v2604_v35 = vmul.f32 0.2, %v2600_v23  ;;  %v4457_v21 = vpop.f32.mrf.mxu0 }
 0xa44   :  { %vm2550_vm2 = vcmp.ge.f32.partialorder %v2548_v36, 0.0  ;;  %v2552_v40 = vmul.f32 0.2, %v2548_v36  ;;  %v2553_v42 = vmul.f32 0.2, %v2549_v12  ;;  %vm2551_vm6 = vcmp.ge.f32.partialorder %v2549_v12, 0.0 }
 0xa45   :  { %v2607_v41 = vsel %vm2603_vm13, %v2601_v37, %v2605_v34  ;;  %v2606_v31 = vsel %vm2602_vm15, %v2600_v23, %v2604_v35  ;;  %vm2914_vm13 = vcmask 15360  }
 0xa46   :  { %v2609_v43 = vsel %vm2533_vm4, %v2607_v41, -1e+30  ;;  %v2608_v44 = vsel %vm2532_vm12, %v2606_v31, -1e+30  ;;  %v2554_v45 = vsel %vm2550_vm2, %v2548_v36, %v2552_v40  ;;  %v2555_v48 = vsel %vm2551_vm6, %v2549_v12, %v2553_v42 }
 0xa47   :  { %v2613_v46 = vsel %vm2056_vm14, %v2609_v43, -inf  ;;  %v2610_v62 = vsel %vm500_vm9, %v2608_v44, -inf  ;;  %v2556_v47 = vsel %vm2532_vm12, %v2554_v45, -1e+30  ;;  %v2557_v50 = vsel %vm2533_vm4, %v2555_v48, -1e+30 }
 0xa48   :  { %2614 = vmax.xlane.f32.xlu1 %v2613_v46  ;;  %2611 = vmax.xlane.f32.xlu0 %v2610_v62  ;;  %v2558_v49 = vsel %vm500_vm9, %v2556_v47, -inf  ;;  %v2561_v57 = vsel %vm2056_vm14, %v2557_v50, -inf  ;;  %vm2921_vm12 = vcmask 1041408  }
 0xa4c   :  { %2559 = vmax.xlane.f32.xlu0 %v2558_v49 }
 0xa50   :  { %2562 = vmax.xlane.f32.xlu0 %v2561_v57 }
 0xad1   :  { %v2612_v53 = vpop.xlane.xlu0 %2611  ;;  %v2615_v56 = vpop.xlane.xlu1 %2614 }
 0xad2   :  { %v2616_v2 = vsub.f32 %v2608_v44, %v2612_v53  ;;  %v2617_v27 = vsub.f32 %v2609_v43, %v2615_v56 }
 0xad4   :  { %v2618_v5 = vmul.f32 1.442695, %v2616_v2  ;;  %v2620_v26 = vmul.f32 1.442695, %v2617_v27 }
 0xad5   :  { %v2560_v7 = vpop.xlane.xlu0 %2559 }
 0xad6   :  { %4618 = vpow2.f32 %v2618_v5  ;;  %v2564_v16 = vsub.f32 %v2556_v47, %v2560_v7 }
 0xad7   :  { %4620 = vpow2.f32 %v2620_v26 }
 0xad8   :  { %v2566_v58 = vmul.f32 1.442695, %v2564_v16 }
 0xad9   :  { %v2563_v59 = vpop.xlane.xlu0 %2562 }
 0xada   :  { %4622 = vpow2.f32 %v2566_v58  ;;  %v2565_v60 = vsub.f32 %v2557_v50, %v2563_v59 }
 0xadc   :  { %v2568_v61 = vmul.f32 1.442695, %v2565_v60 }
 0xade   :  { %4624 = vpow2.f32 %v2568_v61 }
 0xae3   :  { %v4619_v63 = vpop.eup %4618 }
 0xae4   :  { %v4621_v4 = vpop.eup %4620  ;;  %v2622_v6 = vmul.f32 %v4619_v63, %v2307_v32 }
 0xae5   :  { %v2623_v8 = vmul.f32 %v4621_v4, %v5666_v30 }
 0xae6   :  { %v2624_v3 = vsel %vm500_vm9, %v2622_v6, 0.0 }
 0xae7   :  { %v4623_v14 = vpop.eup %4622  ;;  %2625 = vadd.xlane.f32.xlu1 %v2624_v3  ;;  %v2627_v11 = vsel %vm2056_vm14, %v2623_v8, 0.0 }
 0xae8   :  { %2628 = vadd.xlane.f32.xlu0 %v2627_v11  ;;  %v2570_v9 = vmul.f32 %v4623_v14, %v2307_v32 }
 0xaea   :  { %v2572_v20 = vsel %vm500_vm9, %v2570_v9, 0.0 }
 0xaeb   :  { %v4625_v38 = vpop.eup %4624  ;;  %2573 = vadd.xlane.f32.xlu1 %v2572_v20 }
 0xaec   :  { %v2571_v51 = vmul.f32 %v4625_v38, %v5666_v30 }
 0xaee   :  { %v2575_v18 = vsel %vm2056_vm14, %v2571_v51, 0.0 }
 0xaef   :  { %2576 = vadd.xlane.f32.xlu0 %v2575_v18  ;;  %2805 = vadd.xlane.f32.xlu1 %v2804_v17 }
 0xb1c   :  { %2882 = vxpose.xlu0.b32.start.end [1/1] (short) (narrow) %v5682_v52, 16 }
 0xb70   :  { %v2626_v22 = vpop.xlane.xlu1 %2625 }
 0xb71   :  { %v2629_v29 = vpop.xlane.xlu0 %2628  ;;  %vm2630_vm8 = vcmp.gt.f32.partialorder %v2626_v22, 0.0 }
 0xb72   :  { %vm2631_vm10 = vcmp.gt.f32.partialorder %v2629_v29, 0.0  ;;  %v2632_v25 = vsel %vm2630_vm8, %v2626_v22, 1.0 }
 0xb73   :  { %v2633_v32 = vsel %vm2631_vm10, %v2629_v29, 1.0  ;;  %4626 = vrcp.f32 %v2632_v25  ;;  %v3553_v29 = vld [vmem:[#allocation19] sm:$0x3] }
 0xb74   :  { %4628 = vrcp.f32 %v2633_v32  ;;  %v2574_v33 = vpop.xlane.xlu1 %2573 }
 0xb75   :  { %vm2578_vm4 = vcmp.gt.f32.partialorder %v2574_v33, 0.0 }
 0xb76   :  { %v2580_v30 = vsel %vm2578_vm4, %v2574_v33, 1.0 }
 0xb77   :  { %4630 = vrcp.f32 %v2580_v30 }
 0xb78   :  { %v2577_v28 = vpop.xlane.xlu0 %2576  ;;  %v2806_v36 = vpop.xlane.xlu1 %2805 }
 0xb79   :  { %vm2579_vm14 = vcmp.gt.f32.partialorder %v2577_v28, 0.0  ;;  %4632 = vrcp.f32 %v2806_v36 }
 0xb7a   :  { %v2581_v12 = vsel %vm2579_vm14, %v2577_v28, 1.0 }
 0xb7b   :  { %4634 = vrcp.f32 %v2581_v12 }
 0xb80   :  { %v4627_v23 = vpop.eup %4626 }
 0xb81   :  { %v4629_v37 = vpop.eup %4628  ;;  %v2636_v34 = vmul.f32 %v4627_v23, %v2622_v6 }
 0xb82   :  { %v2637_v35 = vmul.f32 %v4629_v37, %v2623_v8 }
 0xb83   :  { %4441 = vmatprep.mubr.msk.f32.mxu1 %vm500_vm9, %v2636_v34 }
 0xb84   :  { %v4631_v40 = vpop.eup %4630  ;;  %4442 = vmatmul.mubr.msk.f32.vlgmr.msra.gmra.mxu1 %vm500_vm9, %v2637_v35 }
 0xb85   :  { %4445 = vmatpush3.msk.msra.mxu1 %vm530_vm5, %v5615_v1  ;;  %v2584_v41 = vmul.f32 %v4631_v40, %v2570_v9 }
 0xb86   :  { %v4633_v31 = vpop.eup %4632  ;;  %4446 = vmatprep.subr.msk.mxu1 %vm530_vm5, %v5617_v55 }
 0xb87   :  { %4447 = vmatpush3.msk.msra.mxu1 %vm530_vm5, %v5617_v55  ;;  %4448 = vmatprep.mubr.msk.f32.mxu1 %vm500_vm9, %v2584_v41  ;;  %v2881_v42 = vmul.f32 %v4633_v31, %v2877_v19  ;;  %vm3176_vm5 = vcmask 91136  }
 0xb88   :  { %v4635_v43 = vpop.eup %4634 }
 0xb89   :  { %v2585_v44 = vmul.f32 %v4635_v43, %v2571_v51  ;;  %4458 = vmatprep.subr.msk.mxu1 %vm2921_vm12, %v2881_v42 }
 0xb8b   :  { %4449 = vmatmul.mubr.msk.f32.vlgmr.msra.gmra.mxu1 %vm500_vm9, %v2585_v44 }
 0xb8c   :  { %4459 = vmatpush3.msk.msra.mxu1 %vm2921_vm12, %v2881_v42 }
 0xb98   :  { %v2898_v1 = vpop.trf.xlu0 }
 0xb99   :  { %4460 = vmatprep.mubr.msk.f32.mxu1 %vm2914_vm13, %v2898_v1 }
 0xb9c   :  { %v2899_v45 = vpop.trf.xlu0 }
 0xb9d   :  { %4461 = vmatmul.mubr.msk.f32.vlgmr.msra.gmra.mxu1 %vm2914_vm13, %v2899_v45 }
 0xb9e   :  { %4472 = vmatprep.mubr.msk.f32.mxu1 %vm2914_vm13, %v2898_v1 }
 0xc44   :  { %v4443_v24 = vpop.f32.mrf.mxu1 }
 0xc46   :  { %v2712_v55 = vpop.f32.mrf.mxu1 }
 0xc4b   :  { %v4450_v46 = vpop.f32.mrf.mxu1 }
 0xc4c   :  { %v5714_v62 = vadd.f32 %v4450_v46, %v4443_v24 }
 0xc4d   :  { %v2793_v47 = vpop.f32.mrf.mxu1 }
 0xc4e   :  { %v5716_v48 = vadd.f32 %v2793_v47, %v2712_v55 }
 0xc5d   :  { %v4462_v49 = vpop.f32.mrf.mxu1 }
 0xc5e   :  { %v5719_v50 = vsub.f32 %v5585_v39, %v4462_v49  ;;  %v5733_v39 = vld [vmem:[%s5876_s24] sm:$0x3]  ;;  %s4961_s24 = smov [#allocation21]  }
 0xc5f   :  { %v2991_v57 = vpop.f32.mrf.mxu1  ;;  %s3946_s17 = sshll.u32 %s4961_s24, 4  ;;  %s3947_s17 = int_to_ptr.vmem [resolvable:$true] %s3946_s17 }
 0xc60   :  { %v5722_v53 = vsub.f32 %v5588_v54, %v2991_v57  ;;  %v3003_v56 = vmul.f32 %v5719_v50, %v5719_v50  ;;  %v3177_v54 = vsel %vm3176_vm5, %v5733_v39, 0.0  ;;  %s4868_s25 = scalar_lea.vmem %s3947_s17, 256  ;;  %p4873_p0 = scmp.lt.s32.totalorder %s3947_s17, %s3947_s17 }
 0xc61   :  { %p4869_p13 = scmp.ne.s32.totalorder %s3947_s17, %s4868_s25  ;;  %p4874_p1 = scmp.lt.s32.totalorder %s4868_s25, %s4868_s25 }
 0xc62   :  { %v3007_v2 = vsel %vm242_vm1, %v3003_v56, 0.0  ;;  %v3002_v27 = vmul.f32 %v5722_v53, %v5722_v53 }
 0xc63   :  { %3008 = vadd.xlane.f32.xlu1 %v3007_v2  ;;  %p4875_p2 = por %p4874_p1, %p4873_p0 }
 0xc64   :  { %v3004_v5 = vsel %vm242_vm1, %v3002_v27, 0.0 }
 0xc65   :  { %p4876_p3 = pnand %p4875_p2, %p4869_p13 }
 0xc67   :  { %3005 = vadd.xlane.f32.xlu1 %v3004_v5 }
 0xc6b   :  { %3178 = vadd.xlane.f32.xlu1 %v3177_v54 }
 0xc9e   :  { %3258 = vxpose.xlu1.b32.start.end [1/1] (short) (narrow) %v5733_v39, 16 }
 0xcec   :  { %v3009_v26 = vpop.xlane.xlu1 %3008 }
 0xced   :  { %4464 = vmatpush3.msra.mxu0 %v3009_v26 }
 0xcee   :  { %4465 = vmatprep.subr.mxu0 %v4957_v0 }
 0xcf0   :  { %v3006_v7 = vpop.xlane.xlu1 %3005 }
 0xcf1   :  { %4466 = vmatpush3.msra.mxu0 %v3006_v7 }
 0xcf2   :  { %4468 = vmatmul.mubr.msk.f32.vlgmr.msra.gmra.mxu0 %vm500_vm9, %v5682_v52  ;;  %4475 = vmatprep.subr.mxu0 %v4957_v0  ;;  %vm3381_vm9 = vcmask 257024  }
 0xcf3   :  { %4476 = vmatpush3.msk.msra.mxu0 %vm1110_vm3, %v5657_v10  ;;  %4479 = vmatprep.mubr.msk.f32.mxu0 %vm4958_vm0, %v4957_v0 }
 0xcf4   :  { %4477 = vmatprep.subr.mxu0 %v4957_v0  ;;  %v3179_v16 = vpop.xlane.xlu1 %3178 }
 0xcf5   :  { %4478 = vmatpush3.msra.mxu0 %v5659_v15  ;;  %4636 = vrcp.f32 %v3179_v16 }
 0xcf6   :  { %4480 = vmatmul.mubr.msk.f32.vlgmr.msra.gmra.mxu0 %vm1021_vm11, %v5733_v39  ;;  %4487 = vmatprep.subr.mxu0 %v4957_v0 }
 0xcf7   :  { %4491 = vmatprep.mubr.msk.f32.mxu0 %vm4958_vm0, %v4957_v0 }
 0xd02   :  { %v4637_v6 = vpop.eup %4636 }
 0xd1a   :  { %v3274_v4 = vpop.trf.xlu1 }
 0xd1e   :  { %v3275_v14 = vpop.trf.xlu1 }
 0xdb2   :  { %v3076_v52 = vpop.f32.mrf.mxu0 }
 0xdb3   :  { %v3080_v58 = vmul.f32 %v4633_v31, %v3076_v52 }
 0xdb4   :  { %v4469_v59 = vpop.f32.mrf.mxu0 }
 0xdb5   :  { %v3081_v60 = vadd.f32 1e-05, %v3080_v58 }
 0xdb6   :  { %v3253_v61 = vpop.f32.mrf.mxu0 }
 0xdb7   :  { %4638 = vrsqrt.f32 %v3081_v60  ;;  %v3257_v3 = vmul.f32 %v4637_v6, %v3253_v61 }
 0xdb8   :  { %v4481_v63 = vpop.f32.mrf.mxu0 }
 0xdc4   :  { %v4639_v8 = vpop.eup %4638 }
 0xdc5   :  { %4470 = vmatprep.subr.msk.mxu1 %vm2921_vm12, %v4639_v8 }
 0xdc6   :  { %4471 = vmatpush3.msk.msra.mxu1 %vm2921_vm12, %v4639_v8 }
 0xdc7   :  { %4473 = vmatmul.mubr.msk.f32.vlgmr.msra.gmra.mxu1 %vm2914_vm13, %v2899_v45  ;;  %4482 = vmatprep.subr.msk.mxu1 %vm2921_vm12, %v3257_v3 }
 0xdc8   :  { %4483 = vmatpush3.msk.msra.mxu1 %vm2921_vm12, %v3257_v3  ;;  %4484 = vmatprep.mubr.msk.f32.mxu1 %vm2914_vm13, %v3274_v4 }
 0xdcb   :  { %4485 = vmatmul.mubr.msk.f32.vlgmr.msra.gmra.mxu1 %vm2914_vm13, %v3275_v14 }
 0xdcc   :  { %4496 = vmatprep.mubr.msk.f32.mxu1 %vm2914_vm13, %v3274_v4 }
 0xe87   :  { %v5761_v11 = vpop.f32.mrf.mxu1 }
 0xe89   :  { %v5763_v9 = vpop.f32.mrf.mxu1 }
 0xe8b   :  { %v4486_v20 = vpop.f32.mrf.mxu1 }
 0xe8c   :  { %v5766_v38 = vsub.f32 %v5657_v10, %v4486_v20  ;;  %v3554_v10 = vsel %vm3176_vm5, %v3553_v29, 0.0 }
 0xe8d   :  { %v3365_v51 = vpop.f32.mrf.mxu1 }
 0xe8e   :  { %v5769_v17 = vsub.f32 %v5659_v15, %v3365_v51  ;;  %v3377_v18 = vmul.f32 %v5766_v38, %v5766_v38 }
 0xe90   :  { %v3382_v19 = vsel %vm3381_vm9, %v3377_v18, 0.0  ;;  %v3376_v21 = vmul.f32 %v5769_v17, %v5769_v17 }
 0xe91   :  { %3383 = vadd.xlane.f32.xlu0 %v3382_v19 }
 0xe92   :  { %v3378_v22 = vsel %vm242_vm1, %v3376_v21, 0.0 }
 0xe93   :  { %3379 = vadd.xlane.f32.xlu1 %v3378_v22 }
 0xe95   :  { %3555 = vadd.xlane.f32.xlu0 %v3554_v10 }
 0xec2   :  { %3635 = vxpose.xlu0.b32.start.end [1/1] (short) (narrow) %v3553_v29, 16 }
 0xeeb   :  { %4553 = vset.pattern.permute.xlu0 %v4960_v13 }
 0xf1a   :  { %v3384_v15 = vpop.xlane.xlu0 %3383 }
 0xf1b   :  { %4488 = vmatpush3.msk.msra.mxu0 %vm1110_vm3, %v3384_v15 }
 0xf1c   :  { %4489 = vmatprep.subr.mxu0 %v4957_v0  ;;  %v3380_v25 = vpop.xlane.xlu1 %3379 }
 0xf1d   :  { %4490 = vmatpush3.msra.mxu0 %v3380_v25 }
 0xf1e   :  { %4492 = vmatmul.mubr.msk.f32.vlgmr.msra.gmra.mxu0 %vm1021_vm11, %v5733_v39  ;;  %4499 = vmatprep.subr.mxu0 %v4957_v0  ;;  %v3556_v32 = vpop.xlane.xlu0 %3555 }
 0xf1f   :  { %4500 = vmatpush3.msk.msra.mxu0 %vm1110_vm3, %v5714_v62  ;;  %4503 = vmatprep.mubr.msk.f32.mxu0 %vm4958_vm0, %v4957_v0  ;;  %4640 = vrcp.f32 %v3556_v32 }
 0xf20   :  { %4501 = vmatprep.subr.mxu0 %v4957_v0 }
 0xf21   :  { %4502 = vmatpush3.msra.mxu0 %v5716_v48 }
 0xf22   :  { %4504 = vmatmul.mubr.msk.f32.vlgmr.msra.gmra.mxu0 %vm1021_vm11, %v3553_v29  ;;  %4511 = vmatprep.subr.mxu0 %v4957_v0 }
 0xf23   :  { %4515 = vmatprep.mubr.msk.f32.mxu0 %vm4958_vm0, %v4957_v0 }
 0xf2c   :  { %v4641_v37 = vpop.eup %4640 }
 0xf3e   :  { %v3651_v23 = vpop.trf.xlu0 }
 0xf42   :  { %v3652_v40 = vpop.trf.xlu0 }
 0xfde   :  { %v3454_v13 = vpop.f32.mrf.mxu0 }
 0xfdf   :  { %v3458_v33 = vmul.f32 %v4637_v6, %v3454_v13 }
 0xfe0   :  { %v4493_v30 = vpop.f32.mrf.mxu0 }
 0xfe1   :  { %v3459_v28 = vadd.f32 1e-05, %v3458_v33 }
 0xfe2   :  { %v3630_v36 = vpop.f32.mrf.mxu0 }
 0xfe3   :  { %4642 = vrsqrt.f32 %v3459_v28  ;;  %v3634_v35 = vmul.f32 %v4641_v37, %v3630_v36 }
 0xfe4   :  { %v4505_v12 = vpop.f32.mrf.mxu0 }
 0xff0   :  { %v4643_v34 = vpop.eup %4642 }
 0xff1   :  { %4494 = vmatprep.subr.msk.mxu1 %vm2921_vm12, %v4643_v34 }
 0xff2   :  { %4495 = vmatpush3.msk.msra.mxu1 %vm2921_vm12, %v4643_v34 }
 0xff3   :  { %4497 = vmatmul.mubr.msk.f32.vlgmr.msra.gmra.mxu1 %vm2914_vm13, %v3275_v14  ;;  %4506 = vmatprep.subr.msk.mxu1 %vm2921_vm12, %v3634_v35 }
 0xff4   :  { %4507 = vmatpush3.msk.msra.mxu1 %vm2921_vm12, %v3634_v35  ;;  %4508 = vmatprep.mubr.msk.f32.mxu1 %vm2914_vm13, %v3651_v23 }
 0xff7   :  { %4509 = vmatmul.mubr.msk.f32.vlgmr.msra.gmra.mxu1 %vm2914_vm13, %v3652_v40 }
 0xff8   :  { %4520 = vmatprep.mubr.msk.f32.mxu1 %vm2914_vm13, %v3651_v23 }
0x10b3   :  { %v4498_v41 = vpop.f32.mrf.mxu1 }
0x10b5   :  { %v3530_v31 = vpop.f32.mrf.mxu1 }
0x10b7   :  { %v4510_v42 = vpop.f32.mrf.mxu1 }
0x10b8   :  { %v5803_v43 = vsub.f32 %v5714_v62, %v4510_v42 }
0x10b9   :  { %v3742_v44 = vpop.f32.mrf.mxu1 }
0x10ba   :  { %v5806_v1 = vsub.f32 %v5716_v48, %v3742_v44  ;;  %v3754_v45 = vmul.f32 %v5803_v43, %v5803_v43 }
0x10bc   :  { %v3758_v24 = vsel %vm3381_vm9, %v3754_v45, 0.0  ;;  %v3753_v55 = vmul.f32 %v5806_v1, %v5806_v1 }
0x10bd   :  { %3759 = vadd.xlane.f32.xlu1 %v3758_v24 }
0x10be   :  { %v3755_v46 = vsel %vm242_vm1, %v3753_v55, 0.0 }
0x10c1   :  { %3756 = vadd.xlane.f32.xlu1 %v3755_v46 }
0x10d2   :  { %3163 = vperm.xlu1 %4552, %v5763_v9  }
0x10d6   :  { %3168 = vperm.xlu1 %4552, %v5761_v11  }
0x10da   :  { %3541 = vperm.xlu1 %4552, %v3530_v31  }
0x10de   :  { %3546 = vperm.xlu1 %4552, %v4498_v41  }
0x1146   :  { %v3760_v62 = vpop.xlane.xlu1 %3759 }
0x1147   :  { %4512 = vmatpush3.msk.msra.mxu0 %vm1110_vm3, %v3760_v62 }
0x1148   :  { %4513 = vmatprep.subr.mxu0 %v4957_v0 }
0x114a   :  { %v3757_v47 = vpop.xlane.xlu1 %3756 }
0x114b   :  { %4514 = vmatpush3.msra.mxu0 %v3757_v47 }
0x114c   :  { %4516 = vmatmul.mubr.msk.f32.vlgmr.msra.gmra.mxu0 %vm1021_vm11, %v3553_v29 }
0x114e   :  { %v3164_v48 = vpop.permute.xlu1 %3163 }
0x114f   :  { %v3171_v49 = vmul.f32 %v3164_v48, %v5722_v53 }
0x1151   :  { %3173 = vst.msk [vmem:[#allocation20] sm:$0xff] %vm242_vm1, %v3171_v49 }
0x1152   :  { %v3169_v57 = vpop.permute.xlu1 %3168 }
0x1153   :  { %v3172_v56 = vmul.f32 %v3169_v57, %v5719_v50 }
0x1155   :  { %3174 = vst.msk [vmem:[#allocation20 + $0x8] sm:$0xff] %vm242_vm1, %v3172_v56 }
0x1156   :  { %v3542_v2 = vpop.permute.xlu1 %3541 }
0x1157   :  { %v3549_v27 = vmul.f32 %v3542_v2, %v5769_v17 }
0x1159   :  { %3551 = vst.msk [vmem:[#allocation21] sm:$0xff] %vm242_vm1, %v3549_v27 }
0x115a   :  { %v3547_v0 = vpop.permute.xlu1 %3546 }
0x115b   :  { %v3550_v5 = vmul.f32 %v3547_v0, %v5766_v38 }
0x115d   :  { %3552 = vst.msk [vmem:[#allocation21 + $0x8] sm:$0xf] %vm3381_vm9, %v3550_v5 }
0x120c   :  { %v3830_v39 = vpop.f32.mrf.mxu0 }
0x120d   :  { %v3834_v54 = vmul.f32 %v4641_v37, %v3830_v39 }
0x120e   :  { %v4517_v53 = vpop.f32.mrf.mxu0 }
0x120f   :  { %v3835_v26 = vadd.f32 1e-05, %v3834_v54 }
0x1211   :  { %4644 = vrsqrt.f32 %v3835_v26 }
0x121e   :  { %v4645_v7 = vpop.eup %4644 }
0x121f   :  { %4518 = vmatprep.subr.msk.mxu1 %vm2921_vm12, %v4645_v7 }
0x1220   :  { %4519 = vmatpush3.msk.msra.mxu1 %vm2921_vm12, %v4645_v7 }
0x1221   :  { %4521 = vmatmul.mubr.msk.f32.vlgmr.msra.gmra.mxu1 %vm2914_vm13, %v3652_v40 }
0x12e1   :  { %v4522_v50 = vpop.f32.mrf.mxu1 }
0x12e2   :  { %3922 = vperm.xlu1 %4552, %v4522_v50  }
0x12e3   :  { %v3906_v52 = vpop.f32.mrf.mxu1 }
0x12e4   :  { %4879 = shalt.err (!%p4876_p3)
}
0x12e5   :  { %3952 = dma.vmem_to_hbm [thread:$0]  %s3947_s17, 256, %s5879_s27, [#allocation22], %s4946_s6, %s4946_s6, %s4947_s10   ;;  %3917 = vperm.xlu0 %4553, %v3906_v52  }
0x12e6   :  { %s4888_s9 = scalar_lea.vmem %s3935_s20, 256  ;;  %p4893_p5 = scmp.lt.s32.totalorder %s3935_s20, %s3935_s20 }
0x12e7   :  { %p4889_p4 = scmp.ne.s32.totalorder %s3935_s20, %s4888_s9  ;;  %p4894_p6 = scmp.lt.s32.totalorder %s4888_s9, %s4888_s9 }
0x12e9   :  { %p4895_p7 = por %p4894_p6, %p4893_p5 }
0x12eb   :  { %p4896_p8 = pnand %p4895_p7, %p4889_p4 }
0x12ed   :  { %4899 = shalt.err (!%p4896_p8)
}
0x12ee   :  { %3940 = dma.vmem_to_hbm [thread:$0]  %s3935_s20, 256, %s5878_s26, [#allocation4], %s4946_s6, %s4946_s6, %s4947_s10  }
0x12ef   :  { %s4963_s18 = smov [#allocation23]  }
0x12f0   :  { %s3958_s3 = sshll.u32 %s4963_s18, 4  ;;  %s3959_s3 = int_to_ptr.vmem [resolvable:$true] %s3958_s3 }
0x12f1   :  { %s4908_s27 = scalar_lea.vmem %s3959_s3, 256  ;;  %p4913_p10 = scmp.lt.s32.totalorder %s3959_s3, %s3959_s3 }
0x12f2   :  { %p4909_p9 = scmp.ne.s32.totalorder %s3959_s3, %s4908_s27  ;;  %p4914_p11 = scmp.lt.s32.totalorder %s4908_s27, %s4908_s27 }
0x12f4   :  { %p4915_p12 = por %p4914_p11, %p4913_p10 }
0x12f6   :  { %p4916_p13 = pnand %p4915_p12, %p4909_p9 }
0x135d   :  { %v3923_v16 = vpop.permute.xlu1 %3922 }
0x135e   :  { %v3926_v58 = vmul.f32 %v3923_v16, %v5803_v43 }
0x1360   :  { %v3918_v59 = vpop.permute.xlu0 %3917  ;;  %3928 = vst.msk [vmem:[#allocation23 + $0x8] sm:$0xf] %vm3381_vm9, %v3926_v58 }
0x1361   :  { %v3925_v60 = vmul.f32 %v3918_v59, %v5806_v1 }
0x1363   :  { %3927 = vst.msk [vmem:[#allocation23] sm:$0xff] %vm242_vm1, %v3925_v60 }
0x1364   :  { %4919 = shalt.err (!%p4916_p13)
}
0x1365   :  { %s5916_s11 = sld [smem:[#allocation45_spill]] }
0x136b   :  { %3964 = dma.vmem_to_hbm [thread:$0]  %s3959_s3, 256, %s5916_s11, [#allocation22], %s4946_s6, %s4946_s6, %s4947_s10  }
0x136c   :  { %4940 = dma.done.wait [#allocation4], 256  }
0x136d   :  { %4941 = vsyncadd [#allocation4], 4294967040 }
0x136e   :  { %4942 = dma.done.wait [#allocation22], 512  }
0x136f   :  { %4943 = vsyncadd [#allocation22], 4294966784 }
0x1370   :  { %3974 = vsyncpa [#allocation3], 1 }
0x1371   :  { %3975 = vsyncpa [#allocation6], 1 }
0x1372   :  { %3976 = vsyncpa [#allocation9], 1 }
0x1373   :  { %3977 = vsyncpa [#allocation12], 1 }
0x1374   :  { %3978 = vsyncpa [#allocation15], 1 }
0x1375   :  { %3979 = vsyncpa [#allocation18], 1 }
0x1376   :  { %3980 = vsyncpa [#allocation4], 1 }
0x1377   :  { %3981 = vsyncpa [#allocation22], 1 }

</bundles_post_ra>
